<compile_context>
chip_gen: v7x
topology: tpu7x:2x2x1
jax: 0.10.0
libtpu: 0.0.40
codegen_flags: <defaults>
</compile_context>

<pallas_src>
import jax
import jax.numpy as jnp
import numpy as np
from jax.experimental import pallas as pl
from jax.experimental.pallas import tpu as pltpu

_HP = 128            # padded hidden width / per-gate lane block
_GW = 3 * _HP        # padded gate axis (r | z | n at lane offsets 0 / 128 / 256)

# Row offsets of the weight blocks inside the packed weight slab (each block is 128 rows).
_R_IHD, _R_IHE, _R_HH, _R_OUT = 0, _HP, 2 * _HP, 3 * _HP
# Row offsets of the small (1, x) operands inside the packed bias/misc slab (8-aligned).
_B_GI, _B_HHN, _B_OUT, _B_DEC = 0, 8, 16, 24


def _make_decoder_kernel(V, bound, eos_token):
    def kernel(w_ref, emb_ref, b_ref, logp_ref, ans_ref, cnt_ref,
               gi_tbl_scr, done_scr):
        # ---- hoisted constants (loop below is fully unrolled; these stay in vregs) ----
        lane = jax.lax.broadcasted_iota(jnp.int32, (1, V), 1)
        b_gi = b_ref[pl.ds(_B_GI, 1), pl.ds(0, _GW)]     # b_ih + b_hh[r,z] folded
        b_hhn = b_ref[pl.ds(_B_HHN, 1), pl.ds(0, _HP)]   # b_hh n-block only
        b_out = b_ref[pl.ds(_B_OUT, 1), pl.ds(0, V)]
        dec = b_ref[pl.ds(_B_DEC, 1), pl.ds(0, _HP)]     # decision vector (lane-padded)

        # ---- one-time precompute (amortized over all decode steps):
        # gi_tbl[v] = emb[v] @ W_ihe + dec @ W_ihd + b_ih + b_hh[r,z]
        gi_tbl_scr[...] = (
            jnp.dot(emb_ref[...], w_ref[pl.ds(_R_IHE, _HP), pl.ds(0, _GW)],
                    preferred_element_type=jnp.float32)
            + jnp.dot(dec, w_ref[pl.ds(_R_IHD, _HP), pl.ds(0, _GW)],
                      preferred_element_type=jnp.float32)
            + b_gi)

        done_scr[0] = 0          # EOS-emitted flag (scalar; never feeds the vector path)
        cnt_ref[0] = 0           # number of log_proba rows appended
        cnt_ref[1] = 0           # number of answer tokens appended

        # Recurrence state as plain values (vregs across the unrolled loop).
        h = dec                                     # hidden = dropout(decision) == decision
        onehot = (lane == 0).astype(jnp.float32)    # SOS token = 0

        for di in range(bound):
            # ---- vector recurrence (free-running, no conditionals) ----
            gh = jnp.dot(h, w_ref[pl.ds(_R_HH, _HP), pl.ds(0, _GW)],
                         preferred_element_type=jnp.float32)                 # (1, 384)
            gi = jnp.dot(onehot, gi_tbl_scr[...],
                         preferred_element_type=jnp.float32)                 # (1, 384)
            # PyTorch GRU gate order: r, z, n — all slices start at 128-lane boundaries.
            r = jax.nn.sigmoid(gi[:, 0:_HP] + gh[:, 0:_HP])
            z = jax.nn.sigmoid(gi[:, _HP:2 * _HP] + gh[:, _HP:2 * _HP])
            n = jnp.tanh(gi[:, 2 * _HP:_GW] + r * (gh[:, 2 * _HP:_GW] + b_hhn))
            h = (1.0 - z) * n + z * h

            logits = jnp.dot(h, w_ref[pl.ds(_R_OUT, _HP), pl.ds(0, V)],
                             preferred_element_type=jnp.float32) + b_out     # (1, V)
            m = jnp.max(logits, axis=1, keepdims=True)
            # greedy top-1 straight from logits (log_softmax is a monotone per-row shift);
            # first-index tie-break matches numpy argmax.
            ni_vec = jnp.min(jnp.where(logits == m, lane, V), axis=1, keepdims=True)
            onehot = (lane == ni_vec).astype(jnp.float32)   # vector-only feedback

            # ---- off-critical-path epilogue ----
            lse = m + jnp.log(jnp.sum(jnp.exp(logits - m), axis=1, keepdims=True))
            logp_ref[pl.ds(di, 1), :] = logits - lse        # rows past EOS: unused garbage

            # ---- scalar side effects (branch-free, gated by done flag) ----
            ni_s = jnp.max(ni_vec)                           # (1,1) -> scalar
            is_eos = (ni_s == eos_token).astype(jnp.int32)
            live = 1 - done_scr[0]
            emit = live * (1 - is_eos)
            ans_ref[di] = emit * ni_s + (emit - 1)           # ni when emitted, else -1
            cnt_ref[0] = cnt_ref[0] + live
            cnt_ref[1] = cnt_ref[1] + emit
            done_scr[0] = done_scr[0] + live * is_eos

    return kernel


def _pack_params(params, decision_vector):
    """Pad / fold / pack the module parameters into 3 DMA slabs."""
    emb, w_ihd, w_ihe, w_hh, b_ih, b_hh, w_out, b_out = [
        np.asarray(p, np.float32) for p in params]
    dec = np.asarray(decision_vector, np.float32)
    V, E = emb.shape
    T = w_hh.shape[0]
    assert T <= _HP and E <= _HP, (T, E)
    assert V % 128 == 0, V
    LW = max(_GW, V)

    def gate_pad(w):                       # (rows, 3T) -> (rows, 384), 128-lane gate blocks
        out = np.zeros((w.shape[0], _GW), np.float32)
        for g in range(3):
            out[:, g * _HP:g * _HP + T] = w[:, g * T:(g + 1) * T]
        return out

    def row_pad(w, rows):
        out = np.zeros((rows, w.shape[1]), np.float32)
        out[:w.shape[0]] = w
        return out

    def lane_pad(w, lanes):
        out = np.zeros((w.shape[0], lanes), np.float32)
        out[:, :w.shape[1]] = w
        return out

    w_slab = np.concatenate([
        lane_pad(row_pad(gate_pad(w_ihd), _HP), LW),   # rows   0:128  W_ihd
        lane_pad(row_pad(gate_pad(w_ihe), _HP), LW),   # rows 128:256  W_ihe
        lane_pad(row_pad(gate_pad(w_hh), _HP), LW),    # rows 256:384  W_hh
        lane_pad(row_pad(w_out, _HP), LW),             # rows 384:512  W_out
    ], axis=0)                                         # (512, LW)

    emb_p = lane_pad(emb, _HP)                         # (V, 128)

    b_slab = np.zeros((32, LW), np.float32)
    b_hh_rz = np.concatenate([b_hh[:, :2 * T], np.zeros((1, T), np.float32)], axis=1)
    b_slab[_B_GI:_B_GI + 1, :_GW] = gate_pad(b_ih) + gate_pad(b_hh_rz)
    b_slab[_B_HHN:_B_HHN + 1, :T] = b_hh[:, 2 * T:3 * T]
    b_slab[_B_OUT:_B_OUT + 1, :V] = b_out
    b_slab[_B_DEC:_B_DEC + 1, :T] = dec
    return jnp.asarray(w_slab), jnp.asarray(emb_p), jnp.asarray(b_slab)


def words_decoder_forward(params, decision_vector, *, bound, eos_token):
    V = np.asarray(params[0]).shape[0]
    w_slab, emb_p, b_slab = _pack_params(params, decision_vector)

    out_shapes = (
        jax.ShapeDtypeStruct((bound, V), jnp.float32),   # log_probas (valid rows: cnt[0])
        jax.ShapeDtypeStruct((bound,), jnp.int32),       # answer tokens (-1 padded)
        jax.ShapeDtypeStruct((2,), jnp.int32),           # [n_log_probas, n_answer]
    )
    fn = pl.pallas_call(
        _make_decoder_kernel(V, bound, eos_token),
        out_shape=out_shapes,
        in_specs=[pl.BlockSpec(memory_space=pltpu.MemorySpace.VMEM)] * 3,
        out_specs=(
            pl.BlockSpec(memory_space=pltpu.MemorySpace.VMEM),
            pl.BlockSpec(memory_space=pltpu.MemorySpace.SMEM),
            pl.BlockSpec(memory_space=pltpu.MemorySpace.SMEM),
        ),
        scratch_shapes=[
            pltpu.VMEM((V, _GW), jnp.float32),   # precomputed gate-input table
            pltpu.SMEM((1,), jnp.int32),         # done (EOS emitted) flag
        ],
    )
    return fn(w_slab, emb_p, b_slab)


def reference_forward(params, decision_vector, *, bound, eos_token):
    """Pure-numpy re-implementation of the PyTorch forward (eval mode, ta=None)."""
    emb, w_ihd, w_ihe, w_hh, b_ih, b_hh, w_out, b_out = [np.asarray(p) for p in params]
    dec = np.asarray(decision_vector)
    T = dec.shape[1]
    h = dec.copy()
    tok = 0
    log_probas, answer = [], []
    for _ in range(bound):
        e = emb[tok:tok + 1]
        gi = dec @ w_ihd + b_ih + e @ w_ihe
        gh = h @ w_hh + b_hh
        r = 1.0 / (1.0 + np.exp(-(gi[:, :T] + gh[:, :T])))
        z = 1.0 / (1.0 + np.exp(-(gi[:, T:2 * T] + gh[:, T:2 * T])))
        n = np.tanh(gi[:, 2 * T:] + r * gh[:, 2 * T:])
        h = (1.0 - z) * n + z * h
        logits = h @ w_out + b_out
        m = logits.max(axis=1, keepdims=True)
        logp = logits - (m + np.log(np.exp(logits - m).sum(axis=1, keepdims=True)))
        log_probas.append(logp)
        ni = int(logp[0].argmax())
        if ni == eos_token:
            break
        answer.append(ni)
        tok = ni
    return answer, log_probas


if __name__ == "__main__":
    # Small synthetic configuration implied by the module's __init__:
    lang_size = 128      # vocabulary (lang_size)
    embedding_dim = 32   # embedding dim
    tracking_dim = 32    # GRU hidden / tracking dim
    bound = 8            # max decoded words
    EOS_token = 1

    key = jax.random.PRNGKey(0)
    ks = jax.random.split(key, 9)
    scale = 0.1
    emb = (scale * jax.random.normal(ks[0], (lang_size, embedding_dim))).astype(jnp.float32)
    # GRU weights, pre-transposed to (in, 3*hidden); input block split: [decision | embedding]
    w_ihd = (scale * jax.random.normal(ks[1], (tracking_dim, 3 * tracking_dim))).astype(jnp.float32)
    w_ihe = (scale * jax.random.normal(ks[2], (embedding_dim, 3 * tracking_dim))).astype(jnp.float32)
    w_hh = (scale * jax.random.normal(ks[3], (tracking_dim, 3 * tracking_dim))).astype(jnp.float32)
    b_ih = (scale * jax.random.normal(ks[4], (1, 3 * tracking_dim))).astype(jnp.float32)
    b_hh = (scale * jax.random.normal(ks[5], (1, 3 * tracking_dim))).astype(jnp.float32)
    # output Linear, pre-transposed to (hidden, vocab)
    w_out = (scale * jax.random.normal(ks[6], (tracking_dim, lang_size))).astype(jnp.float32)
    b_out = (scale * jax.random.normal(ks[7], (1, lang_size))).astype(jnp.float32)
    decision_vector = jax.random.normal(ks[8], (1, tracking_dim)).astype(jnp.float32)

    params = (emb, w_ihd, w_ihe, w_hh, b_ih, b_hh, w_out, b_out)

    logp_pad, ans_pad, counts = words_decoder_forward(
        params, decision_vector, bound=bound, eos_token=EOS_token)
    jax.block_until_ready((logp_pad, ans_pad, counts))

    n_log = int(counts[0])
    n_ans = int(counts[1])
    kernel_answer = [int(t) for t in np.asarray(ans_pad)[:n_ans]]
    kernel_logps = np.asarray(logp_pad)[:n_log]

    ref_answer, ref_logps = reference_forward(
        params, decision_vector, bound=bound, eos_token=EOS_token)

    assert n_log == len(ref_logps), (n_log, len(ref_logps))
    assert n_ans == len(ref_answer), (n_ans, len(ref_answer))
    assert kernel_answer == ref_answer, (kernel_answer, ref_answer)
    assert np.allclose(kernel_logps, np.concatenate(ref_logps, axis=0),
                       atol=1e-4, rtol=1e-4)

    print("KERNEL_OK")
</pallas_src>

<mosaic_0001>
module attributes {stable_mosaic.version = 11 : i64} {
  func.func @kernel(%arg0: memref<512x384xf32, #tpu.memory_space<vmem>>, %arg1: memref<128x128xf32, #tpu.memory_space<vmem>>, %arg2: memref<32x384xf32, #tpu.memory_space<vmem>>, %arg3: memref<8x128xf32, #tpu.memory_space<vmem>>, %arg4: memref<8xi32, #tpu.memory_space<smem>>, %arg5: memref<2xi32, #tpu.memory_space<smem>>, %arg6: memref<128x384xf32, #tpu.memory_space<vmem>>, %arg7: memref<1xi32, #tpu.memory_space<smem>>) attributes {dimension_semantics = [], scalar_prefetch = 0 : i64, scratch_operands = 2 : i64, tpu.core_type = #tpu.core_type<tc>} {
    %0 = tpu.iota {dimensions = array<i32: 1>} : vector<1x128xi32>
    %c0 = arith.constant 0 : index
    %c0_0 = arith.constant 0 : index
    %1 = vector.load %arg2[%c0, %c0_0] : memref<32x384xf32, #tpu.memory_space<vmem>>, vector<1x384xf32>
    %c8 = arith.constant 8 : index
    %c0_1 = arith.constant 0 : index
    %2 = vector.load %arg2[%c8, %c0_1] : memref<32x384xf32, #tpu.memory_space<vmem>>, vector<1x128xf32>
    %c16 = arith.constant 16 : index
    %c0_2 = arith.constant 0 : index
    %3 = vector.load %arg2[%c16, %c0_2] : memref<32x384xf32, #tpu.memory_space<vmem>>, vector<1x128xf32>
    %c24 = arith.constant 24 : index
    %c0_3 = arith.constant 0 : index
    %4 = vector.load %arg2[%c24, %c0_3] : memref<32x384xf32, #tpu.memory_space<vmem>>, vector<1x128xf32>
    %c0_4 = arith.constant 0 : index
    %c0_5 = arith.constant 0 : index
    %5 = vector.load %arg1[%c0_4, %c0_5] : memref<128x128xf32, #tpu.memory_space<vmem>>, vector<128x128xf32>
    %c128 = arith.constant 128 : index
    %c0_6 = arith.constant 0 : index
    %6 = vector.load %arg0[%c128, %c0_6] : memref<512x384xf32, #tpu.memory_space<vmem>>, vector<128x384xf32>
    %cst = arith.constant dense<0.000000e+00> : vector<128x384xf32>
    %7 = tpu.matmul %5, %6, %cst {dimension_numbers = #tpu.dot_dimension_numbers<[1], [0], [0], [1], [0, 0, 1, 1], [], []>} : vector<128x128xf32>, vector<128x384xf32>, vector<128x384xf32> -> vector<128x384xf32>
    %c0_7 = arith.constant 0 : index
    %c0_8 = arith.constant 0 : index
    %8 = vector.load %arg0[%c0_7, %c0_8] : memref<512x384xf32, #tpu.memory_space<vmem>>, vector<128x384xf32>
    %cst_9 = arith.constant dense<0.000000e+00> : vector<1x384xf32>
    %9 = tpu.matmul %4, %8, %cst_9 {dimension_numbers = #tpu.dot_dimension_numbers<[1], [0], [0], [1], [0, 0, 1, 1], [], []>} : vector<1x128xf32>, vector<128x384xf32>, vector<1x384xf32> -> vector<1x384xf32>
    %10 = vector.broadcast %9 : vector<1x384xf32> to vector<128x384xf32>
    %11 = arith.addf %7, %10 : vector<128x384xf32>
    %12 = vector.broadcast %1 : vector<1x384xf32> to vector<128x384xf32>
    %13 = arith.addf %11, %12 : vector<128x384xf32>
    %c0_10 = arith.constant 0 : index
    %c0_11 = arith.constant 0 : index
    %14 = vector.load %arg6[%c0_10, %c0_11] : memref<128x384xf32, #tpu.memory_space<vmem>>, vector<128x384xf32>
    tpu.vector_store %arg6[%c0_10, %c0_11], %13 {strides = array<i32>} : memref<128x384xf32, #tpu.memory_space<vmem>>, vector<128x384xf32>,
    %c0_i32 = arith.constant 0 : i32
    %c0_12 = arith.constant 0 : index
    %15 = memref.load %arg7[%c0_12] : memref<1xi32, #tpu.memory_space<smem>>
    memref.store %c0_i32, %arg7[%c0_12] : memref<1xi32, #tpu.memory_space<smem>>
    %c0_i32_13 = arith.constant 0 : i32
    %c0_14 = arith.constant 0 : index
    %16 = memref.load %arg5[%c0_14] : memref<2xi32, #tpu.memory_space<smem>>
    memref.store %c0_i32_13, %arg5[%c0_14] : memref<2xi32, #tpu.memory_space<smem>>
    %c0_i32_15 = arith.constant 0 : i32
    %c1 = arith.constant 1 : index
    %17 = memref.load %arg5[%c1] : memref<2xi32, #tpu.memory_space<smem>>
    memref.store %c0_i32_15, %arg5[%c1] : memref<2xi32, #tpu.memory_space<smem>>
    %c0_i32_16 = arith.constant 0 : i32
    %18 = vector.broadcast %c0_i32_16 : i32 to vector<1x128xi32>
    %19 = arith.cmpi eq, %0, %18 : vector<1x128xi32>
    %20 = arith.extui %19 : vector<1x128xi1> to vector<1x128xi32>
    %21 = arith.sitofp %20 : vector<1x128xi32> to vector<1x128xf32>
    %c256 = arith.constant 256 : index
    %c0_17 = arith.constant 0 : index
    %22 = vector.load %arg0[%c256, %c0_17] : memref<512x384xf32, #tpu.memory_space<vmem>>, vector<128x384xf32>
    %cst_18 = arith.constant dense<0.000000e+00> : vector<1x384xf32>
    %23 = tpu.matmul %4, %22, %cst_18 {dimension_numbers = #tpu.dot_dimension_numbers<[1], [0], [0], [1], [0, 0, 1, 1], [], []>} : vector<1x128xf32>, vector<128x384xf32>, vector<1x384xf32> -> vector<1x384xf32>
    %c0_19 = arith.constant 0 : index
    %c0_20 = arith.constant 0 : index
    %24 = vector.load %arg6[%c0_19, %c0_20] : memref<128x384xf32, #tpu.memory_space<vmem>>, vector<128x384xf32>
    %cst_21 = arith.constant dense<0.000000e+00> : vector<1x384xf32>
    %25 = tpu.matmul %21, %24, %cst_21 {dimension_numbers = #tpu.dot_dimension_numbers<[1], [0], [0], [1], [0, 0, 1, 1], [], []>} : vector<1x128xf32>, vector<128x384xf32>, vector<1x384xf32> -> vector<1x384xf32>
    %26 = vector.extract_strided_slice %25 {offsets = [0, 0], sizes = [1, 128], strides = [1, 1]} : vector<1x384xf32> to vector<1x128xf32>
    %27 = vector.extract_strided_slice %23 {offsets = [0, 0], sizes = [1, 128], strides = [1, 1]} : vector<1x384xf32> to vector<1x128xf32>
    %28 = arith.addf %26, %27 : vector<1x128xf32>
    %29 = arith.negf %28 : vector<1x128xf32>
    %30 = math.exp %29 : vector<1x128xf32>
    %cst_22 = arith.constant 1.000000e+00 : f32
    %31 = vector.broadcast %cst_22 : f32 to vector<1x128xf32>
    %32 = arith.addf %31, %30 : vector<1x128xf32>
    %33 = arith.divf %31, %32 : vector<1x128xf32>
    %34 = vector.extract_strided_slice %25 {offsets = [0, 128], sizes = [1, 128], strides = [1, 1]} : vector<1x384xf32> to vector<1x128xf32>
    %35 = vector.extract_strided_slice %23 {offsets = [0, 128], sizes = [1, 128], strides = [1, 1]} : vector<1x384xf32> to vector<1x128xf32>
    %36 = arith.addf %34, %35 : vector<1x128xf32>
    %37 = arith.negf %36 : vector<1x128xf32>
    %38 = math.exp %37 : vector<1x128xf32>
    %cst_23 = arith.constant 1.000000e+00 : f32
    %39 = vector.broadcast %cst_23 : f32 to vector<1x128xf32>
    %40 = arith.addf %39, %38 : vector<1x128xf32>
    %41 = arith.divf %39, %40 : vector<1x128xf32>
    %42 = vector.extract_strided_slice %25 {offsets = [0, 256], sizes = [1, 128], strides = [1, 1]} : vector<1x384xf32> to vector<1x128xf32>
    %43 = vector.extract_strided_slice %23 {offsets = [0, 256], sizes = [1, 128], strides = [1, 1]} : vector<1x384xf32> to vector<1x128xf32>
    %44 = arith.addf %43, %2 : vector<1x128xf32>
    %45 = arith.mulf %33, %44 : vector<1x128xf32>
    %46 = arith.addf %42, %45 : vector<1x128xf32>
    %47 = math.tanh %46 : vector<1x128xf32>
    %cst_24 = arith.constant 1.000000e+00 : f32
    %48 = vector.broadcast %cst_24 : f32 to vector<1x128xf32>
    %49 = arith.subf %48, %41 : vector<1x128xf32>
    %50 = arith.mulf %49, %47 : vector<1x128xf32>
    %51 = arith.mulf %41, %4 : vector<1x128xf32>
    %52 = arith.addf %50, %51 : vector<1x128xf32>
    %c384 = arith.constant 384 : index
    %c0_25 = arith.constant 0 : index
    %53 = vector.load %arg0[%c384, %c0_25] : memref<512x384xf32, #tpu.memory_space<vmem>>, vector<128x128xf32>
    %cst_26 = arith.constant dense<0.000000e+00> : vector<1x128xf32>
    %54 = tpu.matmul %52, %53, %cst_26 {dimension_numbers = #tpu.dot_dimension_numbers<[1], [0], [0], [1], [0, 0, 1, 1], [], []>} : vector<1x128xf32>, vector<128x128xf32>, vector<1x128xf32> -> vector<1x128xf32>
    %55 = arith.addf %54, %3 : vector<1x128xf32>
    %cst_27 = arith.constant dense<0xFF800000> : vector<1xf32>
    %56 = vector.multi_reduction <maximumf>, %55, %cst_27 [1] : vector<1x128xf32> to vector<1xf32>
    %57 = vector.shape_cast %56 : vector<1xf32> to vector<1x1xf32>
    %58 = vector.broadcast %57 : vector<1x1xf32> to vector<1x128xf32>
    %59 = arith.cmpf oeq, %55, %58 : vector<1x128xf32>
    %c128_i32 = arith.constant 128 : i32
    %60 = vector.broadcast %c128_i32 : i32 to vector<1x128xi32>
    %61 = arith.select %59, %0, %60 : vector<1x128xi1>, vector<1x128xi32>
    %cst_28 = arith.constant dense<2147483647> : vector<1xi32>
    %62 = vector.multi_reduction <minsi>, %61, %cst_28 [1] : vector<1x128xi32> to vector<1xi32>
    %63 = vector.shape_cast %62 : vector<1xi32> to vector<1x1xi32>
    %64 = vector.broadcast %63 : vector<1x1xi32> to vector<1x128xi32>
    %65 = arith.cmpi eq, %0, %64 : vector<1x128xi32>
    %66 = arith.extui %65 : vector<1x128xi1> to vector<1x128xi32>
    %67 = arith.sitofp %66 : vector<1x128xi32> to vector<1x128xf32>
    %68 = vector.broadcast %57 : vector<1x1xf32> to vector<1x128xf32>
    %69 = arith.subf %55, %68 : vector<1x128xf32>
    %70 = math.exp %69 : vector<1x128xf32>
    %cst_29 = arith.constant dense<0.000000e+00> : vector<1xf32>
    %71 = vector.multi_reduction <add>, %70, %cst_29 [1] : vector<1x128xf32> to vector<1xf32>
    %72 = vector.shape_cast %71 : vector<1xf32> to vector<1x1xf32>
    %73 = math.log %72 : vector<1x1xf32>
    %74 = arith.addf %57, %73 : vector<1x1xf32>
    %75 = vector.broadcast %74 : vector<1x1xf32> to vector<1x128xf32>
    %76 = arith.subf %55, %75 : vector<1x128xf32>
    %c0_30 = arith.constant 0 : index
    %c0_31 = arith.constant 0 : index
    %77 = vector.load %arg3[%c0_30, %c0_31] : memref<8x128xf32, #tpu.memory_space<vmem>>, vector<1x128xf32>
    tpu.vector_store %arg3[%c0_30, %c0_31], %76 {strides = array<i32>} : memref<8x128xf32, #tpu.memory_space<vmem>>, vector<1x128xf32>,
    %78 = vector.shape_cast %63 : vector<1x1xi32> to vector<1x1x1xi32>
    %cst_32 = arith.constant dense<-2147483648> : vector<1xi32>
    %79 = vector.multi_reduction <maxsi>, %78, %cst_32 [1, 2] : vector<1x1x1xi32> to vector<1xi32>
    %80 = vector.shape_cast %79 : vector<1xi32> to vector<1x1x1xi32>
    %81 = vector.extract %80[0, 0, 0] : i32 from vector<1x1x1xi32>
    %c1_i32 = arith.constant 1 : i32
    %82 = arith.cmpi eq, %81, %c1_i32 : i32
    %83 = arith.extui %82 : i1 to i32
    %c0_33 = arith.constant 0 : index
    %84 = memref.load %arg7[%c0_33] : memref<1xi32, #tpu.memory_space<smem>>
    %c1_i32_34 = arith.constant 1 : i32
    %85 = arith.subi %c1_i32_34, %84 : i32
    %c1_i32_35 = arith.constant 1 : i32
    %86 = arith.subi %c1_i32_35, %83 : i32
    %87 = arith.muli %85, %86 : i32
    %88 = arith.muli %87, %81 : i32
    %c1_i32_36 = arith.constant 1 : i32
    %89 = arith.subi %87, %c1_i32_36 : i32
    %90 = arith.addi %88, %89 : i32
    %c0_37 = arith.constant 0 : index
    %91 = memref.load %arg4[%c0_37] : memref<8xi32, #tpu.memory_space<smem>>
    memref.store %90, %arg4[%c0_37] : memref<8xi32, #tpu.memory_space<smem>>
    %c0_38 = arith.constant 0 : index
    %92 = memref.load %arg5[%c0_38] : memref<2xi32, #tpu.memory_space<smem>>
    %93 = arith.addi %92, %85 : i32
    %c0_39 = arith.constant 0 : index
    %94 = memref.load %arg5[%c0_39] : memref<2xi32, #tpu.memory_space<smem>>
    memref.store %93, %arg5[%c0_39] : memref<2xi32, #tpu.memory_space<smem>>
    %c1_40 = arith.constant 1 : index
    %95 = memref.load %arg5[%c1_40] : memref<2xi32, #tpu.memory_space<smem>>
    %96 = arith.addi %95, %87 : i32
    %c1_41 = arith.constant 1 : index
    %97 = memref.load %arg5[%c1_41] : memref<2xi32, #tpu.memory_space<smem>>
    memref.store %96, %arg5[%c1_41] : memref<2xi32, #tpu.memory_space<smem>>
    %c0_42 = arith.constant 0 : index
    %98 = memref.load %arg7[%c0_42] : memref<1xi32, #tpu.memory_space<smem>>
    %99 = arith.muli %85, %83 : i32
    %100 = arith.addi %98, %99 : i32
    %c0_43 = arith.constant 0 : index
    %101 = memref.load %arg7[%c0_43] : memref<1xi32, #tpu.memory_space<smem>>
    memref.store %100, %arg7[%c0_43] : memref<1xi32, #tpu.memory_space<smem>>
    %c256_44 = arith.constant 256 : index
    %c0_45 = arith.constant 0 : index
    %102 = vector.load %arg0[%c256_44, %c0_45] : memref<512x384xf32, #tpu.memory_space<vmem>>, vector<128x384xf32>
    %cst_46 = arith.constant dense<0.000000e+00> : vector<1x384xf32>
    %103 = tpu.matmul %52, %102, %cst_46 {dimension_numbers = #tpu.dot_dimension_numbers<[1], [0], [0], [1], [0, 0, 1, 1], [], []>} : vector<1x128xf32>, vector<128x384xf32>, vector<1x384xf32> -> vector<1x384xf32>
    %c0_47 = arith.constant 0 : index
    %c0_48 = arith.constant 0 : index
    %104 = vector.load %arg6[%c0_47, %c0_48] : memref<128x384xf32, #tpu.memory_space<vmem>>, vector<128x384xf32>
    %cst_49 = arith.constant dense<0.000000e+00> : vector<1x384xf32>
    %105 = tpu.matmul %67, %104, %cst_49 {dimension_numbers = #tpu.dot_dimension_numbers<[1], [0], [0], [1], [0, 0, 1, 1], [], []>} : vector<1x128xf32>, vector<128x384xf32>, vector<1x384xf32> -> vector<1x384xf32>
    %106 = vector.extract_strided_slice %105 {offsets = [0, 0], sizes = [1, 128], strides = [1, 1]} : vector<1x384xf32> to vector<1x128xf32>
    %107 = vector.extract_strided_slice %103 {offsets = [0, 0], sizes = [1, 128], strides = [1, 1]} : vector<1x384xf32> to vector<1x128xf32>
    %108 = arith.addf %106, %107 : vector<1x128xf32>
    %109 = arith.negf %108 : vector<1x128xf32>
    %110 = math.exp %109 : vector<1x128xf32>
    %cst_50 = arith.constant 1.000000e+00 : f32
    %111 = vector.broadcast %cst_50 : f32 to vector<1x128xf32>
    %112 = arith.addf %111, %110 : vector<1x128xf32>
    %113 = arith.divf %111, %112 : vector<1x128xf32>
    %114 = vector.extract_strided_slice %105 {offsets = [0, 128], sizes = [1, 128], strides = [1, 1]} : vector<1x384xf32> to vector<1x128xf32>
    %115 = vector.extract_strided_slice %103 {offsets = [0, 128], sizes = [1, 128], strides = [1, 1]} : vector<1x384xf32> to vector<1x128xf32>
    %116 = arith.addf %114, %115 : vector<1x128xf32>
    %117 = arith.negf %116 : vector<1x128xf32>
    %118 = math.exp %117 : vector<1x128xf32>
    %cst_51 = arith.constant 1.000000e+00 : f32
    %119 = vector.broadcast %cst_51 : f32 to vector<1x128xf32>
    %120 = arith.addf %119, %118 : vector<1x128xf32>
    %121 = arith.divf %119, %120 : vector<1x128xf32>
    %122 = vector.extract_strided_slice %105 {offsets = [0, 256], sizes = [1, 128], strides = [1, 1]} : vector<1x384xf32> to vector<1x128xf32>
    %123 = vector.extract_strided_slice %103 {offsets = [0, 256], sizes = [1, 128], strides = [1, 1]} : vector<1x384xf32> to vector<1x128xf32>
    %124 = arith.addf %123, %2 : vector<1x128xf32>
    %125 = arith.mulf %113, %124 : vector<1x128xf32>
    %126 = arith.addf %122, %125 : vector<1x128xf32>
    %127 = math.tanh %126 : vector<1x128xf32>
    %cst_52 = arith.constant 1.000000e+00 : f32
    %128 = vector.broadcast %cst_52 : f32 to vector<1x128xf32>
    %129 = arith.subf %128, %121 : vector<1x128xf32>
    %130 = arith.mulf %129, %127 : vector<1x128xf32>
    %131 = arith.mulf %121, %52 : vector<1x128xf32>
    %132 = arith.addf %130, %131 : vector<1x128xf32>
    %c384_53 = arith.constant 384 : index
    %c0_54 = arith.constant 0 : index
    %133 = vector.load %arg0[%c384_53, %c0_54] : memref<512x384xf32, #tpu.memory_space<vmem>>, vector<128x128xf32>
    %cst_55 = arith.constant dense<0.000000e+00> : vector<1x128xf32>
    %134 = tpu.matmul %132, %133, %cst_55 {dimension_numbers = #tpu.dot_dimension_numbers<[1], [0], [0], [1], [0, 0, 1, 1], [], []>} : vector<1x128xf32>, vector<128x128xf32>, vector<1x128xf32> -> vector<1x128xf32>
    %135 = arith.addf %134, %3 : vector<1x128xf32>
    %cst_56 = arith.constant dense<0xFF800000> : vector<1xf32>
    %136 = vector.multi_reduction <maximumf>, %135, %cst_56 [1] : vector<1x128xf32> to vector<1xf32>
    %137 = vector.shape_cast %136 : vector<1xf32> to vector<1x1xf32>
    %138 = vector.broadcast %137 : vector<1x1xf32> to vector<1x128xf32>
    %139 = arith.cmpf oeq, %135, %138 : vector<1x128xf32>
    %c128_i32_57 = arith.constant 128 : i32
    %140 = vector.broadcast %c128_i32_57 : i32 to vector<1x128xi32>
    %141 = arith.select %139, %0, %140 : vector<1x128xi1>, vector<1x128xi32>
    %cst_58 = arith.constant dense<2147483647> : vector<1xi32>
    %142 = vector.multi_reduction <minsi>, %141, %cst_58 [1] : vector<1x128xi32> to vector<1xi32>
    %143 = vector.shape_cast %142 : vector<1xi32> to vector<1x1xi32>
    %144 = vector.broadcast %143 : vector<1x1xi32> to vector<1x128xi32>
    %145 = arith.cmpi eq, %0, %144 : vector<1x128xi32>
    %146 = arith.extui %145 : vector<1x128xi1> to vector<1x128xi32>
    %147 = arith.sitofp %146 : vector<1x128xi32> to vector<1x128xf32>
    %148 = vector.broadcast %137 : vector<1x1xf32> to vector<1x128xf32>
    %149 = arith.subf %135, %148 : vector<1x128xf32>
    %150 = math.exp %149 : vector<1x128xf32>
    %cst_59 = arith.constant dense<0.000000e+00> : vector<1xf32>
    %151 = vector.multi_reduction <add>, %150, %cst_59 [1] : vector<1x128xf32> to vector<1xf32>
    %152 = vector.shape_cast %151 : vector<1xf32> to vector<1x1xf32>
    %153 = math.log %152 : vector<1x1xf32>
    %154 = arith.addf %137, %153 : vector<1x1xf32>
    %155 = vector.broadcast %154 : vector<1x1xf32> to vector<1x128xf32>
    %156 = arith.subf %135, %155 : vector<1x128xf32>
    %c1_60 = arith.constant 1 : index
    %c0_61 = arith.constant 0 : index
    %157 = vector.load %arg3[%c1_60, %c0_61] : memref<8x128xf32, #tpu.memory_space<vmem>>, vector<1x128xf32>
    tpu.vector_store %arg3[%c1_60, %c0_61], %156 {strides = array<i32>} : memref<8x128xf32, #tpu.memory_space<vmem>>, vector<1x128xf32>,
    %158 = vector.shape_cast %143 : vector<1x1xi32> to vector<1x1x1xi32>
    %cst_62 = arith.constant dense<-2147483648> : vector<1xi32>
    %159 = vector.multi_reduction <maxsi>, %158, %cst_62 [1, 2] : vector<1x1x1xi32> to vector<1xi32>
    %160 = vector.shape_cast %159 : vector<1xi32> to vector<1x1x1xi32>
    %161 = vector.extract %160[0, 0, 0] : i32 from vector<1x1x1xi32>
    %c1_i32_63 = arith.constant 1 : i32
    %162 = arith.cmpi eq, %161, %c1_i32_63 : i32
    %163 = arith.extui %162 : i1 to i32
    %c0_64 = arith.constant 0 : index
    %164 = memref.load %arg7[%c0_64] : memref<1xi32, #tpu.memory_space<smem>>
    %c1_i32_65 = arith.constant 1 : i32
    %165 = arith.subi %c1_i32_65, %164 : i32
    %c1_i32_66 = arith.constant 1 : i32
    %166 = arith.subi %c1_i32_66, %163 : i32
    %167 = arith.muli %165, %166 : i32
    %168 = arith.muli %167, %161 : i32
    %c1_i32_67 = arith.constant 1 : i32
    %169 = arith.subi %167, %c1_i32_67 : i32
    %170 = arith.addi %168, %169 : i32
    %c1_68 = arith.constant 1 : index
    %171 = memref.load %arg4[%c1_68] : memref<8xi32, #tpu.memory_space<smem>>
    memref.store %170, %arg4[%c1_68] : memref<8xi32, #tpu.memory_space<smem>>
    %c0_69 = arith.constant 0 : index
    %172 = memref.load %arg5[%c0_69] : memref<2xi32, #tpu.memory_space<smem>>
    %173 = arith.addi %172, %165 : i32
    %c0_70 = arith.constant 0 : index
    %174 = memref.load %arg5[%c0_70] : memref<2xi32, #tpu.memory_space<smem>>
    memref.store %173, %arg5[%c0_70] : memref<2xi32, #tpu.memory_space<smem>>
    %c1_71 = arith.constant 1 : index
    %175 = memref.load %arg5[%c1_71] : memref<2xi32, #tpu.memory_space<smem>>
    %176 = arith.addi %175, %167 : i32
    %c1_72 = arith.constant 1 : index
    %177 = memref.load %arg5[%c1_72] : memref<2xi32, #tpu.memory_space<smem>>
    memref.store %176, %arg5[%c1_72] : memref<2xi32, #tpu.memory_space<smem>>
    %c0_73 = arith.constant 0 : index
    %178 = memref.load %arg7[%c0_73] : memref<1xi32, #tpu.memory_space<smem>>
    %179 = arith.muli %165, %163 : i32
    %180 = arith.addi %178, %179 : i32
    %c0_74 = arith.constant 0 : index
    %181 = memref.load %arg7[%c0_74] : memref<1xi32, #tpu.memory_space<smem>>
    memref.store %180, %arg7[%c0_74] : memref<1xi32, #tpu.memory_space<smem>>
    %c256_75 = arith.constant 256 : index
    %c0_76 = arith.constant 0 : index
    %182 = vector.load %arg0[%c256_75, %c0_76] : memref<512x384xf32, #tpu.memory_space<vmem>>, vector<128x384xf32>
    %cst_77 = arith.constant dense<0.000000e+00> : vector<1x384xf32>
    %183 = tpu.matmul %132, %182, %cst_77 {dimension_numbers = #tpu.dot_dimension_numbers<[1], [0], [0], [1], [0, 0, 1, 1], [], []>} : vector<1x128xf32>, vector<128x384xf32>, vector<1x384xf32> -> vector<1x384xf32>
    %c0_78 = arith.constant 0 : index
    %c0_79 = arith.constant 0 : index
    %184 = vector.load %arg6[%c0_78, %c0_79] : memref<128x384xf32, #tpu.memory_space<vmem>>, vector<128x384xf32>
    %cst_80 = arith.constant dense<0.000000e+00> : vector<1x384xf32>
    %185 = tpu.matmul %147, %184, %cst_80 {dimension_numbers = #tpu.dot_dimension_numbers<[1], [0], [0], [1], [0, 0, 1, 1], [], []>} : vector<1x128xf32>, vector<128x384xf32>, vector<1x384xf32> -> vector<1x384xf32>
    %186 = vector.extract_strided_slice %185 {offsets = [0, 0], sizes = [1, 128], strides = [1, 1]} : vector<1x384xf32> to vector<1x128xf32>
    %187 = vector.extract_strided_slice %183 {offsets = [0, 0], sizes = [1, 128], strides = [1, 1]} : vector<1x384xf32> to vector<1x128xf32>
    %188 = arith.addf %186, %187 : vector<1x128xf32>
    %189 = arith.negf %188 : vector<1x128xf32>
    %190 = math.exp %189 : vector<1x128xf32>
    %cst_81 = arith.constant 1.000000e+00 : f32
    %191 = vector.broadcast %cst_81 : f32 to vector<1x128xf32>
    %192 = arith.addf %191, %190 : vector<1x128xf32>
    %193 = arith.divf %191, %192 : vector<1x128xf32>
    %194 = vector.extract_strided_slice %185 {offsets = [0, 128], sizes = [1, 128], strides = [1, 1]} : vector<1x384xf32> to vector<1x128xf32>
    %195 = vector.extract_strided_slice %183 {offsets = [0, 128], sizes = [1, 128], strides = [1, 1]} : vector<1x384xf32> to vector<1x128xf32>
    %196 = arith.addf %194, %195 : vector<1x128xf32>
    %197 = arith.negf %196 : vector<1x128xf32>
    %198 = math.exp %197 : vector<1x128xf32>
    %cst_82 = arith.constant 1.000000e+00 : f32
    %199 = vector.broadcast %cst_82 : f32 to vector<1x128xf32>
    %200 = arith.addf %199, %198 : vector<1x128xf32>
    %201 = arith.divf %199, %200 : vector<1x128xf32>
    %202 = vector.extract_strided_slice %185 {offsets = [0, 256], sizes = [1, 128], strides = [1, 1]} : vector<1x384xf32> to vector<1x128xf32>
    %203 = vector.extract_strided_slice %183 {offsets = [0, 256], sizes = [1, 128], strides = [1, 1]} : vector<1x384xf32> to vector<1x128xf32>
    %204 = arith.addf %203, %2 : vector<1x128xf32>
    %205 = arith.mulf %193, %204 : vector<1x128xf32>
    %206 = arith.addf %202, %205 : vector<1x128xf32>
    %207 = math.tanh %206 : vector<1x128xf32>
    %cst_83 = arith.constant 1.000000e+00 : f32
    %208 = vector.broadcast %cst_83 : f32 to vector<1x128xf32>
    %209 = arith.subf %208, %201 : vector<1x128xf32>
    %210 = arith.mulf %209, %207 : vector<1x128xf32>
    %211 = arith.mulf %201, %132 : vector<1x128xf32>
    %212 = arith.addf %210, %211 : vector<1x128xf32>
    %c384_84 = arith.constant 384 : index
    %c0_85 = arith.constant 0 : index
    %213 = vector.load %arg0[%c384_84, %c0_85] : memref<512x384xf32, #tpu.memory_space<vmem>>, vector<128x128xf32>
    %cst_86 = arith.constant dense<0.000000e+00> : vector<1x128xf32>
    %214 = tpu.matmul %212, %213, %cst_86 {dimension_numbers = #tpu.dot_dimension_numbers<[1], [0], [0], [1], [0, 0, 1, 1], [], []>} : vector<1x128xf32>, vector<128x128xf32>, vector<1x128xf32> -> vector<1x128xf32>
    %215 = arith.addf %214, %3 : vector<1x128xf32>
    %cst_87 = arith.constant dense<0xFF800000> : vector<1xf32>
    %216 = vector.multi_reduction <maximumf>, %215, %cst_87 [1] : vector<1x128xf32> to vector<1xf32>
    %217 = vector.shape_cast %216 : vector<1xf32> to vector<1x1xf32>
    %218 = vector.broadcast %217 : vector<1x1xf32> to vector<1x128xf32>
    %219 = arith.cmpf oeq, %215, %218 : vector<1x128xf32>
    %c128_i32_88 = arith.constant 128 : i32
    %220 = vector.broadcast %c128_i32_88 : i32 to vector<1x128xi32>
    %221 = arith.select %219, %0, %220 : vector<1x128xi1>, vector<1x128xi32>
    %cst_89 = arith.constant dense<2147483647> : vector<1xi32>
    %222 = vector.multi_reduction <minsi>, %221, %cst_89 [1] : vector<1x128xi32> to vector<1xi32>
    %223 = vector.shape_cast %222 : vector<1xi32> to vector<1x1xi32>
    %224 = vector.broadcast %223 : vector<1x1xi32> to vector<1x128xi32>
    %225 = arith.cmpi eq, %0, %224 : vector<1x128xi32>
    %226 = arith.extui %225 : vector<1x128xi1> to vector<1x128xi32>
    %227 = arith.sitofp %226 : vector<1x128xi32> to vector<1x128xf32>
    %228 = vector.broadcast %217 : vector<1x1xf32> to vector<1x128xf32>
    %229 = arith.subf %215, %228 : vector<1x128xf32>
    %230 = math.exp %229 : vector<1x128xf32>
    %cst_90 = arith.constant dense<0.000000e+00> : vector<1xf32>
    %231 = vector.multi_reduction <add>, %230, %cst_90 [1] : vector<1x128xf32> to vector<1xf32>
    %232 = vector.shape_cast %231 : vector<1xf32> to vector<1x1xf32>
    %233 = math.log %232 : vector<1x1xf32>
    %234 = arith.addf %217, %233 : vector<1x1xf32>
    %235 = vector.broadcast %234 : vector<1x1xf32> to vector<1x128xf32>
    %236 = arith.subf %215, %235 : vector<1x128xf32>
    %c2 = arith.constant 2 : index
    %c0_91 = arith.constant 0 : index
    %237 = vector.load %arg3[%c2, %c0_91] : memref<8x128xf32, #tpu.memory_space<vmem>>, vector<1x128xf32>
    tpu.vector_store %arg3[%c2, %c0_91], %236 {strides = array<i32>} : memref<8x128xf32, #tpu.memory_space<vmem>>, vector<1x128xf32>,
    %238 = vector.shape_cast %223 : vector<1x1xi32> to vector<1x1x1xi32>
    %cst_92 = arith.constant dense<-2147483648> : vector<1xi32>
    %239 = vector.multi_reduction <maxsi>, %238, %cst_92 [1, 2] : vector<1x1x1xi32> to vector<1xi32>
    %240 = vector.shape_cast %239 : vector<1xi32> to vector<1x1x1xi32>
    %241 = vector.extract %240[0, 0, 0] : i32 from vector<1x1x1xi32>
    %c1_i32_93 = arith.constant 1 : i32
    %242 = arith.cmpi eq, %241, %c1_i32_93 : i32
    %243 = arith.extui %242 : i1 to i32
    %c0_94 = arith.constant 0 : index
    %244 = memref.load %arg7[%c0_94] : memref<1xi32, #tpu.memory_space<smem>>
    %c1_i32_95 = arith.constant 1 : i32
    %245 = arith.subi %c1_i32_95, %244 : i32
    %c1_i32_96 = arith.constant 1 : i32
    %246 = arith.subi %c1_i32_96, %243 : i32
    %247 = arith.muli %245, %246 : i32
    %248 = arith.muli %247, %241 : i32
    %c1_i32_97 = arith.constant 1 : i32
    %249 = arith.subi %247, %c1_i32_97 : i32
    %250 = arith.addi %248, %249 : i32
    %c2_98 = arith.constant 2 : index
    %251 = memref.load %arg4[%c2_98] : memref<8xi32, #tpu.memory_space<smem>>
    memref.store %250, %arg4[%c2_98] : memref<8xi32, #tpu.memory_space<smem>>
    %c0_99 = arith.constant 0 : index
    %252 = memref.load %arg5[%c0_99] : memref<2xi32, #tpu.memory_space<smem>>
    %253 = arith.addi %252, %245 : i32
    %c0_100 = arith.constant 0 : index
    %254 = memref.load %arg5[%c0_100] : memref<2xi32, #tpu.memory_space<smem>>
    memref.store %253, %arg5[%c0_100] : memref<2xi32, #tpu.memory_space<smem>>
    %c1_101 = arith.constant 1 : index
    %255 = memref.load %arg5[%c1_101] : memref<2xi32, #tpu.memory_space<smem>>
    %256 = arith.addi %255, %247 : i32
    %c1_102 = arith.constant 1 : index
    %257 = memref.load %arg5[%c1_102] : memref<2xi32, #tpu.memory_space<smem>>
    memref.store %256, %arg5[%c1_102] : memref<2xi32, #tpu.memory_space<smem>>
    %c0_103 = arith.constant 0 : index
    %258 = memref.load %arg7[%c0_103] : memref<1xi32, #tpu.memory_space<smem>>
    %259 = arith.muli %245, %243 : i32
    %260 = arith.addi %258, %259 : i32
    %c0_104 = arith.constant 0 : index
    %261 = memref.load %arg7[%c0_104] : memref<1xi32, #tpu.memory_space<smem>>
    memref.store %260, %arg7[%c0_104] : memref<1xi32, #tpu.memory_space<smem>>
    %c256_105 = arith.constant 256 : index
    %c0_106 = arith.constant 0 : index
    %262 = vector.load %arg0[%c256_105, %c0_106] : memref<512x384xf32, #tpu.memory_space<vmem>>, vector<128x384xf32>
    %cst_107 = arith.constant dense<0.000000e+00> : vector<1x384xf32>
    %263 = tpu.matmul %212, %262, %cst_107 {dimension_numbers = #tpu.dot_dimension_numbers<[1], [0], [0], [1], [0, 0, 1, 1], [], []>} : vector<1x128xf32>, vector<128x384xf32>, vector<1x384xf32> -> vector<1x384xf32>
    %c0_108 = arith.constant 0 : index
    %c0_109 = arith.constant 0 : index
    %264 = vector.load %arg6[%c0_108, %c0_109] : memref<128x384xf32, #tpu.memory_space<vmem>>, vector<128x384xf32>
    %cst_110 = arith.constant dense<0.000000e+00> : vector<1x384xf32>
    %265 = tpu.matmul %227, %264, %cst_110 {dimension_numbers = #tpu.dot_dimension_numbers<[1], [0], [0], [1], [0, 0, 1, 1], [], []>} : vector<1x128xf32>, vector<128x384xf32>, vector<1x384xf32> -> vector<1x384xf32>
    %266 = vector.extract_strided_slice %265 {offsets = [0, 0], sizes = [1, 128], strides = [1, 1]} : vector<1x384xf32> to vector<1x128xf32>
    %267 = vector.extract_strided_slice %263 {offsets = [0, 0], sizes = [1, 128], strides = [1, 1]} : vector<1x384xf32> to vector<1x128xf32>
    %268 = arith.addf %266, %267 : vector<1x128xf32>
    %269 = arith.negf %268 : vector<1x128xf32>
    %270 = math.exp %269 : vector<1x128xf32>
    %cst_111 = arith.constant 1.000000e+00 : f32
    %271 = vector.broadcast %cst_111 : f32 to vector<1x128xf32>
    %272 = arith.addf %271, %270 : vector<1x128xf32>
    %273 = arith.divf %271, %272 : vector<1x128xf32>
    %274 = vector.extract_strided_slice %265 {offsets = [0, 128], sizes = [1, 128], strides = [1, 1]} : vector<1x384xf32> to vector<1x128xf32>
    %275 = vector.extract_strided_slice %263 {offsets = [0, 128], sizes = [1, 128], strides = [1, 1]} : vector<1x384xf32> to vector<1x128xf32>
    %276 = arith.addf %274, %275 : vector<1x128xf32>
    %277 = arith.negf %276 : vector<1x128xf32>
    %278 = math.exp %277 : vector<1x128xf32>
    %cst_112 = arith.constant 1.000000e+00 : f32
    %279 = vector.broadcast %cst_112 : f32 to vector<1x128xf32>
    %280 = arith.addf %279, %278 : vector<1x128xf32>
    %281 = arith.divf %279, %280 : vector<1x128xf32>
    %282 = vector.extract_strided_slice %265 {offsets = [0, 256], sizes = [1, 128], strides = [1, 1]} : vector<1x384xf32> to vector<1x128xf32>
    %283 = vector.extract_strided_slice %263 {offsets = [0, 256], sizes = [1, 128], strides = [1, 1]} : vector<1x384xf32> to vector<1x128xf32>
    %284 = arith.addf %283, %2 : vector<1x128xf32>
    %285 = arith.mulf %273, %284 : vector<1x128xf32>
    %286 = arith.addf %282, %285 : vector<1x128xf32>
    %287 = math.tanh %286 : vector<1x128xf32>
    %cst_113 = arith.constant 1.000000e+00 : f32
    %288 = vector.broadcast %cst_113 : f32 to vector<1x128xf32>
    %289 = arith.subf %288, %281 : vector<1x128xf32>
    %290 = arith.mulf %289, %287 : vector<1x128xf32>
    %291 = arith.mulf %281, %212 : vector<1x128xf32>
    %292 = arith.addf %290, %291 : vector<1x128xf32>
    %c384_114 = arith.constant 384 : index
    %c0_115 = arith.constant 0 : index
    %293 = vector.load %arg0[%c384_114, %c0_115] : memref<512x384xf32, #tpu.memory_space<vmem>>, vector<128x128xf32>
    %cst_116 = arith.constant dense<0.000000e+00> : vector<1x128xf32>
    %294 = tpu.matmul %292, %293, %cst_116 {dimension_numbers = #tpu.dot_dimension_numbers<[1], [0], [0], [1], [0, 0, 1, 1], [], []>} : vector<1x128xf32>, vector<128x128xf32>, vector<1x128xf32> -> vector<1x128xf32>
    %295 = arith.addf %294, %3 : vector<1x128xf32>
    %cst_117 = arith.constant dense<0xFF800000> : vector<1xf32>
    %296 = vector.multi_reduction <maximumf>, %295, %cst_117 [1] : vector<1x128xf32> to vector<1xf32>
    %297 = vector.shape_cast %296 : vector<1xf32> to vector<1x1xf32>
    %298 = vector.broadcast %297 : vector<1x1xf32> to vector<1x128xf32>
    %299 = arith.cmpf oeq, %295, %298 : vector<1x128xf32>
    %c128_i32_118 = arith.constant 128 : i32
    %300 = vector.broadcast %c128_i32_118 : i32 to vector<1x128xi32>
    %301 = arith.select %299, %0, %300 : vector<1x128xi1>, vector<1x128xi32>
    %cst_119 = arith.constant dense<2147483647> : vector<1xi32>
    %302 = vector.multi_reduction <minsi>, %301, %cst_119 [1] : vector<1x128xi32> to vector<1xi32>
    %303 = vector.shape_cast %302 : vector<1xi32> to vector<1x1xi32>
    %304 = vector.broadcast %303 : vector<1x1xi32> to vector<1x128xi32>
    %305 = arith.cmpi eq, %0, %304 : vector<1x128xi32>
    %306 = arith.extui %305 : vector<1x128xi1> to vector<1x128xi32>
    %307 = arith.sitofp %306 : vector<1x128xi32> to vector<1x128xf32>
    %308 = vector.broadcast %297 : vector<1x1xf32> to vector<1x128xf32>
    %309 = arith.subf %295, %308 : vector<1x128xf32>
    %310 = math.exp %309 : vector<1x128xf32>
    %cst_120 = arith.constant dense<0.000000e+00> : vector<1xf32>
    %311 = vector.multi_reduction <add>, %310, %cst_120 [1] : vector<1x128xf32> to vector<1xf32>
    %312 = vector.shape_cast %311 : vector<1xf32> to vector<1x1xf32>
    %313 = math.log %312 : vector<1x1xf32>
    %314 = arith.addf %297, %313 : vector<1x1xf32>
    %315 = vector.broadcast %314 : vector<1x1xf32> to vector<1x128xf32>
    %316 = arith.subf %295, %315 : vector<1x128xf32>
    %c3 = arith.constant 3 : index
    %c0_121 = arith.constant 0 : index
    %317 = vector.load %arg3[%c3, %c0_121] : memref<8x128xf32, #tpu.memory_space<vmem>>, vector<1x128xf32>
    tpu.vector_store %arg3[%c3, %c0_121], %316 {strides = array<i32>} : memref<8x128xf32, #tpu.memory_space<vmem>>, vector<1x128xf32>,
    %318 = vector.shape_cast %303 : vector<1x1xi32> to vector<1x1x1xi32>
    %cst_122 = arith.constant dense<-2147483648> : vector<1xi32>
    %319 = vector.multi_reduction <maxsi>, %318, %cst_122 [1, 2] : vector<1x1x1xi32> to vector<1xi32>
    %320 = vector.shape_cast %319 : vector<1xi32> to vector<1x1x1xi32>
    %321 = vector.extract %320[0, 0, 0] : i32 from vector<1x1x1xi32>
    %c1_i32_123 = arith.constant 1 : i32
    %322 = arith.cmpi eq, %321, %c1_i32_123 : i32
    %323 = arith.extui %322 : i1 to i32
    %c0_124 = arith.constant 0 : index
    %324 = memref.load %arg7[%c0_124] : memref<1xi32, #tpu.memory_space<smem>>
    %c1_i32_125 = arith.constant 1 : i32
    %325 = arith.subi %c1_i32_125, %324 : i32
    %c1_i32_126 = arith.constant 1 : i32
    %326 = arith.subi %c1_i32_126, %323 : i32
    %327 = arith.muli %325, %326 : i32
    %328 = arith.muli %327, %321 : i32
    %c1_i32_127 = arith.constant 1 : i32
    %329 = arith.subi %327, %c1_i32_127 : i32
    %330 = arith.addi %328, %329 : i32
    %c3_128 = arith.constant 3 : index
    %331 = memref.load %arg4[%c3_128] : memref<8xi32, #tpu.memory_space<smem>>
    memref.store %330, %arg4[%c3_128] : memref<8xi32, #tpu.memory_space<smem>>
    %c0_129 = arith.constant 0 : index
    %332 = memref.load %arg5[%c0_129] : memref<2xi32, #tpu.memory_space<smem>>
    %333 = arith.addi %332, %325 : i32
    %c0_130 = arith.constant 0 : index
    %334 = memref.load %arg5[%c0_130] : memref<2xi32, #tpu.memory_space<smem>>
    memref.store %333, %arg5[%c0_130] : memref<2xi32, #tpu.memory_space<smem>>
    %c1_131 = arith.constant 1 : index
    %335 = memref.load %arg5[%c1_131] : memref<2xi32, #tpu.memory_space<smem>>
    %336 = arith.addi %335, %327 : i32
    %c1_132 = arith.constant 1 : index
    %337 = memref.load %arg5[%c1_132] : memref<2xi32, #tpu.memory_space<smem>>
    memref.store %336, %arg5[%c1_132] : memref<2xi32, #tpu.memory_space<smem>>
    %c0_133 = arith.constant 0 : index
    %338 = memref.load %arg7[%c0_133] : memref<1xi32, #tpu.memory_space<smem>>
    %339 = arith.muli %325, %323 : i32
    %340 = arith.addi %338, %339 : i32
    %c0_134 = arith.constant 0 : index
    %341 = memref.load %arg7[%c0_134] : memref<1xi32, #tpu.memory_space<smem>>
    memref.store %340, %arg7[%c0_134] : memref<1xi32, #tpu.memory_space<smem>>
    %c256_135 = arith.constant 256 : index
    %c0_136 = arith.constant 0 : index
    %342 = vector.load %arg0[%c256_135, %c0_136] : memref<512x384xf32, #tpu.memory_space<vmem>>, vector<128x384xf32>
    %cst_137 = arith.constant dense<0.000000e+00> : vector<1x384xf32>
    %343 = tpu.matmul %292, %342, %cst_137 {dimension_numbers = #tpu.dot_dimension_numbers<[1], [0], [0], [1], [0, 0, 1, 1], [], []>} : vector<1x128xf32>, vector<128x384xf32>, vector<1x384xf32> -> vector<1x384xf32>
    %c0_138 = arith.constant 0 : index
    %c0_139 = arith.constant 0 : index
    %344 = vector.load %arg6[%c0_138, %c0_139] : memref<128x384xf32, #tpu.memory_space<vmem>>, vector<128x384xf32>
    %cst_140 = arith.constant dense<0.000000e+00> : vector<1x384xf32>
    %345 = tpu.matmul %307, %344, %cst_140 {dimension_numbers = #tpu.dot_dimension_numbers<[1], [0], [0], [1], [0, 0, 1, 1], [], []>} : vector<1x128xf32>, vector<128x384xf32>, vector<1x384xf32> -> vector<1x384xf32>
    %346 = vector.extract_strided_slice %345 {offsets = [0, 0], sizes = [1, 128], strides = [1, 1]} : vector<1x384xf32> to vector<1x128xf32>
    %347 = vector.extract_strided_slice %343 {offsets = [0, 0], sizes = [1, 128], strides = [1, 1]} : vector<1x384xf32> to vector<1x128xf32>
    %348 = arith.addf %346, %347 : vector<1x128xf32>
    %349 = arith.negf %348 : vector<1x128xf32>
    %350 = math.exp %349 : vector<1x128xf32>
    %cst_141 = arith.constant 1.000000e+00 : f32
    %351 = vector.broadcast %cst_141 : f32 to vector<1x128xf32>
    %352 = arith.addf %351, %350 : vector<1x128xf32>
    %353 = arith.divf %351, %352 : vector<1x128xf32>
    %354 = vector.extract_strided_slice %345 {offsets = [0, 128], sizes = [1, 128], strides = [1, 1]} : vector<1x384xf32> to vector<1x128xf32>
    %355 = vector.extract_strided_slice %343 {offsets = [0, 128], sizes = [1, 128], strides = [1, 1]} : vector<1x384xf32> to vector<1x128xf32>
    %356 = arith.addf %354, %355 : vector<1x128xf32>
    %357 = arith.negf %356 : vector<1x128xf32>
    %358 = math.exp %357 : vector<1x128xf32>
    %cst_142 = arith.constant 1.000000e+00 : f32
    %359 = vector.broadcast %cst_142 : f32 to vector<1x128xf32>
    %360 = arith.addf %359, %358 : vector<1x128xf32>
    %361 = arith.divf %359, %360 : vector<1x128xf32>
    %362 = vector.extract_strided_slice %345 {offsets = [0, 256], sizes = [1, 128], strides = [1, 1]} : vector<1x384xf32> to vector<1x128xf32>
    %363 = vector.extract_strided_slice %343 {offsets = [0, 256], sizes = [1, 128], strides = [1, 1]} : vector<1x384xf32> to vector<1x128xf32>
    %364 = arith.addf %363, %2 : vector<1x128xf32>
    %365 = arith.mulf %353, %364 : vector<1x128xf32>
    %366 = arith.addf %362, %365 : vector<1x128xf32>
    %367 = math.tanh %366 : vector<1x128xf32>
    %cst_143 = arith.constant 1.000000e+00 : f32
    %368 = vector.broadcast %cst_143 : f32 to vector<1x128xf32>
    %369 = arith.subf %368, %361 : vector<1x128xf32>
    %370 = arith.mulf %369, %367 : vector<1x128xf32>
    %371 = arith.mulf %361, %292 : vector<1x128xf32>
    %372 = arith.addf %370, %371 : vector<1x128xf32>
    %c384_144 = arith.constant 384 : index
    %c0_145 = arith.constant 0 : index
    %373 = vector.load %arg0[%c384_144, %c0_145] : memref<512x384xf32, #tpu.memory_space<vmem>>, vector<128x128xf32>
    %cst_146 = arith.constant dense<0.000000e+00> : vector<1x128xf32>
    %374 = tpu.matmul %372, %373, %cst_146 {dimension_numbers = #tpu.dot_dimension_numbers<[1], [0], [0], [1], [0, 0, 1, 1], [], []>} : vector<1x128xf32>, vector<128x128xf32>, vector<1x128xf32> -> vector<1x128xf32>
    %375 = arith.addf %374, %3 : vector<1x128xf32>
    %cst_147 = arith.constant dense<0xFF800000> : vector<1xf32>
    %376 = vector.multi_reduction <maximumf>, %375, %cst_147 [1] : vector<1x128xf32> to vector<1xf32>
    %377 = vector.shape_cast %376 : vector<1xf32> to vector<1x1xf32>
    %378 = vector.broadcast %377 : vector<1x1xf32> to vector<1x128xf32>
    %379 = arith.cmpf oeq, %375, %378 : vector<1x128xf32>
    %c128_i32_148 = arith.constant 128 : i32
    %380 = vector.broadcast %c128_i32_148 : i32 to vector<1x128xi32>
    %381 = arith.select %379, %0, %380 : vector<1x128xi1>, vector<1x128xi32>
    %cst_149 = arith.constant dense<2147483647> : vector<1xi32>
    %382 = vector.multi_reduction <minsi>, %381, %cst_149 [1] : vector<1x128xi32> to vector<1xi32>
    %383 = vector.shape_cast %382 : vector<1xi32> to vector<1x1xi32>
    %384 = vector.broadcast %383 : vector<1x1xi32> to vector<1x128xi32>
    %385 = arith.cmpi eq, %0, %384 : vector<1x128xi32>
    %386 = arith.extui %385 : vector<1x128xi1> to vector<1x128xi32>
    %387 = arith.sitofp %386 : vector<1x128xi32> to vector<1x128xf32>
    %388 = vector.broadcast %377 : vector<1x1xf32> to vector<1x128xf32>
    %389 = arith.subf %375, %388 : vector<1x128xf32>
    %390 = math.exp %389 : vector<1x128xf32>
    %cst_150 = arith.constant dense<0.000000e+00> : vector<1xf32>
    %391 = vector.multi_reduction <add>, %390, %cst_150 [1] : vector<1x128xf32> to vector<1xf32>
    %392 = vector.shape_cast %391 : vector<1xf32> to vector<1x1xf32>
    %393 = math.log %392 : vector<1x1xf32>
    %394 = arith.addf %377, %393 : vector<1x1xf32>
    %395 = vector.broadcast %394 : vector<1x1xf32> to vector<1x128xf32>
    %396 = arith.subf %375, %395 : vector<1x128xf32>
    %c4 = arith.constant 4 : index
    %c0_151 = arith.constant 0 : index
    %397 = vector.load %arg3[%c4, %c0_151] : memref<8x128xf32, #tpu.memory_space<vmem>>, vector<1x128xf32>
    tpu.vector_store %arg3[%c4, %c0_151], %396 {strides = array<i32>} : memref<8x128xf32, #tpu.memory_space<vmem>>, vector<1x128xf32>,
    %398 = vector.shape_cast %383 : vector<1x1xi32> to vector<1x1x1xi32>
    %cst_152 = arith.constant dense<-2147483648> : vector<1xi32>
    %399 = vector.multi_reduction <maxsi>, %398, %cst_152 [1, 2] : vector<1x1x1xi32> to vector<1xi32>
    %400 = vector.shape_cast %399 : vector<1xi32> to vector<1x1x1xi32>
    %401 = vector.extract %400[0, 0, 0] : i32 from vector<1x1x1xi32>
    %c1_i32_153 = arith.constant 1 : i32
    %402 = arith.cmpi eq, %401, %c1_i32_153 : i32
    %403 = arith.extui %402 : i1 to i32
    %c0_154 = arith.constant 0 : index
    %404 = memref.load %arg7[%c0_154] : memref<1xi32, #tpu.memory_space<smem>>
    %c1_i32_155 = arith.constant 1 : i32
    %405 = arith.subi %c1_i32_155, %404 : i32
    %c1_i32_156 = arith.constant 1 : i32
    %406 = arith.subi %c1_i32_156, %403 : i32
    %407 = arith.muli %405, %406 : i32
    %408 = arith.muli %407, %401 : i32
    %c1_i32_157 = arith.constant 1 : i32
    %409 = arith.subi %407, %c1_i32_157 : i32
    %410 = arith.addi %408, %409 : i32
    %c4_158 = arith.constant 4 : index
    %411 = memref.load %arg4[%c4_158] : memref<8xi32, #tpu.memory_space<smem>>
    memref.store %410, %arg4[%c4_158] : memref<8xi32, #tpu.memory_space<smem>>
    %c0_159 = arith.constant 0 : index
    %412 = memref.load %arg5[%c0_159] : memref<2xi32, #tpu.memory_space<smem>>
    %413 = arith.addi %412, %405 : i32
    %c0_160 = arith.constant 0 : index
    %414 = memref.load %arg5[%c0_160] : memref<2xi32, #tpu.memory_space<smem>>
    memref.store %413, %arg5[%c0_160] : memref<2xi32, #tpu.memory_space<smem>>
    %c1_161 = arith.constant 1 : index
    %415 = memref.load %arg5[%c1_161] : memref<2xi32, #tpu.memory_space<smem>>
    %416 = arith.addi %415, %407 : i32
    %c1_162 = arith.constant 1 : index
    %417 = memref.load %arg5[%c1_162] : memref<2xi32, #tpu.memory_space<smem>>
    memref.store %416, %arg5[%c1_162] : memref<2xi32, #tpu.memory_space<smem>>
    %c0_163 = arith.constant 0 : index
    %418 = memref.load %arg7[%c0_163] : memref<1xi32, #tpu.memory_space<smem>>
    %419 = arith.muli %405, %403 : i32
    %420 = arith.addi %418, %419 : i32
    %c0_164 = arith.constant 0 : index
    %421 = memref.load %arg7[%c0_164] : memref<1xi32, #tpu.memory_space<smem>>
    memref.store %420, %arg7[%c0_164] : memref<1xi32, #tpu.memory_space<smem>>
    %c256_165 = arith.constant 256 : index
    %c0_166 = arith.constant 0 : index
    %422 = vector.load %arg0[%c256_165, %c0_166] : memref<512x384xf32, #tpu.memory_space<vmem>>, vector<128x384xf32>
    %cst_167 = arith.constant dense<0.000000e+00> : vector<1x384xf32>
    %423 = tpu.matmul %372, %422, %cst_167 {dimension_numbers = #tpu.dot_dimension_numbers<[1], [0], [0], [1], [0, 0, 1, 1], [], []>} : vector<1x128xf32>, vector<128x384xf32>, vector<1x384xf32> -> vector<1x384xf32>
    %c0_168 = arith.constant 0 : index
    %c0_169 = arith.constant 0 : index
    %424 = vector.load %arg6[%c0_168, %c0_169] : memref<128x384xf32, #tpu.memory_space<vmem>>, vector<128x384xf32>
    %cst_170 = arith.constant dense<0.000000e+00> : vector<1x384xf32>
    %425 = tpu.matmul %387, %424, %cst_170 {dimension_numbers = #tpu.dot_dimension_numbers<[1], [0], [0], [1], [0, 0, 1, 1], [], []>} : vector<1x128xf32>, vector<128x384xf32>, vector<1x384xf32> -> vector<1x384xf32>
    %426 = vector.extract_strided_slice %425 {offsets = [0, 0], sizes = [1, 128], strides = [1, 1]} : vector<1x384xf32> to vector<1x128xf32>
    %427 = vector.extract_strided_slice %423 {offsets = [0, 0], sizes = [1, 128], strides = [1, 1]} : vector<1x384xf32> to vector<1x128xf32>
    %428 = arith.addf %426, %427 : vector<1x128xf32>
    %429 = arith.negf %428 : vector<1x128xf32>
    %430 = math.exp %429 : vector<1x128xf32>
    %cst_171 = arith.constant 1.000000e+00 : f32
    %431 = vector.broadcast %cst_171 : f32 to vector<1x128xf32>
    %432 = arith.addf %431, %430 : vector<1x128xf32>
    %433 = arith.divf %431, %432 : vector<1x128xf32>
    %434 = vector.extract_strided_slice %425 {offsets = [0, 128], sizes = [1, 128], strides = [1, 1]} : vector<1x384xf32> to vector<1x128xf32>
    %435 = vector.extract_strided_slice %423 {offsets = [0, 128], sizes = [1, 128], strides = [1, 1]} : vector<1x384xf32> to vector<1x128xf32>
    %436 = arith.addf %434, %435 : vector<1x128xf32>
    %437 = arith.negf %436 : vector<1x128xf32>
    %438 = math.exp %437 : vector<1x128xf32>
    %cst_172 = arith.constant 1.000000e+00 : f32
    %439 = vector.broadcast %cst_172 : f32 to vector<1x128xf32>
    %440 = arith.addf %439, %438 : vector<1x128xf32>
    %441 = arith.divf %439, %440 : vector<1x128xf32>
    %442 = vector.extract_strided_slice %425 {offsets = [0, 256], sizes = [1, 128], strides = [1, 1]} : vector<1x384xf32> to vector<1x128xf32>
    %443 = vector.extract_strided_slice %423 {offsets = [0, 256], sizes = [1, 128], strides = [1, 1]} : vector<1x384xf32> to vector<1x128xf32>
    %444 = arith.addf %443, %2 : vector<1x128xf32>
    %445 = arith.mulf %433, %444 : vector<1x128xf32>
    %446 = arith.addf %442, %445 : vector<1x128xf32>
    %447 = math.tanh %446 : vector<1x128xf32>
    %cst_173 = arith.constant 1.000000e+00 : f32
    %448 = vector.broadcast %cst_173 : f32 to vector<1x128xf32>
    %449 = arith.subf %448, %441 : vector<1x128xf32>
    %450 = arith.mulf %449, %447 : vector<1x128xf32>
    %451 = arith.mulf %441, %372 : vector<1x128xf32>
    %452 = arith.addf %450, %451 : vector<1x128xf32>
    %c384_174 = arith.constant 384 : index
    %c0_175 = arith.constant 0 : index
    %453 = vector.load %arg0[%c384_174, %c0_175] : memref<512x384xf32, #tpu.memory_space<vmem>>, vector<128x128xf32>
    %cst_176 = arith.constant dense<0.000000e+00> : vector<1x128xf32>
    %454 = tpu.matmul %452, %453, %cst_176 {dimension_numbers = #tpu.dot_dimension_numbers<[1], [0], [0], [1], [0, 0, 1, 1], [], []>} : vector<1x128xf32>, vector<128x128xf32>, vector<1x128xf32> -> vector<1x128xf32>
    %455 = arith.addf %454, %3 : vector<1x128xf32>
    %cst_177 = arith.constant dense<0xFF800000> : vector<1xf32>
    %456 = vector.multi_reduction <maximumf>, %455, %cst_177 [1] : vector<1x128xf32> to vector<1xf32>
    %457 = vector.shape_cast %456 : vector<1xf32> to vector<1x1xf32>
    %458 = vector.broadcast %457 : vector<1x1xf32> to vector<1x128xf32>
    %459 = arith.cmpf oeq, %455, %458 : vector<1x128xf32>
    %c128_i32_178 = arith.constant 128 : i32
    %460 = vector.broadcast %c128_i32_178 : i32 to vector<1x128xi32>
    %461 = arith.select %459, %0, %460 : vector<1x128xi1>, vector<1x128xi32>
    %cst_179 = arith.constant dense<2147483647> : vector<1xi32>
    %462 = vector.multi_reduction <minsi>, %461, %cst_179 [1] : vector<1x128xi32> to vector<1xi32>
    %463 = vector.shape_cast %462 : vector<1xi32> to vector<1x1xi32>
    %464 = vector.broadcast %463 : vector<1x1xi32> to vector<1x128xi32>
    %465 = arith.cmpi eq, %0, %464 : vector<1x128xi32>
    %466 = arith.extui %465 : vector<1x128xi1> to vector<1x128xi32>
    %467 = arith.sitofp %466 : vector<1x128xi32> to vector<1x128xf32>
    %468 = vector.broadcast %457 : vector<1x1xf32> to vector<1x128xf32>
    %469 = arith.subf %455, %468 : vector<1x128xf32>
    %470 = math.exp %469 : vector<1x128xf32>
    %cst_180 = arith.constant dense<0.000000e+00> : vector<1xf32>
    %471 = vector.multi_reduction <add>, %470, %cst_180 [1] : vector<1x128xf32> to vector<1xf32>
    %472 = vector.shape_cast %471 : vector<1xf32> to vector<1x1xf32>
    %473 = math.log %472 : vector<1x1xf32>
    %474 = arith.addf %457, %473 : vector<1x1xf32>
    %475 = vector.broadcast %474 : vector<1x1xf32> to vector<1x128xf32>
    %476 = arith.subf %455, %475 : vector<1x128xf32>
    %c5 = arith.constant 5 : index
    %c0_181 = arith.constant 0 : index
    %477 = vector.load %arg3[%c5, %c0_181] : memref<8x128xf32, #tpu.memory_space<vmem>>, vector<1x128xf32>
    tpu.vector_store %arg3[%c5, %c0_181], %476 {strides = array<i32>} : memref<8x128xf32, #tpu.memory_space<vmem>>, vector<1x128xf32>,
    %478 = vector.shape_cast %463 : vector<1x1xi32> to vector<1x1x1xi32>
    %cst_182 = arith.constant dense<-2147483648> : vector<1xi32>
    %479 = vector.multi_reduction <maxsi>, %478, %cst_182 [1, 2] : vector<1x1x1xi32> to vector<1xi32>
    %480 = vector.shape_cast %479 : vector<1xi32> to vector<1x1x1xi32>
    %481 = vector.extract %480[0, 0, 0] : i32 from vector<1x1x1xi32>
    %c1_i32_183 = arith.constant 1 : i32
    %482 = arith.cmpi eq, %481, %c1_i32_183 : i32
    %483 = arith.extui %482 : i1 to i32
    %c0_184 = arith.constant 0 : index
    %484 = memref.load %arg7[%c0_184] : memref<1xi32, #tpu.memory_space<smem>>
    %c1_i32_185 = arith.constant 1 : i32
    %485 = arith.subi %c1_i32_185, %484 : i32
    %c1_i32_186 = arith.constant 1 : i32
    %486 = arith.subi %c1_i32_186, %483 : i32
    %487 = arith.muli %485, %486 : i32
    %488 = arith.muli %487, %481 : i32
    %c1_i32_187 = arith.constant 1 : i32
    %489 = arith.subi %487, %c1_i32_187 : i32
    %490 = arith.addi %488, %489 : i32
    %c5_188 = arith.constant 5 : index
    %491 = memref.load %arg4[%c5_188] : memref<8xi32, #tpu.memory_space<smem>>
    memref.store %490, %arg4[%c5_188] : memref<8xi32, #tpu.memory_space<smem>>
    %c0_189 = arith.constant 0 : index
    %492 = memref.load %arg5[%c0_189] : memref<2xi32, #tpu.memory_space<smem>>
    %493 = arith.addi %492, %485 : i32
    %c0_190 = arith.constant 0 : index
    %494 = memref.load %arg5[%c0_190] : memref<2xi32, #tpu.memory_space<smem>>
    memref.store %493, %arg5[%c0_190] : memref<2xi32, #tpu.memory_space<smem>>
    %c1_191 = arith.constant 1 : index
    %495 = memref.load %arg5[%c1_191] : memref<2xi32, #tpu.memory_space<smem>>
    %496 = arith.addi %495, %487 : i32
    %c1_192 = arith.constant 1 : index
    %497 = memref.load %arg5[%c1_192] : memref<2xi32, #tpu.memory_space<smem>>
    memref.store %496, %arg5[%c1_192] : memref<2xi32, #tpu.memory_space<smem>>
    %c0_193 = arith.constant 0 : index
    %498 = memref.load %arg7[%c0_193] : memref<1xi32, #tpu.memory_space<smem>>
    %499 = arith.muli %485, %483 : i32
    %500 = arith.addi %498, %499 : i32
    %c0_194 = arith.constant 0 : index
    %501 = memref.load %arg7[%c0_194] : memref<1xi32, #tpu.memory_space<smem>>
    memref.store %500, %arg7[%c0_194] : memref<1xi32, #tpu.memory_space<smem>>
    %c256_195 = arith.constant 256 : index
    %c0_196 = arith.constant 0 : index
    %502 = vector.load %arg0[%c256_195, %c0_196] : memref<512x384xf32, #tpu.memory_space<vmem>>, vector<128x384xf32>
    %cst_197 = arith.constant dense<0.000000e+00> : vector<1x384xf32>
    %503 = tpu.matmul %452, %502, %cst_197 {dimension_numbers = #tpu.dot_dimension_numbers<[1], [0], [0], [1], [0, 0, 1, 1], [], []>} : vector<1x128xf32>, vector<128x384xf32>, vector<1x384xf32> -> vector<1x384xf32>
    %c0_198 = arith.constant 0 : index
    %c0_199 = arith.constant 0 : index
    %504 = vector.load %arg6[%c0_198, %c0_199] : memref<128x384xf32, #tpu.memory_space<vmem>>, vector<128x384xf32>
    %cst_200 = arith.constant dense<0.000000e+00> : vector<1x384xf32>
    %505 = tpu.matmul %467, %504, %cst_200 {dimension_numbers = #tpu.dot_dimension_numbers<[1], [0], [0], [1], [0, 0, 1, 1], [], []>} : vector<1x128xf32>, vector<128x384xf32>, vector<1x384xf32> -> vector<1x384xf32>
    %506 = vector.extract_strided_slice %505 {offsets = [0, 0], sizes = [1, 128], strides = [1, 1]} : vector<1x384xf32> to vector<1x128xf32>
    %507 = vector.extract_strided_slice %503 {offsets = [0, 0], sizes = [1, 128], strides = [1, 1]} : vector<1x384xf32> to vector<1x128xf32>
    %508 = arith.addf %506, %507 : vector<1x128xf32>
    %509 = arith.negf %508 : vector<1x128xf32>
    %510 = math.exp %509 : vector<1x128xf32>
    %cst_201 = arith.constant 1.000000e+00 : f32
    %511 = vector.broadcast %cst_201 : f32 to vector<1x128xf32>
    %512 = arith.addf %511, %510 : vector<1x128xf32>
    %513 = arith.divf %511, %512 : vector<1x128xf32>
    %514 = vector.extract_strided_slice %505 {offsets = [0, 128], sizes = [1, 128], strides = [1, 1]} : vector<1x384xf32> to vector<1x128xf32>
    %515 = vector.extract_strided_slice %503 {offsets = [0, 128], sizes = [1, 128], strides = [1, 1]} : vector<1x384xf32> to vector<1x128xf32>
    %516 = arith.addf %514, %515 : vector<1x128xf32>
    %517 = arith.negf %516 : vector<1x128xf32>
    %518 = math.exp %517 : vector<1x128xf32>
    %cst_202 = arith.constant 1.000000e+00 : f32
    %519 = vector.broadcast %cst_202 : f32 to vector<1x128xf32>
    %520 = arith.addf %519, %518 : vector<1x128xf32>
    %521 = arith.divf %519, %520 : vector<1x128xf32>
    %522 = vector.extract_strided_slice %505 {offsets = [0, 256], sizes = [1, 128], strides = [1, 1]} : vector<1x384xf32> to vector<1x128xf32>
    %523 = vector.extract_strided_slice %503 {offsets = [0, 256], sizes = [1, 128], strides = [1, 1]} : vector<1x384xf32> to vector<1x128xf32>
    %524 = arith.addf %523, %2 : vector<1x128xf32>
    %525 = arith.mulf %513, %524 : vector<1x128xf32>
    %526 = arith.addf %522, %525 : vector<1x128xf32>
    %527 = math.tanh %526 : vector<1x128xf32>
    %cst_203 = arith.constant 1.000000e+00 : f32
    %528 = vector.broadcast %cst_203 : f32 to vector<1x128xf32>
    %529 = arith.subf %528, %521 : vector<1x128xf32>
    %530 = arith.mulf %529, %527 : vector<1x128xf32>
    %531 = arith.mulf %521, %452 : vector<1x128xf32>
    %532 = arith.addf %530, %531 : vector<1x128xf32>
    %c384_204 = arith.constant 384 : index
    %c0_205 = arith.constant 0 : index
    %533 = vector.load %arg0[%c384_204, %c0_205] : memref<512x384xf32, #tpu.memory_space<vmem>>, vector<128x128xf32>
    %cst_206 = arith.constant dense<0.000000e+00> : vector<1x128xf32>
    %534 = tpu.matmul %532, %533, %cst_206 {dimension_numbers = #tpu.dot_dimension_numbers<[1], [0], [0], [1], [0, 0, 1, 1], [], []>} : vector<1x128xf32>, vector<128x128xf32>, vector<1x128xf32> -> vector<1x128xf32>
    %535 = arith.addf %534, %3 : vector<1x128xf32>
    %cst_207 = arith.constant dense<0xFF800000> : vector<1xf32>
    %536 = vector.multi_reduction <maximumf>, %535, %cst_207 [1] : vector<1x128xf32> to vector<1xf32>
    %537 = vector.shape_cast %536 : vector<1xf32> to vector<1x1xf32>
    %538 = vector.broadcast %537 : vector<1x1xf32> to vector<1x128xf32>
    %539 = arith.cmpf oeq, %535, %538 : vector<1x128xf32>
    %c128_i32_208 = arith.constant 128 : i32
    %540 = vector.broadcast %c128_i32_208 : i32 to vector<1x128xi32>
    %541 = arith.select %539, %0, %540 : vector<1x128xi1>, vector<1x128xi32>
    %cst_209 = arith.constant dense<2147483647> : vector<1xi32>
    %542 = vector.multi_reduction <minsi>, %541, %cst_209 [1] : vector<1x128xi32> to vector<1xi32>
    %543 = vector.shape_cast %542 : vector<1xi32> to vector<1x1xi32>
    %544 = vector.broadcast %543 : vector<1x1xi32> to vector<1x128xi32>
    %545 = arith.cmpi eq, %0, %544 : vector<1x128xi32>
    %546 = arith.extui %545 : vector<1x128xi1> to vector<1x128xi32>
    %547 = arith.sitofp %546 : vector<1x128xi32> to vector<1x128xf32>
    %548 = vector.broadcast %537 : vector<1x1xf32> to vector<1x128xf32>
    %549 = arith.subf %535, %548 : vector<1x128xf32>
    %550 = math.exp %549 : vector<1x128xf32>
    %cst_210 = arith.constant dense<0.000000e+00> : vector<1xf32>
    %551 = vector.multi_reduction <add>, %550, %cst_210 [1] : vector<1x128xf32> to vector<1xf32>
    %552 = vector.shape_cast %551 : vector<1xf32> to vector<1x1xf32>
    %553 = math.log %552 : vector<1x1xf32>
    %554 = arith.addf %537, %553 : vector<1x1xf32>
    %555 = vector.broadcast %554 : vector<1x1xf32> to vector<1x128xf32>
    %556 = arith.subf %535, %555 : vector<1x128xf32>
    %c6 = arith.constant 6 : index
    %c0_211 = arith.constant 0 : index
    %557 = vector.load %arg3[%c6, %c0_211] : memref<8x128xf32, #tpu.memory_space<vmem>>, vector<1x128xf32>
    tpu.vector_store %arg3[%c6, %c0_211], %556 {strides = array<i32>} : memref<8x128xf32, #tpu.memory_space<vmem>>, vector<1x128xf32>,
    %558 = vector.shape_cast %543 : vector<1x1xi32> to vector<1x1x1xi32>
    %cst_212 = arith.constant dense<-2147483648> : vector<1xi32>
    %559 = vector.multi_reduction <maxsi>, %558, %cst_212 [1, 2] : vector<1x1x1xi32> to vector<1xi32>
    %560 = vector.shape_cast %559 : vector<1xi32> to vector<1x1x1xi32>
    %561 = vector.extract %560[0, 0, 0] : i32 from vector<1x1x1xi32>
    %c1_i32_213 = arith.constant 1 : i32
    %562 = arith.cmpi eq, %561, %c1_i32_213 : i32
    %563 = arith.extui %562 : i1 to i32
    %c0_214 = arith.constant 0 : index
    %564 = memref.load %arg7[%c0_214] : memref<1xi32, #tpu.memory_space<smem>>
    %c1_i32_215 = arith.constant 1 : i32
    %565 = arith.subi %c1_i32_215, %564 : i32
    %c1_i32_216 = arith.constant 1 : i32
    %566 = arith.subi %c1_i32_216, %563 : i32
    %567 = arith.muli %565, %566 : i32
    %568 = arith.muli %567, %561 : i32
    %c1_i32_217 = arith.constant 1 : i32
    %569 = arith.subi %567, %c1_i32_217 : i32
    %570 = arith.addi %568, %569 : i32
    %c6_218 = arith.constant 6 : index
    %571 = memref.load %arg4[%c6_218] : memref<8xi32, #tpu.memory_space<smem>>
    memref.store %570, %arg4[%c6_218] : memref<8xi32, #tpu.memory_space<smem>>
    %c0_219 = arith.constant 0 : index
    %572 = memref.load %arg5[%c0_219] : memref<2xi32, #tpu.memory_space<smem>>
    %573 = arith.addi %572, %565 : i32
    %c0_220 = arith.constant 0 : index
    %574 = memref.load %arg5[%c0_220] : memref<2xi32, #tpu.memory_space<smem>>
    memref.store %573, %arg5[%c0_220] : memref<2xi32, #tpu.memory_space<smem>>
    %c1_221 = arith.constant 1 : index
    %575 = memref.load %arg5[%c1_221] : memref<2xi32, #tpu.memory_space<smem>>
    %576 = arith.addi %575, %567 : i32
    %c1_222 = arith.constant 1 : index
    %577 = memref.load %arg5[%c1_222] : memref<2xi32, #tpu.memory_space<smem>>
    memref.store %576, %arg5[%c1_222] : memref<2xi32, #tpu.memory_space<smem>>
    %c0_223 = arith.constant 0 : index
    %578 = memref.load %arg7[%c0_223] : memref<1xi32, #tpu.memory_space<smem>>
    %579 = arith.muli %565, %563 : i32
    %580 = arith.addi %578, %579 : i32
    %c0_224 = arith.constant 0 : index
    %581 = memref.load %arg7[%c0_224] : memref<1xi32, #tpu.memory_space<smem>>
    memref.store %580, %arg7[%c0_224] : memref<1xi32, #tpu.memory_space<smem>>
    %c256_225 = arith.constant 256 : index
    %c0_226 = arith.constant 0 : index
    %582 = vector.load %arg0[%c256_225, %c0_226] : memref<512x384xf32, #tpu.memory_space<vmem>>, vector<128x384xf32>
    %cst_227 = arith.constant dense<0.000000e+00> : vector<1x384xf32>
    %583 = tpu.matmul %532, %582, %cst_227 {dimension_numbers = #tpu.dot_dimension_numbers<[1], [0], [0], [1], [0, 0, 1, 1], [], []>} : vector<1x128xf32>, vector<128x384xf32>, vector<1x384xf32> -> vector<1x384xf32>
    %c0_228 = arith.constant 0 : index
    %c0_229 = arith.constant 0 : index
    %584 = vector.load %arg6[%c0_228, %c0_229] : memref<128x384xf32, #tpu.memory_space<vmem>>, vector<128x384xf32>
    %cst_230 = arith.constant dense<0.000000e+00> : vector<1x384xf32>
    %585 = tpu.matmul %547, %584, %cst_230 {dimension_numbers = #tpu.dot_dimension_numbers<[1], [0], [0], [1], [0, 0, 1, 1], [], []>} : vector<1x128xf32>, vector<128x384xf32>, vector<1x384xf32> -> vector<1x384xf32>
    %586 = vector.extract_strided_slice %585 {offsets = [0, 0], sizes = [1, 128], strides = [1, 1]} : vector<1x384xf32> to vector<1x128xf32>
    %587 = vector.extract_strided_slice %583 {offsets = [0, 0], sizes = [1, 128], strides = [1, 1]} : vector<1x384xf32> to vector<1x128xf32>
    %588 = arith.addf %586, %587 : vector<1x128xf32>
    %589 = arith.negf %588 : vector<1x128xf32>
    %590 = math.exp %589 : vector<1x128xf32>
    %cst_231 = arith.constant 1.000000e+00 : f32
    %591 = vector.broadcast %cst_231 : f32 to vector<1x128xf32>
    %592 = arith.addf %591, %590 : vector<1x128xf32>
    %593 = arith.divf %591, %592 : vector<1x128xf32>
    %594 = vector.extract_strided_slice %585 {offsets = [0, 128], sizes = [1, 128], strides = [1, 1]} : vector<1x384xf32> to vector<1x128xf32>
    %595 = vector.extract_strided_slice %583 {offsets = [0, 128], sizes = [1, 128], strides = [1, 1]} : vector<1x384xf32> to vector<1x128xf32>
    %596 = arith.addf %594, %595 : vector<1x128xf32>
    %597 = arith.negf %596 : vector<1x128xf32>
    %598 = math.exp %597 : vector<1x128xf32>
    %cst_232 = arith.constant 1.000000e+00 : f32
    %599 = vector.broadcast %cst_232 : f32 to vector<1x128xf32>
    %600 = arith.addf %599, %598 : vector<1x128xf32>
    %601 = arith.divf %599, %600 : vector<1x128xf32>
    %602 = vector.extract_strided_slice %585 {offsets = [0, 256], sizes = [1, 128], strides = [1, 1]} : vector<1x384xf32> to vector<1x128xf32>
    %603 = vector.extract_strided_slice %583 {offsets = [0, 256], sizes = [1, 128], strides = [1, 1]} : vector<1x384xf32> to vector<1x128xf32>
    %604 = arith.addf %603, %2 : vector<1x128xf32>
    %605 = arith.mulf %593, %604 : vector<1x128xf32>
    %606 = arith.addf %602, %605 : vector<1x128xf32>
    %607 = math.tanh %606 : vector<1x128xf32>
    %cst_233 = arith.constant 1.000000e+00 : f32
    %608 = vector.broadcast %cst_233 : f32 to vector<1x128xf32>
    %609 = arith.subf %608, %601 : vector<1x128xf32>
    %610 = arith.mulf %609, %607 : vector<1x128xf32>
    %611 = arith.mulf %601, %532 : vector<1x128xf32>
    %612 = arith.addf %610, %611 : vector<1x128xf32>
    %c384_234 = arith.constant 384 : index
    %c0_235 = arith.constant 0 : index
    %613 = vector.load %arg0[%c384_234, %c0_235] : memref<512x384xf32, #tpu.memory_space<vmem>>, vector<128x128xf32>
    %cst_236 = arith.constant dense<0.000000e+00> : vector<1x128xf32>
    %614 = tpu.matmul %612, %613, %cst_236 {dimension_numbers = #tpu.dot_dimension_numbers<[1], [0], [0], [1], [0, 0, 1, 1], [], []>} : vector<1x128xf32>, vector<128x128xf32>, vector<1x128xf32> -> vector<1x128xf32>
    %615 = arith.addf %614, %3 : vector<1x128xf32>
    %cst_237 = arith.constant dense<0xFF800000> : vector<1xf32>
    %616 = vector.multi_reduction <maximumf>, %615, %cst_237 [1] : vector<1x128xf32> to vector<1xf32>
    %617 = vector.shape_cast %616 : vector<1xf32> to vector<1x1xf32>
    %618 = vector.broadcast %617 : vector<1x1xf32> to vector<1x128xf32>
    %619 = arith.cmpf oeq, %615, %618 : vector<1x128xf32>
    %c128_i32_238 = arith.constant 128 : i32
    %620 = vector.broadcast %c128_i32_238 : i32 to vector<1x128xi32>
    %621 = arith.select %619, %0, %620 : vector<1x128xi1>, vector<1x128xi32>
    %cst_239 = arith.constant dense<2147483647> : vector<1xi32>
    %622 = vector.multi_reduction <minsi>, %621, %cst_239 [1] : vector<1x128xi32> to vector<1xi32>
    %623 = vector.shape_cast %622 : vector<1xi32> to vector<1x1xi32>
    %624 = vector.broadcast %617 : vector<1x1xf32> to vector<1x128xf32>
    %625 = arith.subf %615, %624 : vector<1x128xf32>
    %626 = math.exp %625 : vector<1x128xf32>
    %cst_240 = arith.constant dense<0.000000e+00> : vector<1xf32>
    %627 = vector.multi_reduction <add>, %626, %cst_240 [1] : vector<1x128xf32> to vector<1xf32>
    %628 = vector.shape_cast %627 : vector<1xf32> to vector<1x1xf32>
    %629 = math.log %628 : vector<1x1xf32>
    %630 = arith.addf %617, %629 : vector<1x1xf32>
    %631 = vector.broadcast %630 : vector<1x1xf32> to vector<1x128xf32>
    %632 = arith.subf %615, %631 : vector<1x128xf32>
    %c7 = arith.constant 7 : index
    %c0_241 = arith.constant 0 : index
    %633 = vector.load %arg3[%c7, %c0_241] : memref<8x128xf32, #tpu.memory_space<vmem>>, vector<1x128xf32>
    tpu.vector_store %arg3[%c7, %c0_241], %632 {strides = array<i32>} : memref<8x128xf32, #tpu.memory_space<vmem>>, vector<1x128xf32>,
    %634 = vector.shape_cast %623 : vector<1x1xi32> to vector<1x1x1xi32>
    %cst_242 = arith.constant dense<-2147483648> : vector<1xi32>
    %635 = vector.multi_reduction <maxsi>, %634, %cst_242 [1, 2] : vector<1x1x1xi32> to vector<1xi32>
    %636 = vector.shape_cast %635 : vector<1xi32> to vector<1x1x1xi32>
    %637 = vector.extract %636[0, 0, 0] : i32 from vector<1x1x1xi32>
    %c1_i32_243 = arith.constant 1 : i32
    %638 = arith.cmpi eq, %637, %c1_i32_243 : i32
    %639 = arith.extui %638 : i1 to i32
    %c0_244 = arith.constant 0 : index
    %640 = memref.load %arg7[%c0_244] : memref<1xi32, #tpu.memory_space<smem>>
    %c1_i32_245 = arith.constant 1 : i32
    %641 = arith.subi %c1_i32_245, %640 : i32
    %c1_i32_246 = arith.constant 1 : i32
    %642 = arith.subi %c1_i32_246, %639 : i32
    %643 = arith.muli %641, %642 : i32
    %644 = arith.muli %643, %637 : i32
    %c1_i32_247 = arith.constant 1 : i32
    %645 = arith.subi %643, %c1_i32_247 : i32
    %646 = arith.addi %644, %645 : i32
    %c7_248 = arith.constant 7 : index
    %647 = memref.load %arg4[%c7_248] : memref<8xi32, #tpu.memory_space<smem>>
    memref.store %646, %arg4[%c7_248] : memref<8xi32, #tpu.memory_space<smem>>
    %c0_249 = arith.constant 0 : index
    %648 = memref.load %arg5[%c0_249] : memref<2xi32, #tpu.memory_space<smem>>
    %649 = arith.addi %648, %641 : i32
    %c0_250 = arith.constant 0 : index
    %650 = memref.load %arg5[%c0_250] : memref<2xi32, #tpu.memory_space<smem>>
    memref.store %649, %arg5[%c0_250] : memref<2xi32, #tpu.memory_space<smem>>
    %c1_251 = arith.constant 1 : index
    %651 = memref.load %arg5[%c1_251] : memref<2xi32, #tpu.memory_space<smem>>
    %652 = arith.addi %651, %643 : i32
    %c1_252 = arith.constant 1 : index
    %653 = memref.load %arg5[%c1_252] : memref<2xi32, #tpu.memory_space<smem>>
    memref.store %652, %arg5[%c1_252] : memref<2xi32, #tpu.memory_space<smem>>
    %c0_253 = arith.constant 0 : index
    %654 = memref.load %arg7[%c0_253] : memref<1xi32, #tpu.memory_space<smem>>
    %655 = arith.muli %641, %639 : i32
    %656 = arith.addi %654, %655 : i32
    %c0_254 = arith.constant 0 : index
    %657 = memref.load %arg7[%c0_254] : memref<1xi32, #tpu.memory_space<smem>>
    memref.store %656, %arg7[%c0_254] : memref<1xi32, #tpu.memory_space<smem>>
    return
  }
}

</mosaic_0001>

<bundles_post_ra>
// kernel: tpu_custom_call.1
= control target key start
LH: loop header
LB: loop body
LE: loop exit
PB: predicated region body
PF: predicated region fallthrough
CT: control target
= control target key end

     0   :  { %11 = vsyncpa [#allocation5], 0  ;;  %s9621_s0 = inlined_call_operand.hbm [shape: f32[512,384], index: 0, kind: input, shape index: {}]   ;;  %s9622_s1 = inlined_call_operand.hbm [shape: f32[128,128], index: 1, kind: input, shape index: {}]   ;;  %s9623_s2 = inlined_call_operand.hbm [shape: f32[32,384], index: 2, kind: input, shape index: {}]   ;;  %s9624_s3 = inlined_call_operand.hbm [shape: f32[8,128], index: 3, kind: output, shape index: {0}]   ;;  %s9625_s4 = inlined_call_operand.hbm [shape: s32[8], index: 4, kind: output, shape index: {1}]   ;;  %s9626_s5 = inlined_call_operand.hbm [shape: s32[2], index: 5, kind: output, shape index: {2}]  }
   0x1   :  { %12 = vsyncpa [#allocation9], 0 }
   0x2   :  { %13 = vsyncpa [#allocation6], 0 }
   0x3   :  { %14 = vsyncpa [#allocation7], 0 }
   0x4   :  { %15 = vsyncpa [#allocation14], 0  ;;  %s8068_s18 = smov [#allocation8]   ;;  %s7950_s22 = scalar_lea.hbm %s9622_s1, 2048 }
   0x5   :  { %s33_s19 = sshll.u32 %s8068_s18, 4  ;;  %p7951_p0 = scmp.ne.s32.totalorder %s9622_s1, %s7950_s22  ;;  %s34_s19 = int_to_ptr.vmem [resolvable:$true] %s33_s19 }
   0x6   :  { %p7954_p1 = scmp.lt.u32.totalorder %s7950_s22, %s9622_s1 }
   0x8   :  { %p7956_p2 = pnand %p7954_p1, %p7951_p0 }
   0xa   :  { %7959 = shalt.err (!%p7956_p2)
}
   0xb   :  { %s7960_s27 = scalar_lea.vmem %s34_s19, 2048  ;;  %p7965_p4 = scmp.lt.s32.totalorder %s34_s19, %s34_s19 }
   0xc   :  { %p7961_p3 = scmp.ne.s32.totalorder %s34_s19, %s7960_s27  ;;  %p7966_p5 = scmp.lt.s32.totalorder %s7960_s27, %s7960_s27 }
   0xe   :  { %p7967_p6 = por %p7966_p5, %p7965_p4 }
  0x10   :  { %p7968_p7 = pnand %p7967_p6, %p7961_p3 }
  0x12   :  { %7971 = shalt.err (!%p7968_p7)
}
  0x13   :  { %s8069_s28 = smov 128   ;;  %s8070_s29 = smov 8  }
  0x14   :  { %39 = dma.hbm_to_vmem [thread:$0]  %s9622_s1, 2048, %s34_s19, [#allocation9], %s8069_s28, %s8069_s28, %s8070_s29  }
  0x15   :  { %s8071_s7 = smov [#allocation4]   ;;  %s7972_s11 = scalar_lea.hbm %s9621_s0, 24576 }
  0x16   :  { %s21_s8 = sshll.u32 %s8071_s7, 4  ;;  %p7973_p8 = scmp.ne.s32.totalorder %s9621_s0, %s7972_s11  ;;  %s22_s8 = int_to_ptr.vmem [resolvable:$true] %s21_s8 }
  0x17   :  { %p7976_p9 = scmp.lt.u32.totalorder %s7972_s11, %s9621_s0 }
  0x19   :  { %p7978_p10 = pnand %p7976_p9, %p7973_p8 }
  0x1b   :  { %7981 = shalt.err (!%p7978_p10)
}
  0x1c   :  { %s7982_s16 = scalar_lea.vmem %s22_s8, 24576  ;;  %p7987_p12 = scmp.lt.s32.totalorder %s22_s8, %s22_s8 }
  0x1d   :  { %p7983_p11 = scmp.ne.s32.totalorder %s22_s8, %s7982_s16  ;;  %p7988_p13 = scmp.lt.s32.totalorder %s7982_s16, %s7982_s16 }
  0x1f   :  { %p7989_p0 = por %p7988_p13, %p7987_p12 }
  0x21   :  { %p7990_p1 = pnand %p7989_p0, %p7983_p11 }
  0x23   :  { %7993 = shalt.err (!%p7990_p1)
}
  0x24   :  { %s8072_s1 = smov 384   ;;  %s8073_s17 = smov 24  }
  0x25   :  { %27 = dma.hbm_to_vmem [thread:$0]  %s9621_s0, 24576, %s22_s8, [#allocation5], %s8072_s1, %s8072_s1, %s8073_s17  }
  0x26   :  { %s8074_s20 = smov [#allocation10]   ;;  %s7994_s24 = scalar_lea.hbm %s9623_s2, 1536 }
  0x27   :  { %s45_s21 = sshll.u32 %s8074_s20, 4  ;;  %p7995_p2 = scmp.ne.s32.totalorder %s9623_s2, %s7994_s24  ;;  %s46_s21 = int_to_ptr.vmem [resolvable:$true] %s45_s21 }
  0x28   :  { %p7998_p3 = scmp.lt.u32.totalorder %s7994_s24, %s9623_s2 }
  0x2a   :  { %p8000_p4 = pnand %p7998_p3, %p7995_p2 }
  0x2c   :  { %8003 = shalt.err (!%p8000_p4)
}
  0x2d   :  { %s8004_s29 = scalar_lea.vmem %s46_s21, 1536  ;;  %p8009_p6 = scmp.lt.s32.totalorder %s46_s21, %s46_s21 }
  0x2e   :  { %p8005_p5 = scmp.ne.s32.totalorder %s46_s21, %s8004_s29  ;;  %p8010_p7 = scmp.lt.s32.totalorder %s8004_s29, %s8004_s29 }
  0x30   :  { %p8011_p8 = por %p8010_p7, %p8009_p6 }
  0x32   :  { %p8012_p9 = pnand %p8011_p8, %p8005_p5 }
  0x34   :  { %8015 = shalt.err (!%p8012_p9)
}
  0x35   :  { %51 = dma.hbm_to_vmem [thread:$0]  %s9623_s2, 1536, %s46_s21, [#allocation9], %s8072_s1, %s8072_s1, %s8073_s17  }
  0x36   :  { %8058 = dma.done.wait [#allocation5], 24576  }
  0x37   :  { %8059 = vsyncadd [#allocation5], 4294942720 }
  0x38   :  { %8060 = dma.done.wait [#allocation9], 3584  }
  0x39   :  { %8061 = vsyncadd [#allocation9], 4294963712  ;;  %v9631_v0 = vmov 0.0|0.0   ;;  %v9629_v1 = vmov 0.0   ;;  %vm8077_vm0 = vmmov 0   ;;  %v132_v2 = vld [vmem:[#allocation4 + $0x8] sm:$0xff] }
  0x3a   :  { %6610 = vmatprep.subr.bf16.mxu1 %v9631_v0  ;;  %243 = vmatprep.mubr.f32.mxu0 %v9629_v1  ;;  %v135_v3 = vld [vmem:[#allocation4 + $0x20] sm:$0xff]  ;;  %v133_v4 = vld [vmem:[#allocation4 + $0x10] sm:$0xff]  ;;  %v136_v6 = vld [vmem:[#allocation4 + $0x28] sm:$0xff]  ;;  %vm1245_vm2 = vcmask 1040384  }
  0x3b   :  { %5679 = vmatprep.mubr.msk.f32.mxu1 %vm8077_vm0, %v9629_v1  ;;  %v6578_v5 = vpack.c.bf16 %v135_v3, %v132_v2  ;;  %v131_v7 = vld [vmem:[#allocation4] sm:$0xff]  ;;  %v134_v8 = vld [vmem:[#allocation4 + $0x18] sm:$0xff]  ;;  %v6611_v9 = vpack.c.bf16 %v136_v6, %v133_v4  ;;  %v141_v12 = vld [vmem:[#allocation4 + $0x50] sm:$0xff] }
  0x3c   :  { %v6580_v10 = vpack.c.bf16 %v134_v8, %v131_v7  ;;  %v138_v11 = vld [vmem:[#allocation4 + $0x38] sm:$0xff]  ;;  %v139_v13 = vld [vmem:[#allocation4 + $0x40] sm:$0xff]  ;;  %v137_v16 = vld [vmem:[#allocation4 + $0x30] sm:$0xff] }
  0x3d   :  { %6579 = vmatprep.subr.bf16.mxu0 %v6578_v5  ;;  %v6582_v14 = vpack.c.bf16 %v141_v12, %v138_v11  ;;  %v142_v15 = vld [vmem:[#allocation4 + $0x58] sm:$0xff]  ;;  %v140_v17 = vld [vmem:[#allocation4 + $0x48] sm:$0xff]  ;;  %6612 = vmatpush3.bf16.msra.mxu1 %v6611_v9  ;;  %v147_v21 = vld [vmem:[#allocation4 + $0x80] sm:$0xff] }
  0x3e   :  { %6581 = vmatpush1.bf16.msra.mxu0 %v6580_v10  ;;  %v6614_v18 = vpack.c.bf16 %v142_v15, %v139_v13  ;;  %v6584_v19 = vpack.c.bf16 %v140_v17, %v137_v16  ;;  %v144_v20 = vld [vmem:[#allocation4 + $0x68] sm:$0xff]  ;;  %v145_v22 = vld [vmem:[#allocation4 + $0x70] sm:$0xff]  ;;  %6613 = vmatprep.subr.bf16.mxu1 %v9631_v0  ;;  %v143_v25 = vld [vmem:[#allocation4 + $0x60] sm:$0xff] }
  0x3f   :  { %6583 = vmatprep.subr.bf16.mxu0 %v6582_v14  ;;  %v6586_v23 = vpack.c.bf16 %v147_v21, %v144_v20  ;;  %v148_v24 = vld [vmem:[#allocation4 + $0x88] sm:$0xff]  ;;  %v146_v26 = vld [vmem:[#allocation4 + $0x78] sm:$0xff]  ;;  %v153_v28 = vld [vmem:[#allocation4 + $0xb0] sm:$0xff] }
  0x40   :  { %v150_v27 = vld [vmem:[#allocation4 + $0x98] sm:$0xff]  ;;  %v6617_v29 = vpack.c.bf16 %v148_v24, %v145_v22  ;;  %v6588_v30 = vpack.c.bf16 %v146_v26, %v143_v25  ;;  %v151_v31 = vld [vmem:[#allocation4 + $0xa0] sm:$0xff]  ;;  %v149_v34 = vld [vmem:[#allocation4 + $0x90] sm:$0xff] }
  0x41   :  { %6615 = vmatpush3.bf16.msra.mxu1 %v6614_v18  ;;  %v6590_v32 = vpack.c.bf16 %v153_v28, %v150_v27  ;;  %v154_v33 = vld [vmem:[#allocation4 + $0xb8] sm:$0xff]  ;;  %v152_v35 = vld [vmem:[#allocation4 + $0xa8] sm:$0xff]  ;;  %v159_v37 = vld [vmem:[#allocation4 + $0xe0] sm:$0xff] }
  0x42   :  { %6585 = vmatpush1.bf16.msra.mxu0 %v6584_v19  ;;  %6616 = vmatprep.subr.bf16.mxu1 %v9631_v0  ;;  %v156_v36 = vld [vmem:[#allocation4 + $0xc8] sm:$0xff]  ;;  %v6620_v38 = vpack.c.bf16 %v154_v33, %v151_v31  ;;  %v6592_v39 = vpack.c.bf16 %v152_v35, %v149_v34  ;;  %v157_v40 = vld [vmem:[#allocation4 + $0xd0] sm:$0xff]  ;;  %v155_v43 = vld [vmem:[#allocation4 + $0xc0] sm:$0xff] }
  0x43   :  { %6587 = vmatprep.subr.bf16.mxu0 %v6586_v23  ;;  %v6594_v41 = vpack.c.bf16 %v159_v37, %v156_v36  ;;  %v160_v42 = vld [vmem:[#allocation4 + $0xe8] sm:$0xff]  ;;  %v158_v44 = vld [vmem:[#allocation4 + $0xd8] sm:$0xff]  ;;  %v165_v46 = vld [vmem:[#allocation4 + $0x110] sm:$0xff] }
  0x44   :  { %v162_v45 = vld [vmem:[#allocation4 + $0xf8] sm:$0xff]  ;;  %v6623_v47 = vpack.c.bf16 %v160_v42, %v157_v40  ;;  %v6596_v48 = vpack.c.bf16 %v158_v44, %v155_v43  ;;  %v163_v49 = vld [vmem:[#allocation4 + $0x100] sm:$0xff]  ;;  %v161_v52 = vld [vmem:[#allocation4 + $0xf0] sm:$0xff] }
  0x45   :  { %6618 = vmatpush3.bf16.msra.mxu1 %v6617_v29  ;;  %v6598_v50 = vpack.c.bf16 %v165_v46, %v162_v45  ;;  %v166_v51 = vld [vmem:[#allocation4 + $0x118] sm:$0xff]  ;;  %v164_v53 = vld [vmem:[#allocation4 + $0x108] sm:$0xff]  ;;  %v171_v55 = vld [vmem:[#allocation4 + $0x140] sm:$0xff] }
  0x46   :  { %6589 = vmatpush1.bf16.msra.mxu0 %v6588_v30  ;;  %6619 = vmatprep.subr.bf16.mxu1 %v9631_v0  ;;  %v168_v54 = vld [vmem:[#allocation4 + $0x128] sm:$0xff]  ;;  %v6626_v56 = vpack.c.bf16 %v166_v51, %v163_v49  ;;  %v6600_v57 = vpack.c.bf16 %v164_v53, %v161_v52  ;;  %v169_v58 = vld [vmem:[#allocation4 + $0x130] sm:$0xff]  ;;  %v167_v61 = vld [vmem:[#allocation4 + $0x120] sm:$0xff] }
  0x47   :  { %6591 = vmatprep.subr.bf16.mxu0 %v6590_v32  ;;  %v6602_v59 = vpack.c.bf16 %v171_v55, %v168_v54  ;;  %v172_v60 = vld [vmem:[#allocation4 + $0x148] sm:$0xff]  ;;  %v170_v62 = vld [vmem:[#allocation4 + $0x138] sm:$0xff]  ;;  %v177_v2 = vld [vmem:[#allocation4 + $0x170] sm:$0xff] }
  0x48   :  { %v174_v63 = vld [vmem:[#allocation4 + $0x158] sm:$0xff]  ;;  %v6629_v3 = vpack.c.bf16 %v172_v60, %v169_v58  ;;  %v6604_v4 = vpack.c.bf16 %v170_v62, %v167_v61  ;;  %v175_v5 = vld [vmem:[#allocation4 + $0x160] sm:$0xff]  ;;  %v173_v8 = vld [vmem:[#allocation4 + $0x150] sm:$0xff] }
  0x49   :  { %6621 = vmatpush3.bf16.msra.mxu1 %v6620_v38  ;;  %v178_v6 = vld [vmem:[#allocation4 + $0x178] sm:$0xff]  ;;  %v6606_v7 = vpack.c.bf16 %v177_v2, %v174_v63  ;;  %v176_v9 = vld [vmem:[#allocation4 + $0x168] sm:$0xff]  ;;  %v85_v10 = vld [vmem:[#allocation4 + $0x190] sm:$0xff] }
  0x4a   :  { %6593 = vmatpush1.bf16.msra.mxu0 %v6592_v39  ;;  %6622 = vmatprep.subr.bf16.mxu1 %v9631_v0  ;;  %v88_v11 = vld [vmem:[#allocation4 + $0x1a8] sm:$0xff]  ;;  %v87_v13 = vld [vmem:[#allocation4 + $0x1a0] sm:$0xff]  ;;  %v6632_v14 = vpack.c.bf16 %v178_v6, %v175_v5  ;;  %v6608_v15 = vpack.c.bf16 %v176_v9, %v173_v8  ;;  %v86_v19 = vld [vmem:[#allocation4 + $0x198] sm:$0xff] }
  0x4b   :  { %6595 = vmatprep.subr.bf16.mxu0 %v6594_v41  ;;  %v84_v12 = vld [vmem:[#allocation4 + $0x188] sm:$0xff]  ;;  %v6666_v16 = vpack.c.bf16 %v88_v11, %v85_v10  ;;  %v83_v18 = vld [vmem:[#allocation4 + $0x180] sm:$0xff]  ;;  %v94_v21 = vld [vmem:[#allocation4 + $0x1d8] sm:$0xff] }
  0x4c   :  { %v6634_v17 = vpack.c.bf16 %v87_v13, %v84_v12  ;;  %v91_v20 = vld [vmem:[#allocation4 + $0x1c0] sm:$0xff]  ;;  %v90_v22 = vld [vmem:[#allocation4 + $0x1b8] sm:$0xff]  ;;  %v93_v23 = vld [vmem:[#allocation4 + $0x1d0] sm:$0xff]  ;;  %v6636_v25 = vpack.c.bf16 %v86_v19, %v83_v18 }
  0x4d   :  { %6624 = vmatpush3.bf16.msra.mxu1 %v6623_v47  ;;  %v8159_v24 = vld [vmem:[#allocation10 + $0x48] ss:$0 sm:$0xff]  ;;  %v6670_v26 = vpack.c.bf16 %v94_v21, %v91_v20  ;;  %v6638_v27 = vpack.c.bf16 %v93_v23, %v90_v22  ;;  %v89_v28 = vld [vmem:[#allocation4 + $0x1b0] sm:$0xff]  ;;  %v99_v33 = vld [vmem:[#allocation4 + $0x200] sm:$0xff] }
  0x4e   :  { %6597 = vmatpush1.bf16.msra.mxu0 %v6596_v48  ;;  %6625 = vmatprep.subr.bf16.mxu1 %v9631_v0  ;;  %v92_v29 = vld [vmem:[#allocation4 + $0x1c8] sm:$0xff]  ;;  %v97_v30 = vld [vmem:[#allocation4 + $0x1f0] sm:$0xff]  ;;  %v8163_v34 = vld [vmem:[#allocation8] sm:$0xff] }
  0x4f   :  { %6599 = vmatprep.subr.bf16.mxu0 %v6598_v50  ;;  %v100_v31 = vld [vmem:[#allocation4 + $0x208] sm:$0xff]  ;;  %v6640_v35 = vpack.c.bf16 %v92_v29, %v89_v28  ;;  %v95_v38 = vld [vmem:[#allocation4 + $0x1e0] sm:$0xff]  ;;  %v98_v39 = vld [vmem:[#allocation4 + $0x1f8] sm:$0xff] }
  0x50   :  { %v96_v32 = vld [vmem:[#allocation4 + $0x1e8] sm:$0xff]  ;;  %v6674_v36 = vpack.c.bf16 %v100_v31, %v97_v30  ;;  %v103_v40 = vld [vmem:[#allocation4 + $0x220] sm:$0xff]  ;;  %v106_v41 = vld [vmem:[#allocation4 + $0x238] sm:$0xff]  ;;  %v6644_v44 = vpack.c.bf16 %v98_v39, %v95_v38 }
  0x51   :  { %6627 = vmatpush3.bf16.msra.mxu1 %v6626_v56  ;;  %v6642_v37 = vpack.c.bf16 %v99_v33, %v96_v32  ;;  %v102_v42 = vld [vmem:[#allocation4 + $0x218] sm:$0xff]  ;;  %v105_v43 = vld [vmem:[#allocation4 + $0x230] sm:$0xff]  ;;  %v6678_v45 = vpack.c.bf16 %v106_v41, %v103_v40  ;;  %v104_v48 = vld [vmem:[#allocation4 + $0x228] sm:$0xff] }
  0x52   :  { %6601 = vmatpush1.bf16.msra.mxu0 %v6600_v57  ;;  %6628 = vmatprep.subr.bf16.mxu1 %v9631_v0  ;;  %v6646_v46 = vpack.c.bf16 %v105_v43, %v102_v42  ;;  %v101_v47 = vld [vmem:[#allocation4 + $0x210] sm:$0xff]  ;;  %v112_v50 = vld [vmem:[#allocation4 + $0x268] sm:$0xff]  ;;  %v111_v52 = vld [vmem:[#allocation4 + $0x260] sm:$0xff] }
  0x53   :  { %6603 = vmatprep.subr.bf16.mxu0 %v6602_v59  ;;  %v109_v49 = vld [vmem:[#allocation4 + $0x250] sm:$0xff]  ;;  %v108_v51 = vld [vmem:[#allocation4 + $0x248] sm:$0xff]  ;;  %v6648_v53 = vpack.c.bf16 %v104_v48, %v101_v47  ;;  %v107_v56 = vld [vmem:[#allocation4 + $0x240] sm:$0xff] }
  0x54   :  { %v6682_v54 = vpack.c.bf16 %v112_v50, %v109_v49  ;;  %v6650_v55 = vpack.c.bf16 %v111_v52, %v108_v51  ;;  %v110_v57 = vld [vmem:[#allocation4 + $0x258] sm:$0xff]  ;;  %v115_v58 = vld [vmem:[#allocation4 + $0x280] sm:$0xff]  ;;  %v117_v61 = vld [vmem:[#allocation4 + $0x290] sm:$0xff] }
  0x55   :  { %6630 = vmatpush3.bf16.msra.mxu1 %v6629_v3  ;;  %v118_v59 = vld [vmem:[#allocation4 + $0x298] sm:$0xff]  ;;  %v6652_v62 = vpack.c.bf16 %v110_v57, %v107_v56  ;;  %v113_v3 = vld [vmem:[#allocation4 + $0x270] sm:$0xff]  ;;  %v124_v6 = vld [vmem:[#allocation4 + $0x2c8] sm:$0xff] }
  0x56   :  { %6605 = vmatpush1.bf16.msra.mxu0 %v6604_v4  ;;  %6631 = vmatprep.subr.bf16.mxu1 %v9631_v0  ;;  %v114_v60 = vld [vmem:[#allocation4 + $0x278] sm:$0xff]  ;;  %v6686_v63 = vpack.c.bf16 %v118_v59, %v115_v58  ;;  %v116_v4 = vld [vmem:[#allocation4 + $0x288] sm:$0xff]  ;;  %v121_v5 = vld [vmem:[#allocation4 + $0x2b0] sm:$0xff] }
  0x57   :  { %6607 = vmatprep.subr.bf16.mxu0 %v6606_v7  ;;  %v6654_v2 = vpack.c.bf16 %v117_v61, %v114_v60  ;;  %v120_v7 = vld [vmem:[#allocation4 + $0x2a8] sm:$0xff]  ;;  %v123_v8 = vld [vmem:[#allocation4 + $0x2c0] sm:$0xff]  ;;  %v6656_v9 = vpack.c.bf16 %v116_v4, %v113_v3  ;;  %v6690_v10 = vpack.c.bf16 %v124_v6, %v121_v5  ;;  %v122_v13 = vld [vmem:[#allocation4 + $0x2b8] sm:$0xff] }
  0x58   :  { %v6658_v11 = vpack.c.bf16 %v123_v8, %v120_v7  ;;  %v119_v12 = vld [vmem:[#allocation4 + $0x2a0] sm:$0xff]  ;;  %v125_v21 = vld [vmem:[#allocation4 + $0x2d0] sm:$0xff]  ;;  %v128_v22 = vld [vmem:[#allocation4 + $0x2e8] sm:$0xff] }
  0x59   :  { %6633 = vmatpush3.bf16.msra.mxu1 %v6632_v14  ;;  %v127_v14 = vld [vmem:[#allocation4 + $0x2e0] sm:$0xff]  ;;  %v6660_v18 = vpack.c.bf16 %v122_v13, %v119_v12  ;;  %v6664_v23 = vpack.c.bf16 %v128_v22, %v125_v21  ;;  %v72_v29 = vld [vmem:[#allocation8 + $0x28] sm:$0xff]  ;;  %v73_v30 = vld [vmem:[#allocation8 + $0x30] sm:$0xff] }
  0x5a   :  { %6609 = vmatpush1.bf16.msra.mxu0 %v6608_v15  ;;  %6667 = vmatprep.subr.bf16.mxu1 %v6666_v16  ;;  %v130_v15 = vld [vmem:[#allocation4 + $0x2f8] sm:$0xff]  ;;  %v71_v28 = vld [vmem:[#allocation8 + $0x20] sm:$0xff]  ;;  %v76_v33 = vld [vmem:[#allocation8 + $0x48] sm:$0xff] }
  0x5b   :  { %6635 = vmatprep.subr.bf16.mxu0 %v6634_v17  ;;  %v129_v17 = vld [vmem:[#allocation4 + $0x2f0] sm:$0xff]  ;;  %v6694_v19 = vpack.c.bf16 %v130_v15, %v127_v14  ;;  %v74_v31 = vld [vmem:[#allocation8 + $0x38] sm:$0xff]  ;;  %v75_v32 = vld [vmem:[#allocation8 + $0x40] sm:$0xff] }
  0x5c   :  { %5680 = vmatmul.mubr.f32.vlgmr.msra.gmra.mrb[0].mxu1 %v8159_v24  ;;  %v81_v38 = vld [vmem:[#allocation8 + $0x70] sm:$0xff]  ;;  %v82_v39 = vld [vmem:[#allocation8 + $0x78] sm:$0xff]  ;;  %v764_v41 = vld [vmem:[#allocation4 + $0x328] sm:$0xff] }
  0x5d   :  { %244 = vmatmul.mubr.f32.vlgmr.msra.gmra.mrb[0].mxu0 %v8159_v24  ;;  %6669 = vmatpush3.bf16.msra.mxu1 %v6666_v16  ;;  %v126_v16 = vld [vmem:[#allocation4 + $0x2d8] sm:$0xff]  ;;  %v761_v40 = vld [vmem:[#allocation4 + $0x310] sm:$0xff]  ;;  %v767_v42 = vld [vmem:[#allocation4 + $0x340] sm:$0xff] }
  0x5e   :  { %6637 = vmatpush1.bf16.msra.mxu0 %v6636_v25  ;;  %6671 = vmatprep.subr.bf16.mxu1 %v6670_v26  ;;  %v6662_v20 = vpack.c.bf16 %v129_v17, %v126_v16  ;;  %v68_v25 = vld [vmem:[#allocation8 + $0x8] sm:$0xff]  ;;  %v8184_v43 = vpack.c.bf16 %v764_v41, %v761_v40  ;;  %v759_v48 = vld [vmem:[#allocation4 + $0x300] sm:$0xff]  ;;  %v762_v49 = vld [vmem:[#allocation4 + $0x318] sm:$0xff] }
  0x5f   :  { %6639 = vmatprep.subr.bf16.mxu0 %v6638_v27  ;;  %5714 = vmatprep.mubr.f32.mxu1 %v8163_v34  ;;  %v70_v27 = vld [vmem:[#allocation8 + $0x18] sm:$0xff]  ;;  %v8188_v50 = vpack.c.bf16 %v762_v49, %v759_v48  ;;  %v769_v52 = vld [vmem:[#allocation4 + $0x350] sm:$0xff]  ;;  %v768_v57 = vld [vmem:[#allocation4 + $0x348] sm:$0xff] }
  0x60   :  { %396 = vmatprep.mubr.f32.mxu0 %v9629_v1  ;;  %v766_v51 = vld [vmem:[#allocation4 + $0x338] sm:$0xff]  ;;  %v765_v56 = vld [vmem:[#allocation4 + $0x330] sm:$0xff]  ;;  %v776_v58 = vld [vmem:[#allocation4 + $0x388] sm:$0xff] }
  0x61   :  { %6673 = vmatpush3.bf16.msra.mxu1 %v6670_v26  ;;  %v69_v26 = vld [vmem:[#allocation8 + $0x10] sm:$0xff]  ;;  %v772_v59 = vld [vmem:[#allocation4 + $0x368] sm:$0xff]  ;;  %v775_v60 = vld [vmem:[#allocation4 + $0x380] sm:$0xff]  ;;  %v8199_v61 = vpack.c.bf16 %v768_v57, %v765_v56 }
  0x62   :  { %6641 = vmatpush1.bf16.msra.mxu0 %v6640_v35  ;;  %6675 = vmatprep.subr.bf16.mxu1 %v6674_v36  ;;  %v78_v35 = vld [vmem:[#allocation8 + $0x58] sm:$0xff]  ;;  %v781_v5 = vld [vmem:[#allocation4 + $0x3b0] sm:$0xff]  ;;  %v779_v6 = vld [vmem:[#allocation4 + $0x3a0] sm:$0xff] }
  0x63   :  { %6643 = vmatprep.subr.bf16.mxu0 %v6642_v37  ;;  %v80_v37 = vld [vmem:[#allocation8 + $0x68] sm:$0xff]  ;;  %v778_v4 = vld [vmem:[#allocation4 + $0x398] sm:$0xff]  ;;  %v787_v14 = vld [vmem:[#allocation4 + $0x3e0] sm:$0xff] }
  0x64   :  { %v782_v7 = vld [vmem:[#allocation4 + $0x3b8] sm:$0xff]  ;;  %v784_v13 = vld [vmem:[#allocation4 + $0x3c8] sm:$0xff]  ;;  %v785_v15 = vld [vmem:[#allocation4 + $0x3d0] sm:$0xff] }
  0x65   :  { %6677 = vmatpush3.bf16.msra.mxu1 %v6674_v36  ;;  %v79_v36 = vld [vmem:[#allocation8 + $0x60] sm:$0xff]  ;;  %v8217_v12 = vpack.c.bf16 %v782_v7, %v779_v6  ;;  %v788_v16 = vld [vmem:[#allocation4 + $0x3e8] sm:$0xff]  ;;  %v805_v48 = vld [vmem:[#allocation4 + $0x470] sm:$0xff] }
  0x66   :  { %6645 = vmatpush1.bf16.msra.mxu0 %v6644_v44  ;;  %6679 = vmatprep.subr.bf16.mxu1 %v6678_v45  ;;  %v770_v44 = vld [vmem:[#allocation4 + $0x358] sm:$0xff]  ;;  %v8227_v21 = vpack.c.bf16 %v788_v16, %v785_v15  ;;  %v791_v22 = vld [vmem:[#allocation4 + $0x400] sm:$0xff] }
  0x67   :  { %6647 = vmatprep.subr.bf16.mxu0 %v6646_v46  ;;  %v763_v46 = vld [vmem:[#allocation4 + $0x320] sm:$0xff] }
  0x68   :  { %v799_v40 = vld [vmem:[#allocation4 + $0x440] sm:$0xff] }
  0x69   :  { %6681 = vmatpush3.bf16.msra.mxu1 %v6678_v45  ;;  %v760_v45 = vld [vmem:[#allocation4 + $0x308] sm:$0xff] }
  0x6a   :  { %6649 = vmatpush1.bf16.msra.mxu0 %v6648_v53  ;;  %6683 = vmatprep.subr.bf16.mxu1 %v6682_v54  ;;  %v8186_v47 = vpack.c.bf16 %v763_v46, %v760_v45  ;;  %v8192_v53 = vpack.c.bf16 %v770_v44, %v767_v42  ;;  %v795_v42 = vld [vmem:[#allocation4 + $0x420] sm:$0xff]  ;;  %v798_v44 = vld [vmem:[#allocation4 + $0x438] sm:$0xff] }
  0x6b   :  { %6651 = vmatprep.subr.bf16.mxu0 %v6650_v55  ;;  %v8194_v55 = vpack.c.bf16 %v769_v52, %v766_v51  ;;  %v8256_v45 = vpack.c.bf16 %v798_v44, %v795_v42  ;;  %v802_v46 = vld [vmem:[#allocation4 + $0x458] sm:$0xff]  ;;  %v801_v51 = vld [vmem:[#allocation4 + $0x450] sm:$0xff]  ;;  %v804_v52 = vld [vmem:[#allocation4 + $0x468] sm:$0xff] }
  0x6c   :  { %v8262_v49 = vpack.c.bf16 %v805_v48, %v802_v46 }
  0x6d   :  { %6685 = vmatpush3.bf16.msra.mxu1 %v6682_v54  ;;  %v773_v54 = vld [vmem:[#allocation4 + $0x370] sm:$0xff] }
  0x6e   :  { %6653 = vmatpush1.bf16.msra.mxu0 %v6652_v62  ;;  %6687 = vmatprep.subr.bf16.mxu1 %v6686_v63  ;;  %v8202_v62 = vpack.c.bf16 %v775_v60, %v772_v59  ;;  %v8205_v3 = vpack.c.bf16 %v776_v58, %v773_v54  ;;  %v8264_v54 = vpack.c.bf16 %v804_v52, %v801_v51  ;;  %v61_v60 = vlaneseq }
  0x6f   :  { %6655 = vmatprep.subr.bf16.mxu0 %v6654_v2  ;;  %v774_v2 = vld [vmem:[#allocation4 + $0x378] sm:$0xff] }
  0x71   :  { %6689 = vmatpush3.bf16.msra.mxu1 %v6686_v63  ;;  %v771_v63 = vld [vmem:[#allocation4 + $0x360] sm:$0xff] }
  0x72   :  { %6657 = vmatpush1.bf16.msra.mxu0 %v6656_v9  ;;  %6691 = vmatprep.subr.bf16.mxu1 %v6690_v10  ;;  %v8211_v8 = vpack.c.bf16 %v774_v2, %v771_v63  ;;  %v8214_v9 = vpack.c.bf16 %v781_v5, %v778_v4  ;;  %v321_v63 = vshrl.u32 %v61_v60, 7  ;;  %v63_v5 = vld [vmem:[#allocation10] ss:$8 sm:$0x7] }
  0x73   :  { %6659 = vmatprep.subr.bf16.mxu0 %v6658_v11  ;;  %v780_v11 = vld [vmem:[#allocation4 + $0x3a8] sm:$0xff] }
  0x74   :  { %v322_v2 = vsub.s32 0, %v321_v63  ;;  %v649_v4 = vsub.s32 2, %v321_v63 }
  0x75   :  { %6693 = vmatpush3.bf16.msra.mxu1 %v6690_v10  ;;  %v777_v10 = vld [vmem:[#allocation4 + $0x390] sm:$0xff] }
  0x76   :  { %6661 = vmatpush1.bf16.msra.mxu0 %v6660_v18  ;;  %6695 = vmatprep.subr.bf16.mxu1 %v6694_v19  ;;  %v8221_v17 = vpack.c.bf16 %v780_v11, %v777_v10  ;;  %v8224_v18 = vpack.c.bf16 %v787_v14, %v784_v13  ;;  %v8277_v10 = vrot.slane %v63_v5, %v649_v4  ;;  %v645_v14 = vsub.s32 1, %v321_v63 }
  0x77   :  { %6663 = vmatprep.subr.bf16.mxu0 %v6662_v20  ;;  %v786_v20 = vld [vmem:[#allocation4 + $0x3d8] sm:$0xff] }
  0x79   :  { %6697 = vmatpush3.bf16.msra.mxu1 %v6694_v19  ;;  %v783_v19 = vld [vmem:[#allocation4 + $0x3c0] sm:$0xff] }
  0x7a   :  { %6665 = vmatpush1.bf16.msra.mxu0 %v6664_v23  ;;  %6699 = vmatprep.subr.bf16.mxu1 %v8186_v47  ;;  %v794_v23 = vld [vmem:[#allocation4 + $0x418] sm:$0xff] }
  0x7b   :  { %6730 = vmatprep.subr.bf16.mxu0 %v9631_v0 }
  0x7c   :  { %5715 = vmatmul.mubr.f32.vlgmr.msra.gmra.mrb[2].mxu1 %v68_v25 }
  0x7d   :  { %397 = vmatmul.mubr.f32.vlgmr.msra.gmra.mrb[2].mxu0 %v8163_v34  ;;  %5717 = vmatprep.mubr.f32.mxu1 %v69_v26  ;;  %v77_v34 = vld [vmem:[#allocation8 + $0x50] sm:$0xff] }
  0x7e   :  { %402 = vmatprep.mubr.f32.mxu0 %v9629_v1  ;;  %6732 = vmatpush3.bf16.msra.mxu0 %v8184_v43 }
  0x7f   :  { %6733 = vmatprep.subr.bf16.mxu0 %v9631_v0  ;;  %6701 = vmatpush1.bf16.msra.mxu1 %v8188_v50 }
  0x80   :  { %5718 = vmatmul.mubr.f32.gmra.mrb[4].mxu1 %v70_v27  ;;  %6703 = vmatprep.subr.bf16.mxu1 %v8194_v55 }
  0x81   :  { %403 = vmatmul.mubr.f32.gmra.mrb[4].mxu0 %v68_v25  ;;  %5720 = vmatprep.mubr.f32.mxu1 %v71_v28  ;;  %v8231_v25 = vpack.c.bf16 %v786_v20, %v783_v19 }
  0x82   :  { %408 = vmatprep.mubr.f32.mxu0 %v9629_v1  ;;  %6735 = vmatpush3.bf16.msra.mxu0 %v8192_v53 }
  0x83   :  { %6736 = vmatprep.subr.bf16.mxu0 %v9631_v0  ;;  %6705 = vmatpush1.bf16.msra.mxu1 %v8199_v61 }
  0x84   :  { %5721 = vmatmul.mubr.f32.gmra.mrb[6].mxu1 %v72_v29  ;;  %6707 = vmatprep.subr.bf16.mxu1 %v8202_v62 }
  0x85   :  { %409 = vmatmul.mubr.f32.gmra.mrb[6].mxu0 %v69_v26  ;;  %5723 = vmatprep.mubr.f32.mxu1 %v73_v30  ;;  %v8235_v26 = vpack.c.bf16 %v794_v23, %v791_v22 }
  0x86   :  { %414 = vmatprep.mubr.f32.mxu0 %v9629_v1  ;;  %6738 = vmatpush3.bf16.msra.mxu0 %v8205_v3 }
  0x87   :  { %6739 = vmatprep.subr.bf16.mxu0 %v9631_v0  ;;  %6709 = vmatpush1.bf16.msra.mxu1 %v8211_v8 }
  0x88   :  { %5724 = vmatmul.mubr.f32.gmra.mrb[8].mxu1 %v74_v31  ;;  %6711 = vmatprep.subr.bf16.mxu1 %v8214_v9 }
  0x89   :  { %415 = vmatmul.mubr.f32.gmra.mrb[8].mxu0 %v70_v27  ;;  %5726 = vmatprep.mubr.f32.mxu1 %v75_v32  ;;  %v797_v27 = vld [vmem:[#allocation4 + $0x430] sm:$0xff] }
  0x8a   :  { %420 = vmatprep.mubr.f32.mxu0 %v9629_v1  ;;  %6741 = vmatpush3.bf16.msra.mxu0 %v8217_v12 }
  0x8b   :  { %6742 = vmatprep.subr.bf16.mxu0 %v9631_v0  ;;  %6713 = vmatpush1.bf16.msra.mxu1 %v8221_v17 }
  0x8c   :  { %5727 = vmatmul.mubr.f32.gmra.mrb[10].mxu1 %v76_v33  ;;  %6715 = vmatprep.subr.bf16.mxu1 %v8224_v18 }
  0x8d   :  { %421 = vmatmul.mubr.f32.gmra.mrb[10].mxu0 %v71_v28  ;;  %5729 = vmatprep.mubr.f32.mxu1 %v77_v34  ;;  %v800_v28 = vld [vmem:[#allocation4 + $0x448] sm:$0xff] }
  0x8e   :  { %426 = vmatprep.mubr.f32.mxu0 %v9629_v1  ;;  %6744 = vmatpush3.bf16.msra.mxu0 %v8227_v21 }
  0x8f   :  { %6745 = vmatprep.subr.bf16.mxu0 %v9631_v0  ;;  %6717 = vmatpush1.bf16.msra.mxu1 %v8231_v25 }
  0x90   :  { %5730 = vmatmul.mubr.f32.gmra.mrb[12].mxu1 %v78_v35 }
  0x91   :  { %427 = vmatmul.mubr.f32.gmra.mrb[12].mxu0 %v72_v29  ;;  %5732 = vmatprep.mubr.f32.mxu1 %v79_v36  ;;  %v8241_v29 = vpack.c.bf16 %v800_v28, %v797_v27  ;;  %v8286_v28 = vrot.slane %v63_v5, %v322_v2 }
  0x92   :  { %432 = vmatprep.mubr.f32.mxu0 %v9629_v1  ;;  %6747 = vmatpush3.bf16.msra.mxu0 %v8235_v26 }
  0x93   :  { %6748 = vmatprep.subr.bf16.mxu0 %v9631_v0 }
  0x94   :  { %5733 = vmatmul.mubr.f32.gmra.mrb[14].mxu1 %v80_v37 }
  0x95   :  { %433 = vmatmul.mubr.f32.gmra.mrb[14].mxu0 %v73_v30  ;;  %5735 = vmatprep.mubr.f32.mxu1 %v81_v38  ;;  %v790_v30 = vld [vmem:[#allocation4 + $0x3f8] sm:$0xff] }
  0x96   :  { %438 = vmatprep.mubr.f32.mxu0 %v9629_v1  ;;  %6750 = vmatpush3.bf16.msra.mxu0 %v8241_v29 }
  0x97   :  { %6751 = vmatprep.subr.bf16.mxu0 %v9631_v0 }
  0x98   :  { %5736 = vmatmul.mubr.f32.gmra.mrb[16].mxu1 %v82_v39 }
  0x99   :  { %439 = vmatmul.mubr.f32.gmra.mrb[16].mxu0 %v74_v31  ;;  %871 = vmatprep.mubr.f32.mxu1 %v9629_v1  ;;  %v793_v31 = vld [vmem:[#allocation4 + $0x410] sm:$0xff] }
  0x9a   :  { %444 = vmatprep.mubr.f32.mxu0 %v9629_v1 }
  0x9d   :  { %445 = vmatmul.mubr.f32.gmra.mrb[18].mxu0 %v75_v32  ;;  %v8243_v32 = vpack.c.bf16 %v793_v31, %v790_v30  ;;  %v8289_v31 = vrot.slane %v63_v5, %v645_v14 }
  0x9e   :  { %450 = vmatprep.mubr.f32.mxu0 %v9629_v1 }
  0x9f   :  { %6719 = vmatprep.subr.bf16.mxu1 %v8243_v32 }
  0xa1   :  { %451 = vmatmul.mubr.f32.gmra.mrb[20].mxu0 %v76_v33  ;;  %v789_v33 = vld [vmem:[#allocation4 + $0x3f0] sm:$0xff] }
  0xa2   :  { %456 = vmatprep.mubr.f32.mxu0 %v9629_v1 }
  0xa5   :  { %457 = vmatmul.mubr.f32.gmra.mrb[22].mxu0 %v77_v34  ;;  %v792_v34 = vld [vmem:[#allocation4 + $0x408] sm:$0xff] }
  0xa6   :  { %462 = vmatprep.mubr.f32.mxu0 %v9629_v1 }
  0xa9   :  { %463 = vmatmul.mubr.f32.gmra.mrb[24].mxu0 %v78_v35  ;;  %v8246_v35 = vpack.c.bf16 %v792_v34, %v789_v33 }
  0xaa   :  { %468 = vmatprep.mubr.f32.mxu0 %v9629_v1 }
  0xab   :  { %6721 = vmatpush1.bf16.msra.mxu1 %v8246_v35 }
  0xad   :  { %469 = vmatmul.mubr.f32.gmra.mrb[26].mxu0 %v79_v36  ;;  %v803_v36 = vld [vmem:[#allocation4 + $0x460] sm:$0xff] }
  0xae   :  { %474 = vmatprep.mubr.f32.mxu0 %v9629_v1 }
  0xb1   :  { %475 = vmatmul.mubr.f32.gmra.mrb[28].mxu0 %v80_v37  ;;  %v806_v37 = vld [vmem:[#allocation4 + $0x478] sm:$0xff] }
  0xb2   :  { %480 = vmatprep.mubr.f32.mxu0 %v9629_v1 }
  0xb5   :  { %481 = vmatmul.mubr.f32.gmra.mrb[30].mxu0 %v81_v38  ;;  %v8251_v38 = vpack.c.bf16 %v806_v37, %v803_v36 }
  0xb6   :  { %486 = vmatprep.mubr.f32.mxu0 %v9629_v1 }
  0xb7   :  { %6753 = vmatpush3.bf16.msra.mxu0 %v8251_v38 }
  0xb8   :  { %6786 = vmatprep.subr.bf16.mxu0 %v9631_v0 }
  0xb9   :  { %487 = vmatmul.mubr.f32.gmra.mrb[32].mxu0 %v82_v39  ;;  %v796_v39 = vld [vmem:[#allocation4 + $0x428] sm:$0xff] }
  0xba   :  { %5770 = vmatprep.mubr.msk.f32.mxu0 %vm8077_vm0, %v9629_v1  ;;  %v8253_v41 = vpack.c.bf16 %v799_v40, %v796_v39 }
  0xbc   :  { %6723 = vmatprep.subr.bf16.mxu1 %v8253_v41 }
  0xbd   :  { %6725 = vmatpush1.bf16.msra.mxu1 %v8256_v45  ;;  %5771 = vmatmul.mubr.f32.vlgmr.msra.gmra.mrb[34].mxu0 %v8159_v24 }
  0xbe   :  { %5805 = vmatprep.mubr.msk.f32.mxu0 %vm8077_vm0, %v9629_v1  ;;  %6727 = vmatprep.subr.bf16.mxu1 %v8262_v49 }
  0xc1   :  { %6729 = vmatpush1.bf16.msra.mxu1 %v8264_v54 }
  0xc4   :  { %872 = vmatmul.mubr.f32.vlgmr.msra.gmra.mrb[18].mxu1 %v8159_v24 }
  0xc5   :  { %1060 = vmatprep.mubr.f32.mxu1 %v9629_v1 }
 0x12f   :  { %v316_v57 = vpop.f32.mrb[0].mxu1 }
 0x130   :  { %v245_v56 = vpop.f32.mrb[0].mxu0  ;;  %v5681_v59 = vpop.f32.mrb[1].mxu1  ;;  %v8273_v6 = vrot.slane %v316_v57, %v322_v2 }
 0x131   :  { %v247_v58 = vpop.f32.mrb[1].mxu0  ;;  %v8275_v7 = vrot.slane %v245_v56, %v322_v2 }
 0x132   :  { %v8279_v11 = vrot.slane %v247_v58, %v322_v2 }
 0x14f   :  { %v5716_v24 = vpop.f32.mrb[2].mxu1 }
 0x150   :  { %v398_v13 = vpop.f32.mrb[2].mxu0  ;;  %v565_v15 = vadd.f32 %v5716_v24, %v8273_v6  ;;  %v559_v19 = vpop.f32.mrb[3].mxu1 }
 0x151   :  { %v399_v16 = vadd.f32 %v398_v13, %v8275_v7  ;;  %v400_v20 = vpop.f32.mrb[3].mxu0  ;;  %v560_v22 = vadd.f32 %v559_v19, %v8273_v6 }
 0x152   :  { %v401_v23 = vadd.f32 %v400_v20, %v8279_v11  ;;  %v659_v27 = vadd.f32 %v8277_v10, %v565_v15 }
 0x153   :  { %v656_v30 = vadd.f32 %v8277_v10, %v560_v22  ;;  %v5719_v33 = vpop.f32.mrb[4].mxu1  ;;  %v654_v48 = vadd.f32 %v8286_v28, %v399_v16 }
 0x154   :  { %v404_v34 = vpop.f32.mrb[4].mxu0  ;;  %v575_v36 = vadd.f32 %v5719_v33, %v8273_v6  ;;  %v569_v39 = vpop.f32.mrb[5].mxu1  ;;  %v655_v56 = vadd.f32 %v8289_v31, %v401_v23 }
 0x155   :  { %v405_v37 = vadd.f32 %v404_v34, %v8275_v7  ;;  %v406_v40 = vpop.f32.mrb[5].mxu0  ;;  %v8293_v42 = vpack.c.bf16 %v659_v27, %v656_v30  ;;  %v570_v44 = vadd.f32 %v569_v39, %v8273_v6 }
 0x156   :  { %v407_v46 = vadd.f32 %v406_v40, %v8279_v11  ;;  %v665_v51 = vadd.f32 %v8277_v10, %v575_v36 }
 0x157   :  { %v657_v52 = vadd.f32 %v8286_v28, %v405_v37  ;;  %v662_v57 = vadd.f32 %v8277_v10, %v570_v44  ;;  %v5722_v59 = vpop.f32.mrb[6].mxu1  ;;  %6788 = vmatpush3.bf16.msra.mxu0 %v8293_v42 }
 0x158   :  { %v658_v58 = vadd.f32 %v8289_v31, %v407_v46  ;;  %v410_v63 = vpop.f32.mrb[6].mxu0  ;;  %v585_v4 = vadd.f32 %v5722_v59, %v8273_v6  ;;  %v579_v24 = vpop.f32.mrb[7].mxu1  ;;  %6789 = vmatprep.subr.bf16.mxu0 %v9631_v0 }
 0x159   :  { %v8304_v2 = vpack.c.bf16 %v657_v52, %v654_v48  ;;  %v411_v5 = vadd.f32 %v410_v63, %v8275_v7  ;;  %v412_v13 = vpop.f32.mrb[7].mxu0  ;;  %v8309_v14 = vpack.c.bf16 %v665_v51, %v662_v57  ;;  %v580_v16 = vadd.f32 %v579_v24, %v8273_v6 }
 0x15a   :  { %v8311_v15 = vpack.c.bf16 %v658_v58, %v655_v56  ;;  %v413_v19 = vadd.f32 %v412_v13, %v8279_v11  ;;  %v671_v20 = vadd.f32 %v8277_v10, %v585_v4 }
 0x15b   :  { %v668_v22 = vadd.f32 %v8277_v10, %v580_v16  ;;  %v5725_v23 = vpop.f32.mrb[8].mxu1  ;;  %6791 = vmatpush3.bf16.msra.mxu0 %v8309_v14  ;;  %v660_v44 = vadd.f32 %v8286_v28, %v411_v5 }
 0x15c   :  { %9687 = vst [vmem:[#allocation20_spill] sm:$0xff] %v8311_v15  ;;  %v416_v27 = vpop.f32.mrb[8].mxu0  ;;  %6755 = vmatprep.subr.bf16.mxu1 %v8311_v15  ;;  %v595_v30 = vadd.f32 %v5725_v23, %v8273_v6  ;;  %v589_v34 = vpop.f32.mrb[9].mxu1  ;;  %6792 = vmatprep.subr.bf16.mxu0 %v9631_v0  ;;  %v661_v51 = vadd.f32 %v8289_v31, %v413_v19 }
 0x15d   :  { %v417_v33 = vadd.f32 %v416_v27, %v8275_v7  ;;  %v418_v36 = vpop.f32.mrb[9].mxu0  ;;  %6757 = vmatpush1.bf16.msra.mxu1 %v8304_v2  ;;  %v8323_v37 = vpack.c.bf16 %v671_v20, %v668_v22  ;;  %v590_v39 = vadd.f32 %v589_v34, %v8273_v6 }
 0x15e   :  { %v419_v40 = vadd.f32 %v418_v36, %v8279_v11  ;;  %v677_v46 = vadd.f32 %v8277_v10, %v595_v30 }
 0x15f   :  { %v663_v48 = vadd.f32 %v8286_v28, %v417_v33  ;;  %v674_v52 = vadd.f32 %v8277_v10, %v590_v39  ;;  %v5728_v57 = vpop.f32.mrb[10].mxu1  ;;  %6794 = vmatpush3.bf16.msra.mxu0 %v8323_v37 }
 0x160   :  { %v664_v56 = vadd.f32 %v8289_v31, %v419_v40  ;;  %v422_v58 = vpop.f32.mrb[10].mxu0  ;;  %v605_v63 = vadd.f32 %v5728_v57, %v8273_v6  ;;  %v599_v5 = vpop.f32.mrb[11].mxu1  ;;  %6795 = vmatprep.subr.bf16.mxu0 %v9631_v0 }
 0x161   :  { %v8334_v59 = vpack.c.bf16 %v663_v48, %v660_v44  ;;  %v423_v4 = vadd.f32 %v422_v58, %v8275_v7  ;;  %v424_v24 = vpop.f32.mrb[11].mxu0  ;;  %v8339_v13 = vpack.c.bf16 %v677_v46, %v674_v52  ;;  %v600_v19 = vadd.f32 %v599_v5, %v8273_v6 }
 0x162   :  { %v8341_v16 = vpack.c.bf16 %v664_v56, %v661_v51  ;;  %v425_v20 = vadd.f32 %v424_v24, %v8279_v11  ;;  %v683_v22 = vadd.f32 %v8277_v10, %v605_v63 }
 0x163   :  { %v680_v23 = vadd.f32 %v8277_v10, %v600_v19  ;;  %v5731_v27 = vpop.f32.mrb[12].mxu1  ;;  %6797 = vmatpush3.bf16.msra.mxu0 %v8339_v13  ;;  %v666_v48 = vadd.f32 %v8286_v28, %v423_v4 }
 0x164   :  { %v428_v30 = vpop.f32.mrb[12].mxu0  ;;  %6759 = vmatprep.subr.bf16.mxu1 %v8341_v16  ;;  %v615_v33 = vadd.f32 %v5731_v27, %v8273_v6  ;;  %v609_v36 = vpop.f32.mrb[13].mxu1  ;;  %6798 = vmatprep.subr.bf16.mxu0 %v9631_v0  ;;  %v667_v56 = vadd.f32 %v8289_v31, %v425_v20 }
 0x165   :  { %v429_v34 = vadd.f32 %v428_v30, %v8275_v7  ;;  %v430_v39 = vpop.f32.mrb[13].mxu0  ;;  %6761 = vmatpush1.bf16.msra.mxu1 %v8334_v59  ;;  %v8353_v40 = vpack.c.bf16 %v683_v22, %v680_v23  ;;  %v610_v44 = vadd.f32 %v609_v36, %v8273_v6 }
 0x166   :  { %v431_v46 = vadd.f32 %v430_v39, %v8279_v11  ;;  %v689_v51 = vadd.f32 %v8277_v10, %v615_v33 }
 0x167   :  { %9688 = vst [vmem:[#allocation21_spill] sm:$0xff] %v8353_v40  ;;  %v669_v52 = vadd.f32 %v8286_v28, %v429_v34  ;;  %v686_v57 = vadd.f32 %v8277_v10, %v610_v44  ;;  %v5734_v63 = vpop.f32.mrb[14].mxu1  ;;  %6800 = vmatpush3.bf16.msra.mxu0 %v8353_v40 }
 0x168   :  { %v670_v58 = vadd.f32 %v8289_v31, %v431_v46  ;;  %v434_v5 = vpop.f32.mrb[14].mxu0  ;;  %v625_v19 = vadd.f32 %v5734_v63, %v8273_v6  ;;  %v619_v22 = vpop.f32.mrb[15].mxu1  ;;  %6801 = vmatprep.subr.bf16.mxu0 %v9631_v0 }
 0x169   :  { %v8364_v24 = vpack.c.bf16 %v669_v52, %v666_v48  ;;  %v435_v4 = vadd.f32 %v434_v5, %v8275_v7  ;;  %v436_v23 = vpop.f32.mrb[15].mxu0  ;;  %v8369_v27 = vpack.c.bf16 %v689_v51, %v686_v57  ;;  %v620_v30 = vadd.f32 %v619_v22, %v8273_v6 }
 0x16a   :  { %v8371_v20 = vpack.c.bf16 %v670_v58, %v667_v56  ;;  %v437_v33 = vadd.f32 %v436_v23, %v8279_v11  ;;  %v695_v34 = vadd.f32 %v8277_v10, %v625_v19 }
 0x16b   :  { %9689 = vst [vmem:[#allocation22_spill] sm:$0xff] %v8369_v27  ;;  %v692_v36 = vadd.f32 %v8277_v10, %v620_v30  ;;  %v5737_v39 = vpop.f32.mrb[16].mxu1  ;;  %6803 = vmatpush3.bf16.msra.mxu0 %v8369_v27  ;;  %v672_v63 = vadd.f32 %v8286_v28, %v435_v4 }
 0x16c   :  { %v440_v44 = vpop.f32.mrb[16].mxu0  ;;  %6763 = vmatprep.subr.bf16.mxu1 %v8371_v20  ;;  %v635_v46 = vadd.f32 %v5737_v39, %v8273_v6  ;;  %v629_v51 = vpop.f32.mrb[17].mxu1  ;;  %6804 = vmatprep.subr.bf16.mxu0 %v9631_v0  ;;  %v673_v22 = vadd.f32 %v8289_v31, %v437_v33 }
 0x16d   :  { %v441_v48 = vadd.f32 %v440_v44, %v8275_v7  ;;  %v442_v52 = vpop.f32.mrb[17].mxu0  ;;  %6765 = vmatpush1.bf16.msra.mxu1 %v8364_v24  ;;  %v8383_v56 = vpack.c.bf16 %v695_v34, %v692_v36  ;;  %v630_v57 = vadd.f32 %v629_v51, %v8273_v6  ;;  %v8395_v36 = vand.u32 127, %v61_v60 }
 0x16e   :  { %v443_v58 = vadd.f32 %v442_v52, %v8279_v11  ;;  %v701_v5 = vadd.f32 %v8277_v10, %v635_v46 }
 0x16f   :  { %9690 = vst [vmem:[#allocation23_spill] sm:$0xff] %v8383_v56  ;;  %v675_v19 = vadd.f32 %v8286_v28, %v441_v48  ;;  %v698_v23 = vadd.f32 %v8277_v10, %v630_v57  ;;  %6806 = vmatpush3.bf16.msra.mxu0 %v8383_v56  ;;  %vm756_vm1 = vcmp.eq.s32.totalorder %v8395_v36, 0 }
 0x170   :  { %v676_v30 = vadd.f32 %v8289_v31, %v443_v58  ;;  %v446_v34 = vpop.f32.mrb[18].mxu0  ;;  %6807 = vmatprep.subr.bf16.mxu0 %v9631_v0  ;;  %v9627_v58 = vmov 1.0  }
 0x171   :  { %v8397_v6 = vpack.c.bf16 %v675_v19, %v672_v63  ;;  %v447_v4 = vadd.f32 %v446_v34, %v8275_v7  ;;  %v448_v39 = vpop.f32.mrb[19].mxu0  ;;  %v8401_v44 = vpack.c.bf16 %v701_v5, %v698_v23 }
 0x172   :  { %v8403_v33 = vpack.c.bf16 %v676_v30, %v673_v22  ;;  %v449_v10 = vadd.f32 %v448_v39, %v8279_v11 }
 0x173   :  { %9691 = vst [vmem:[#allocation24_spill] sm:$0xff] %v8401_v44  ;;  %6809 = vmatpush3.bf16.msra.mxu0 %v8401_v44  ;;  %v678_v52 = vadd.f32 %v8286_v28, %v447_v4 }
 0x174   :  { %v452_v46 = vpop.f32.mrb[20].mxu0  ;;  %6767 = vmatprep.subr.bf16.mxu1 %v8403_v33  ;;  %6835 = vmatprep.subr.bf16.mxu0 %v8186_v47  ;;  %v679_v63 = vadd.f32 %v8289_v31, %v449_v10 }
 0x175   :  { %v453_v60 = vadd.f32 %v452_v46, %v8275_v7  ;;  %v454_v48 = vpop.f32.mrb[21].mxu0  ;;  %6769 = vmatpush1.bf16.msra.mxu1 %v8397_v6 }
 0x176   :  { %v455_v51 = vadd.f32 %v454_v48, %v8279_v11  ;;  %5806 = vmatmul.mubr.msk.f32.vlgmr.msra.gmra.mrb[36].mxu0 %vm756_vm1, %v9627_v58 }
 0x177   :  { %v681_v57 = vadd.f32 %v8286_v28, %v453_v60  ;;  %6837 = vmatpush1.bf16.msra.mxu0 %v8188_v50  ;;  %1414 = vmatprep.mubr.f32.mxu0 %v9629_v1 }
 0x178   :  { %v682_v5 = vadd.f32 %v8289_v31, %v455_v51  ;;  %v458_v19 = vpop.f32.mrb[22].mxu0  ;;  %6839 = vmatprep.subr.bf16.mxu0 %v8194_v55 }
 0x179   :  { %v8422_v47 = vpack.c.bf16 %v681_v57, %v678_v52  ;;  %v459_v22 = vadd.f32 %v458_v19, %v8275_v7  ;;  %v460_v23 = vpop.f32.mrb[23].mxu0 }
 0x17a   :  { %v8426_v30 = vpack.c.bf16 %v682_v5, %v679_v63  ;;  %v461_v34 = vadd.f32 %v460_v23, %v8279_v11 }
 0x17b   :  { %6841 = vmatpush1.bf16.msra.mxu0 %v8199_v61  ;;  %v684_v55 = vadd.f32 %v8286_v28, %v459_v22 }
 0x17c   :  { %v464_v4 = vpop.f32.mrb[24].mxu0  ;;  %6771 = vmatprep.subr.bf16.mxu1 %v8426_v30  ;;  %6843 = vmatprep.subr.bf16.mxu0 %v8202_v62  ;;  %v685_v60 = vadd.f32 %v8289_v31, %v461_v34 }
 0x17d   :  { %v465_v50 = vadd.f32 %v464_v4, %v8275_v7  ;;  %v466_v39 = vpop.f32.mrb[25].mxu0  ;;  %6773 = vmatpush1.bf16.msra.mxu1 %v8422_v47 }
 0x17e   :  { %v467_v10 = vadd.f32 %v466_v39, %v8279_v11 }
 0x17f   :  { %v687_v46 = vadd.f32 %v8286_v28, %v465_v50  ;;  %6845 = vmatpush1.bf16.msra.mxu0 %v8211_v8 }
 0x180   :  { %v688_v61 = vadd.f32 %v8289_v31, %v467_v10  ;;  %v470_v48 = vpop.f32.mrb[26].mxu0  ;;  %6847 = vmatprep.subr.bf16.mxu0 %v8214_v9 }
 0x181   :  { %v8440_v51 = vpack.c.bf16 %v687_v46, %v684_v55  ;;  %v471_v52 = vadd.f32 %v470_v48, %v8275_v7  ;;  %v472_v57 = vpop.f32.mrb[27].mxu0 }
 0x182   :  { %v8444_v62 = vpack.c.bf16 %v688_v61, %v685_v60  ;;  %v473_v63 = vadd.f32 %v472_v57, %v8279_v11 }
 0x183   :  { %6849 = vmatpush1.bf16.msra.mxu0 %v8221_v17  ;;  %v690_v9 = vadd.f32 %v8286_v28, %v471_v52 }
 0x184   :  { %v476_v5 = vpop.f32.mrb[28].mxu0  ;;  %6775 = vmatprep.subr.bf16.mxu1 %v8444_v62  ;;  %6851 = vmatprep.subr.bf16.mxu0 %v8224_v18  ;;  %v691_v34 = vadd.f32 %v8289_v31, %v473_v63 }
 0x185   :  { %v477_v19 = vadd.f32 %v476_v5, %v8275_v7  ;;  %v478_v8 = vpop.f32.mrb[29].mxu0  ;;  %6777 = vmatpush1.bf16.msra.mxu1 %v8440_v51  ;;  %v1160_v5 = vld [vmem:[#allocation4 + $0x498] sm:$0xff] }
 0x186   :  { %v479_v22 = vadd.f32 %v478_v8, %v8279_v11  ;;  %v1161_v8 = vld [vmem:[#allocation4 + $0x4b0] sm:$0xff] }
 0x187   :  { %v693_v23 = vadd.f32 %v8286_v28, %v477_v19  ;;  %6853 = vmatpush1.bf16.msra.mxu0 %v8231_v25 }
 0x188   :  { %v694_v17 = vadd.f32 %v8289_v31, %v479_v22  ;;  %v482_v4 = vpop.f32.mrb[30].mxu0  ;;  %6855 = vmatprep.subr.bf16.mxu0 %v8243_v32  ;;  %v1162_v22 = vld [vmem:[#allocation4 + $0x4c8] sm:$0xff] }
 0x189   :  { %v8458_v50 = vpack.c.bf16 %v693_v23, %v690_v9  ;;  %v483_v39 = vadd.f32 %v482_v4, %v8275_v7  ;;  %v484_v10 = vpop.f32.mrb[31].mxu0  ;;  %v8495_v9 = vpack.c.bf16 %v1162_v22, %v1161_v8  ;;  %v1163_v23 = vld [vmem:[#allocation4 + $0x4e0] sm:$0xff]  ;;  %v1165_v4 = vld [vmem:[#allocation4 + $0x510] sm:$0xff] }
 0x18a   :  { %v8462_v18 = vpack.c.bf16 %v694_v17, %v691_v34  ;;  %v485_v55 = vadd.f32 %v484_v10, %v8279_v11  ;;  %v1164_v34 = vld [vmem:[#allocation4 + $0x4f8] sm:$0xff] }
 0x18b   :  { %6857 = vmatpush1.bf16.msra.mxu0 %v8246_v35  ;;  %v696_v32 = vadd.f32 %v8286_v28, %v483_v39  ;;  %v8498_v17 = vpack.c.bf16 %v1164_v34, %v1163_v23  ;;  %v1166_v39 = vld [vmem:[#allocation4 + $0x528] sm:$0xff] }
 0x18c   :  { %v488_v46 = vpop.f32.mrb[32].mxu0  ;;  %6779 = vmatprep.subr.bf16.mxu1 %v8462_v18  ;;  %6859 = vmatprep.subr.bf16.mxu0 %v8253_v41  ;;  %v697_v52 = vadd.f32 %v8289_v31, %v485_v55  ;;  %v8502_v10 = vpack.c.bf16 %v1166_v39, %v1165_v4  ;;  %v1167_v55 = vld [vmem:[#allocation4 + $0x540] sm:$0xff] }
 0x18d   :  { %v489_v60 = vadd.f32 %v488_v46, %v8275_v7  ;;  %v490_v25 = vpop.f32.mrb[33].mxu0  ;;  %6781 = vmatpush1.bf16.msra.mxu1 %v8458_v50  ;;  %v1168_v46 = vld [vmem:[#allocation4 + $0x558] sm:$0xff] }
 0x18e   :  { %v491_v61 = vadd.f32 %v490_v25, %v8279_v11  ;;  %v1169_v25 = vld [vmem:[#allocation4 + $0x570] sm:$0xff] }
 0x18f   :  { %v699_v48 = vadd.f32 %v8286_v28, %v489_v60  ;;  %6861 = vmatpush1.bf16.msra.mxu0 %v8256_v45  ;;  %v8507_v60 = vpack.c.bf16 %v1168_v46, %v1167_v55 }
 0x190   :  { %v700_v57 = vadd.f32 %v8289_v31, %v491_v61  ;;  %6863 = vmatprep.subr.bf16.mxu0 %v8262_v49  ;;  %v944_v11 = vpop.f32.mrb[34].mxu0  ;;  %v1159_v31 = vld [vmem:[#allocation4 + $0x480] sm:$0xff]  ;;  %v1170_v61 = vld [vmem:[#allocation4 + $0x588] sm:$0xff] }
 0x191   :  { %v8476_v63 = vpack.c.bf16 %v699_v48, %v696_v32  ;;  %v5772_v28 = vpop.f32.mrb[35].mxu0  ;;  %v8491_v19 = vpack.c.bf16 %v1160_v5, %v1159_v31  ;;  %v8511_v32 = vpack.c.bf16 %v1170_v61, %v1169_v25  ;;  %v1171_v48 = vld [vmem:[#allocation4 + $0x5a0] sm:$0xff]  ;;  %v1174_v31 = vld [vmem:[#allocation4 + $0x5e8] sm:$0xff]  ;;  %v8523_v61 = vld [vmem:[#allocation10 + $0x18] ss:$0 sm:$0xff] }
 0x192   :  { %v8479_v7 = vpack.c.bf16 %v700_v57, %v697_v52  ;;  %v1172_v52 = vld [vmem:[#allocation4 + $0x5b8] sm:$0xff]  ;;  %v1173_v28 = vld [vmem:[#allocation4 + $0x5d0] sm:$0xff] }
 0x193   :  { %6865 = vmatpush1.bf16.msra.mxu0 %v8264_v54  ;;  %v8514_v57 = vpack.c.bf16 %v1172_v52, %v1171_v48  ;;  %v8518_v5 = vpack.c.bf16 %v1174_v31, %v1173_v28  ;;  %v1151_v52 = vadd.f32 %v944_v11, %v8523_v61  ;;  %v9692_v11 = vmov 0.0|0.0  }
 0x194   :  { %6783 = vmatprep.subr.bf16.mxu1 %v8479_v7  ;;  %6891 = vmatprep.subr.bf16.mxu0 %v8311_v15 }
 0x195   :  { %6785 = vmatpush1.bf16.msra.mxu1 %v8476_v63 }
 0x196   :  { %6810 = vmatprep.subr.bf16.mxu1 %v9631_v0 }
 0x198   :  { %5135 = vmatmul.mubr.msk.f32.vlgmr.msra.gmra.mrb[18].mxu1 %vm756_vm1, %v9627_v58 }
 0x199   :  { %5840 = vmatprep.mubr.msk.f32.mxu1 %vm8077_vm0, %v9629_v1  ;;  %6812 = vmatpush3.bf16.msra.mxu1 %v8491_v19 }
 0x19a   :  { %6813 = vmatprep.subr.bf16.mxu1 %v9631_v0 }
 0x19d   :  { %6815 = vmatpush3.bf16.msra.mxu1 %v8495_v9 }
 0x19e   :  { %6816 = vmatprep.subr.bf16.mxu1 %v9631_v0 }
 0x1a1   :  { %6818 = vmatpush3.bf16.msra.mxu1 %v8498_v17 }
 0x1a2   :  { %6819 = vmatprep.subr.bf16.mxu1 %v9631_v0 }
 0x1a5   :  { %6821 = vmatpush3.bf16.msra.mxu1 %v8502_v10 }
 0x1a6   :  { %6822 = vmatprep.subr.bf16.mxu1 %v9631_v0 }
 0x1a9   :  { %6824 = vmatpush3.bf16.msra.mxu1 %v8507_v60 }
 0x1aa   :  { %6825 = vmatprep.subr.bf16.mxu1 %v9631_v0 }
 0x1ad   :  { %6827 = vmatpush3.bf16.msra.mxu1 %v8511_v32 }
 0x1ae   :  { %6828 = vmatprep.subr.bf16.mxu1 %v9631_v0 }
 0x1b1   :  { %6830 = vmatpush3.bf16.msra.mxu1 %v8514_v57 }
 0x1b2   :  { %6831 = vmatprep.subr.bf16.mxu1 %v9631_v0 }
 0x1b5   :  { %6833 = vmatpush3.bf16.msra.mxu1 %v8518_v5 }
 0x1b6   :  { %6866 = vmatprep.subr.bf16.mxu1 %v9631_v0 }
 0x249   :  { %v1133_v8 = vpop.f32.mrb[36].mxu0 }
 0x24a   :  { %v5807_v22 = vpop.f32.mrb[37].mxu0 }
 0x26b   :  { %v1062_v23 = vpop.f32.mrb[18].mxu1 }
 0x26c   :  { %v5137_v34 = vmul.f32 -1.442695, %v1062_v23  ;;  %v1064_v4 = vpop.f32.mrb[19].mxu1 }
 0x26d   :  { %v5138_v39 = vmul.f32 -1.442695, %v1064_v4  ;;  %v7945_v4 = vld [vmem:[#allocation10 + $0x48] ss:$0 sm:$0xff] }
 0x26e   :  { %7833 = vpow2.f32 %v5137_v34 }
 0x26f   :  { %7835 = vpow2.f32 %v5138_v39 }
 0x278   :  { %v7834_v55 = vpop.eup %7833 }
 0x279   :  { %v1141_v46 = vadd.f32 1.0, %v7834_v55  ;;  %v7836_v25 = vpop.eup %7835 }
 0x27a   :  { %v1148_v48 = vadd.f32 1.0, %v7836_v25 }
 0x27b   :  { %7837 = vrcp.f32 %v1141_v46 }
 0x27c   :  { %7839 = vrcp.f32 %v1148_v48 }
 0x285   :  { %v7838_v28 = vpop.eup %7837 }
 0x286   :  { %v1152_v31 = vmul.f32 %v7838_v28, %v1151_v52  ;;  %v7840_v22 = vpop.eup %7839 }
 0x287   :  { %v1155_v23 = vsub.f32 1.0, %v7840_v22  ;;  %v1157_v39 = vmul.f32 %v7945_v4, %v7840_v22  ;;  %v1848_v22 = vld [vmem:[#allocation4 + $0x320] sm:$0xff] }
 0x288   :  { %v1153_v58 = vadd.f32 %v1152_v31, %v1133_v8  ;;  %v1845_v31 = vld [vmem:[#allocation4 + $0x308] sm:$0xff] }
 0x28a   :  { %7841 = vtanh.f32 %v1153_v58  ;;  %v9693_v58 = vmov 0.0  }
 0x294   :  { %v7842_v1 = vpop.eup %7841 }
 0x295   :  { %v1156_v34 = vmul.f32 %v7842_v1, %v1155_v23  ;;  %v8583_v1 = vld [vmem:[#allocation10 + $0x30] ss:$0 sm:$0xff]  ;;  %v8598_v23 = vpack.c.bf16 %v1848_v22, %v1845_v31  ;;  %v1860_v31 = vld [vmem:[#allocation4 + $0x380] sm:$0xff] }
 0x296   :  { %9694 = vst [vmem:[#allocation25_spill] sm:$0xff] %v8583_v1 }
 0x297   :  { %v8526_v0 = vadd.f32 %v1157_v39, %v1156_v34  ;;  %9697 = vst [vmem:[#allocation28_spill] sm:$0xff] %v8598_v23  ;;  %v1844_v39 = vld [vmem:[#allocation4 + $0x300] sm:$0xff] }
 0x299   :  { %5841 = vmatmul.mubr.f32.vlgmr.msra.gmra.mrb[20].mxu1 %v8526_v0  ;;  %1415 = vmatmul.mubr.f32.vlgmr.msra.gmra.mrb[38].mxu0 %v8526_v0 }
 0x29a   :  { %6868 = vmatpush3.bf16.msra.mxu1 %v8184_v43  ;;  %6893 = vmatpush1.bf16.msra.mxu0 %v8304_v2 }
 0x29b   :  { %6895 = vmatprep.subr.bf16.mxu0 %v8341_v16  ;;  %6869 = vmatprep.subr.bf16.mxu1 %v9692_v11 }
 0x29c   :  { %5875 = vmatprep.mubr.msk.f32.mxu1 %vm8077_vm0, %v9693_v58  ;;  %1603 = vmatprep.mubr.f32.mxu0 %v9693_v58 }
 0x29e   :  { %6871 = vmatpush3.bf16.msra.mxu1 %v8192_v53  ;;  %6897 = vmatpush1.bf16.msra.mxu0 %v8334_v59 }
 0x29f   :  { %6899 = vmatprep.subr.bf16.mxu0 %v8371_v20  ;;  %6872 = vmatprep.subr.bf16.mxu1 %v9692_v11 }
 0x2a2   :  { %6874 = vmatpush3.bf16.msra.mxu1 %v8205_v3  ;;  %6901 = vmatpush1.bf16.msra.mxu0 %v8364_v24 }
 0x2a3   :  { %6903 = vmatprep.subr.bf16.mxu0 %v8403_v33  ;;  %6875 = vmatprep.subr.bf16.mxu1 %v9692_v11 }
 0x2a6   :  { %6877 = vmatpush3.bf16.msra.mxu1 %v8217_v12  ;;  %6905 = vmatpush1.bf16.msra.mxu0 %v8397_v6 }
 0x2a7   :  { %6907 = vmatprep.subr.bf16.mxu0 %v8426_v30  ;;  %6878 = vmatprep.subr.bf16.mxu1 %v9692_v11 }
 0x2aa   :  { %6880 = vmatpush3.bf16.msra.mxu1 %v8227_v21  ;;  %6909 = vmatpush1.bf16.msra.mxu0 %v8422_v47 }
 0x2ab   :  { %6911 = vmatprep.subr.bf16.mxu0 %v8444_v62  ;;  %6881 = vmatprep.subr.bf16.mxu1 %v9692_v11 }
 0x2ae   :  { %6883 = vmatpush3.bf16.msra.mxu1 %v8235_v26  ;;  %6913 = vmatpush1.bf16.msra.mxu0 %v8440_v51 }
 0x2af   :  { %6915 = vmatprep.subr.bf16.mxu0 %v8462_v18  ;;  %6884 = vmatprep.subr.bf16.mxu1 %v9692_v11 }
 0x2b2   :  { %6886 = vmatpush3.bf16.msra.mxu1 %v8241_v29  ;;  %6917 = vmatpush1.bf16.msra.mxu0 %v8458_v50 }
 0x2b3   :  { %6919 = vmatprep.subr.bf16.mxu0 %v8479_v7  ;;  %6887 = vmatprep.subr.bf16.mxu1 %v9692_v11 }
 0x2b6   :  { %6889 = vmatpush3.bf16.msra.mxu1 %v8251_v38  ;;  %6921 = vmatpush1.bf16.msra.mxu0 %v8476_v63 }
 0x2b7   :  { %6922 = vmatprep.subr.bf16.mxu1 %v9692_v11  ;;  %6946 = vmatprep.subr.bf16.mxu0 %v9692_v11 }
 0x2b9   :  { %5876 = vmatmul.mubr.f32.vlgmr.msra.gmra.mrb[22].mxu1 %v8526_v0 }
 0x2ba   :  { %6924 = vmatpush3.bf16.msra.mxu1 %v8293_v42  ;;  %5910 = vmatprep.mubr.msk.f32.mxu1 %vm8077_vm0, %v9693_v58 }
 0x2bb   :  { %6925 = vmatprep.subr.bf16.mxu1 %v9692_v11 }
 0x2be   :  { %6927 = vmatpush3.bf16.msra.mxu1 %v8309_v14 }
 0x2bf   :  { %6928 = vmatprep.subr.bf16.mxu1 %v9692_v11 }
 0x2c2   :  { %6930 = vmatpush3.bf16.msra.mxu1 %v8323_v37 }
 0x2c3   :  { %6931 = vmatprep.subr.bf16.mxu1 %v9692_v11 }
 0x2c6   :  { %6933 = vmatpush3.bf16.msra.mxu1 %v8339_v13 }
 0x2c7   :  { %6934 = vmatprep.subr.bf16.mxu1 %v9692_v11 }
 0x2ca   :  { %6936 = vmatpush3.bf16.msra.mxu1 %v8353_v40 }
 0x2cb   :  { %6937 = vmatprep.subr.bf16.mxu1 %v9692_v11 }
 0x2ce   :  { %6939 = vmatpush3.bf16.msra.mxu1 %v8369_v27 }
 0x2cf   :  { %6940 = vmatprep.subr.bf16.mxu1 %v9692_v11 }
 0x2d2   :  { %6942 = vmatpush3.bf16.msra.mxu1 %v8383_v56 }
 0x2d3   :  { %6943 = vmatprep.subr.bf16.mxu1 %v9692_v11 }
 0x2d6   :  { %6945 = vmatpush3.bf16.msra.mxu1 %v8401_v44 }
 0x2d7   :  { %6971 = vmatprep.subr.bf16.mxu1 %v8598_v23 }
 0x36c   :  { %v1241_v43 = vpop.f32.mrb[20].mxu1 }
 0x36d   :  { %v8586_v53 = vadd.f32 %v1241_v43, %v8583_v1  ;;  %v5842_v3 = vpop.f32.mrb[21].mxu1  ;;  %v1847_v43 = vld [vmem:[#allocation4 + $0x318] sm:$0xff] }
 0x36f   :  { %9695 = vst [vmem:[#allocation26_spill] sm:$0xff] %v8586_v53  ;;  %v1246_v12 = vsel %vm1245_vm2, %v8586_v53, -inf }
 0x370   :  { %1247 = vmax.xlane.f32.xlu0 %v1246_v12 }
 0x38c   :  { %v8590_v21 = vpop.f32.mrb[22].mxu1 }
 0x38d   :  { %v5877_v26 = vpop.f32.mrb[23].mxu1 }
 0x38e   :  { %v1851_v26 = vld [vmem:[#allocation4 + $0x338] sm:$0xff] }
 0x3fd   :  { %v8592_v29 = vpop.xlane.xlu0 %1247 }
 0x3fe   :  { %9696 = vst [vmem:[#allocation27_spill] sm:$0xff] %v8592_v29  ;;  %vm1249_vm3 = vcmp.eq.f32.partialorder %v8586_v53, %v8592_v29  ;;  %v1846_v53 = vld [vmem:[#allocation4 + $0x310] sm:$0xff]  ;;  %v1855_v29 = vld [vmem:[#allocation4 + $0x358] sm:$0xff] }
 0x3ff   :  { %v1250_v38 = vsel %vm1249_vm3, %v8395_v36, 128 }
 0x400   :  { %v1251_v8 = vsel %vm1245_vm2, %v1250_v38, 2147483647  ;;  %v1854_v38 = vld [vmem:[#allocation4 + $0x350] sm:$0xff] }
 0x401   :  { %v1253_v55 = vshra.s32 %v1251_v8, 16  ;;  %v1252_v25 = vand.u32 65535, %v1251_v8 }
 0x403   :  { %v1255_v46 = vcvt.s32.f32 %v1253_v55  ;;  %v1254_v52 = vcvt.s32.f32 %v1252_v25  ;;  %v8601_v55 = vpack.c.bf16 %v1847_v43, %v1844_v39  ;;  %v1850_v25 = vld [vmem:[#allocation4 + $0x330] sm:$0xff]  ;;  %v1859_v39 = vld [vmem:[#allocation4 + $0x378] sm:$0xff] }
 0x404   :  { %v1863_v43 = vld [vmem:[#allocation4 + $0x398] sm:$0xff] }
 0x405   :  { %1256 = vmin.xlane.f32.xlu0 %v1255_v46 }
 0x492   :  { %v1257_v48 = vpop.xlane.xlu0 %1256 }
 0x493   :  { %vm1258_vm4 = vcmp.eq.f32.partialorder %v1255_v46, %v1257_v48  ;;  %v1263_v34 = vcvt.f32.s32 %v1257_v48  ;;  %v8603_v46 = vpack.c.bf16 %v1854_v38, %v1851_v26  ;;  %v9698_v48 = vmov 1.0   ;;  %v1862_v26 = vld [vmem:[#allocation4 + $0x390] sm:$0xff]  ;;  %v1865_v38 = vld [vmem:[#allocation4 + $0x3a8] sm:$0xff] }
 0x494   :  { %v1259_v28 = vsel %vm1258_vm4, %v1254_v52, inf  ;;  %v1853_v52 = vld [vmem:[#allocation4 + $0x348] sm:$0xff] }
 0x495   :  { %1260 = vmin.xlane.f32.xlu1 %v1259_v28  ;;  %v1264_v3 = vshll.u32 %v1263_v34, 16  ;;  %v1857_v28 = vld [vmem:[#allocation4 + $0x368] sm:$0xff]  ;;  %v8609_v22 = vpack.c.bf16 %v1853_v52, %v1850_v25  ;;  %v1872_v25 = vld [vmem:[#allocation4 + $0x3e0] sm:$0xff]  ;;  %v8628_v52 = vpack.c.bf16 %v1865_v38, %v1862_v26 }
 0x496   :  { %v8613_v34 = vpack.c.bf16 %v1860_v31, %v1857_v28  ;;  %v1871_v31 = vld [vmem:[#allocation4 + $0x3d8] sm:$0xff] }
 0x522   :  { %v1261_v4 = vpop.xlane.xlu1 %1260 }
 0x523   :  { %v1262_v12 = vcvt.f32.s32 %v1261_v4  ;;  %v1856_v4 = vld [vmem:[#allocation4 + $0x360] sm:$0xff] }
 0x525   :  { %v1265_v8 = vadd.s32 %v1264_v3, %v1262_v12  ;;  %v1866_v3 = vld [vmem:[#allocation4 + $0x3b0] sm:$0xff]  ;;  %v8620_v12 = vpack.c.bf16 %v1859_v39, %v1856_v4  ;;  %v1875_v4 = vld [vmem:[#allocation4 + $0x3f8] sm:$0xff] }
 0x526   :  { %v1878_v39 = vld [vmem:[#allocation4 + $0x410] sm:$0xff] }
 0x527   :  { %vm1266_vm5 = vcmp.eq.s32.totalorder %v8395_v36, %v1265_v8  ;;  %7802 = vpush %v1265_v8  ;;  %v1869_v8 = vld [vmem:[#allocation4 + $0x3c8] sm:$0xff] }
 0x528   :  { %5142 = vmatmul.mubr.msk.f32.vlgmr.msra.gmra.mrb[38].mxu0 %vm1266_vm5, %v9698_v48  ;;  %5911 = vmatmul.mubr.msk.f32.vlgmr.msra.gmra.mrb[24].mxu1 %vm1266_vm5, %v9698_v48  ;;  %v8632_v28 = vpack.c.bf16 %v1872_v25, %v1869_v8  ;;  %v1694_v25 = vadd.f32 %v8590_v21, %v8523_v61 }
 0x529   :  { %6973 = vmatpush1.bf16.msra.mxu1 %v8601_v55  ;;  %6948 = vmatpush3.bf16.msra.mxu0 %v8491_v19  ;;  %v8624_v19 = vpack.c.bf16 %v1866_v3, %v1863_v43  ;;  %v8640_v3 = vpack.c.bf16 %v1878_v39, %v1875_v4 }
 0x52a   :  { %6975 = vmatprep.subr.bf16.mxu1 %v8603_v46  ;;  %6949 = vmatprep.subr.bf16.mxu0 %v9692_v11 }
 0x52b   :  { %5945 = vmatprep.mubr.msk.f32.mxu0 %vm8077_vm0, %v9693_v58  ;;  %1956 = vmatprep.mubr.f32.mxu1 %v9693_v58 }
 0x52d   :  { %6977 = vmatpush1.bf16.msra.mxu1 %v8609_v22  ;;  %6951 = vmatpush3.bf16.msra.mxu0 %v8495_v9  ;;  %v1868_v9 = vld [vmem:[#allocation4 + $0x3c0] sm:$0xff] }
 0x52e   :  { %6979 = vmatprep.subr.bf16.mxu1 %v8613_v34  ;;  %6952 = vmatprep.subr.bf16.mxu0 %v9692_v11  ;;  %v8636_v43 = vpack.c.bf16 %v1871_v31, %v1868_v9 }
 0x531   :  { %6981 = vmatpush1.bf16.msra.mxu1 %v8620_v12  ;;  %6954 = vmatpush3.bf16.msra.mxu0 %v8498_v17 }
 0x532   :  { %6983 = vmatprep.subr.bf16.mxu1 %v8624_v19  ;;  %6955 = vmatprep.subr.bf16.mxu0 %v9692_v11 }
 0x535   :  { %6985 = vmatpush1.bf16.msra.mxu1 %v8628_v52  ;;  %6957 = vmatpush3.bf16.msra.mxu0 %v8502_v10 }
 0x536   :  { %6987 = vmatprep.subr.bf16.mxu1 %v8632_v28  ;;  %6958 = vmatprep.subr.bf16.mxu0 %v9692_v11 }
 0x539   :  { %6989 = vmatpush1.bf16.msra.mxu1 %v8636_v43  ;;  %6960 = vmatpush3.bf16.msra.mxu0 %v8507_v60 }
 0x53a   :  { %6991 = vmatprep.subr.bf16.mxu1 %v8640_v3  ;;  %6961 = vmatprep.subr.bf16.mxu0 %v9692_v11 }
 0x53d   :  { %6993 = vmatpush1.bf16.msra.mxu1 %v8246_v35  ;;  %6963 = vmatpush3.bf16.msra.mxu0 %v8511_v32 }
 0x53e   :  { %6995 = vmatprep.subr.bf16.mxu1 %v8253_v41  ;;  %6964 = vmatprep.subr.bf16.mxu0 %v9692_v11 }
 0x541   :  { %6997 = vmatpush1.bf16.msra.mxu1 %v8256_v45  ;;  %6966 = vmatpush3.bf16.msra.mxu0 %v8514_v57 }
 0x542   :  { %6999 = vmatprep.subr.bf16.mxu1 %v8262_v49  ;;  %6967 = vmatprep.subr.bf16.mxu0 %v9692_v11 }
 0x545   :  { %7001 = vmatpush1.bf16.msra.mxu1 %v8264_v54  ;;  %6969 = vmatpush3.bf16.msra.mxu0 %v8518_v5 }
 0x546   :  { %7027 = vmatprep.subr.bf16.mxu1 %v8311_v15  ;;  %7002 = vmatprep.subr.bf16.mxu0 %v9692_v11 }
 0x558   :  { %s7803_s2 = spop %7802 }
 0x559   :  { %p1281_p10 = scmp.eq.s32.totalorder %s7803_s2, 1 }
 0x55b   :  { %s8659_s6 = scalar_select %p1281_p10, 1, 0 }
 0x55d   :  { %s8662_s7 = ssub.s32 1, %s8659_s6 }
 0x55e   :  { %s1287_s8 = smul.u32 %s7803_s2, %s8662_s7  ;;  %s5140_s9 = sadd.s32 4294967295, %s8662_s7 }
 0x560   :  { %s1289_s10 = sadd.s32 %s5140_s9, %s1287_s8 }
 0x561   :  { %1291 = sst [smem:[#allocation12]] %s1289_s10 }
 0x5fb   :  { %v1605_v35 = vpop.f32.mrb[38].mxu0  ;;  %v1676_v41 = vpop.f32.mrb[24].mxu1 }
 0x5fc   :  { %v5144_v45 = vmul.f32 -1.442695, %v1605_v35  ;;  %v1607_v49 = vpop.f32.mrb[39].mxu0  ;;  %v5912_v54 = vpop.f32.mrb[25].mxu1 }
 0x5fd   :  { %v5145_v17 = vmul.f32 -1.442695, %v1607_v49  ;;  %v1849_v54 = vld [vmem:[#allocation4 + $0x328] sm:$0xff] }
 0x5fe   :  { %7843 = vpow2.f32 %v5144_v45 }
 0x5ff   :  { %7845 = vpow2.f32 %v5145_v17 }
 0x608   :  { %v7844_v10 = vpop.eup %7843 }
 0x609   :  { %v1684_v26 = vadd.f32 1.0, %v7844_v10  ;;  %v7846_v38 = vpop.eup %7845  ;;  %v8669_v10 = vpack.c.bf16 %v1849_v54, %v1846_v53  ;;  %v1861_v53 = vld [vmem:[#allocation4 + $0x388] sm:$0xff] }
 0x60a   :  { %v1691_v8 = vadd.f32 1.0, %v7846_v38  ;;  %v1852_v38 = vld [vmem:[#allocation4 + $0x340] sm:$0xff] }
 0x60b   :  { %7847 = vrcp.f32 %v1684_v26  ;;  %v8677_v21 = vpack.c.bf16 %v1855_v29, %v1852_v38  ;;  %v1864_v29 = vld [vmem:[#allocation4 + $0x3a0] sm:$0xff] }
 0x60c   :  { %7849 = vrcp.f32 %v1691_v8  ;;  %v1867_v8 = vld [vmem:[#allocation4 + $0x3b8] sm:$0xff]  ;;  %v1888_v38 = vld [vmem:[#allocation4 + $0x460] sm:$0xff] }
 0x615   :  { %v7848_v9 = vpop.eup %7847 }
 0x616   :  { %v1695_v31 = vmul.f32 %v7848_v9, %v1694_v25  ;;  %v7850_v39 = vpop.eup %7849  ;;  %v8692_v25 = vpack.c.bf16 %v1867_v8, %v1864_v29  ;;  %v1870_v9 = vld [vmem:[#allocation4 + $0x3d0] sm:$0xff] }
 0x617   :  { %v1698_v35 = vsub.f32 1.0, %v7850_v39  ;;  %v1700_v17 = vmul.f32 %v7850_v39, %v8526_v0  ;;  %v1858_v0 = vld [vmem:[#allocation4 + $0x370] sm:$0xff]  ;;  %v1876_v39 = vld [vmem:[#allocation4 + $0x400] sm:$0xff] }
 0x618   :  { %v1696_v4 = vadd.f32 %v1695_v31, %v1676_v41  ;;  %v8686_v41 = vpack.c.bf16 %v1861_v53, %v1858_v0  ;;  %v1873_v31 = vld [vmem:[#allocation4 + $0x3e8] sm:$0xff]  ;;  %v1891_v0 = vld [vmem:[#allocation4 + $0x478] sm:$0xff] }
 0x619   :  { %v8716_v53 = vpack.c.bf16 %v1891_v0, %v1888_v38 }
 0x61a   :  { %7851 = vtanh.f32 %v1696_v4  ;;  %v8698_v4 = vpack.c.bf16 %v1873_v31, %v1870_v9 }
 0x624   :  { %v7852_v45 = vpop.eup %7851 }
 0x625   :  { %v1699_v49 = vmul.f32 %v7852_v45, %v1698_v35  ;;  %v1879_v35 = vld [vmem:[#allocation4 + $0x418] sm:$0xff]  ;;  %v1882_v45 = vld [vmem:[#allocation4 + $0x430] sm:$0xff] }
 0x626   :  { %v8704_v54 = vpack.c.bf16 %v1879_v35, %v1876_v39 }
 0x627   :  { %v8671_v26 = vadd.f32 %v1700_v17, %v1699_v49  ;;  %v1885_v49 = vld [vmem:[#allocation4 + $0x448] sm:$0xff] }
 0x628   :  { %v8710_v17 = vpack.c.bf16 %v1885_v49, %v1882_v45 }
 0x629   :  { %5946 = vmatmul.mubr.f32.vlgmr.msra.gmra.mrb[40].mxu0 %v8671_v26  ;;  %1957 = vmatmul.mubr.f32.vlgmr.msra.gmra.mrb[26].mxu1 %v8671_v26 }
 0x62a   :  { %7004 = vmatpush3.bf16.msra.mxu0 %v8669_v10  ;;  %7029 = vmatpush1.bf16.msra.mxu1 %v8304_v2 }
 0x62b   :  { %7031 = vmatprep.subr.bf16.mxu1 %v8341_v16  ;;  %7005 = vmatprep.subr.bf16.mxu0 %v9692_v11 }
 0x62c   :  { %5980 = vmatprep.mubr.msk.f32.mxu0 %vm8077_vm0, %v9693_v58  ;;  %2145 = vmatprep.mubr.f32.mxu1 %v9693_v58 }
 0x62e   :  { %7007 = vmatpush3.bf16.msra.mxu0 %v8677_v21  ;;  %7033 = vmatpush1.bf16.msra.mxu1 %v8334_v59 }
 0x62f   :  { %7035 = vmatprep.subr.bf16.mxu1 %v8371_v20  ;;  %7008 = vmatprep.subr.bf16.mxu0 %v9692_v11 }
 0x632   :  { %7010 = vmatpush3.bf16.msra.mxu0 %v8686_v41  ;;  %7037 = vmatpush1.bf16.msra.mxu1 %v8364_v24 }
 0x633   :  { %7039 = vmatprep.subr.bf16.mxu1 %v8403_v33  ;;  %7011 = vmatprep.subr.bf16.mxu0 %v9692_v11 }
 0x636   :  { %7013 = vmatpush3.bf16.msra.mxu0 %v8692_v25  ;;  %7041 = vmatpush1.bf16.msra.mxu1 %v8397_v6 }
 0x637   :  { %7043 = vmatprep.subr.bf16.mxu1 %v8426_v30  ;;  %7014 = vmatprep.subr.bf16.mxu0 %v9692_v11 }
 0x63a   :  { %7016 = vmatpush3.bf16.msra.mxu0 %v8698_v4  ;;  %7045 = vmatpush1.bf16.msra.mxu1 %v8422_v47 }
 0x63b   :  { %7047 = vmatprep.subr.bf16.mxu1 %v8444_v62  ;;  %7017 = vmatprep.subr.bf16.mxu0 %v9692_v11 }
 0x63e   :  { %7019 = vmatpush3.bf16.msra.mxu0 %v8704_v54  ;;  %7049 = vmatpush1.bf16.msra.mxu1 %v8440_v51 }
 0x63f   :  { %7051 = vmatprep.subr.bf16.mxu1 %v8462_v18  ;;  %7020 = vmatprep.subr.bf16.mxu0 %v9692_v11 }
 0x642   :  { %7022 = vmatpush3.bf16.msra.mxu0 %v8710_v17  ;;  %7053 = vmatpush1.bf16.msra.mxu1 %v8458_v50 }
 0x643   :  { %7055 = vmatprep.subr.bf16.mxu1 %v8479_v7  ;;  %7023 = vmatprep.subr.bf16.mxu0 %v9692_v11 }
 0x646   :  { %7025 = vmatpush3.bf16.msra.mxu0 %v8716_v53  ;;  %7057 = vmatpush1.bf16.msra.mxu1 %v8476_v63 }
 0x647   :  { %7058 = vmatprep.subr.bf16.mxu0 %v9692_v11  ;;  %7082 = vmatprep.subr.bf16.mxu1 %v9692_v11 }
 0x649   :  { %5981 = vmatmul.mubr.f32.vlgmr.msra.gmra.mrb[42].mxu0 %v8671_v26 }
 0x64a   :  { %7060 = vmatpush3.bf16.msra.mxu0 %v8293_v42  ;;  %6015 = vmatprep.mubr.msk.f32.mxu0 %vm8077_vm0, %v9693_v58 }
 0x64b   :  { %7061 = vmatprep.subr.bf16.mxu0 %v9692_v11 }
 0x64e   :  { %7063 = vmatpush3.bf16.msra.mxu0 %v8309_v14 }
 0x64f   :  { %7064 = vmatprep.subr.bf16.mxu0 %v9692_v11 }
 0x652   :  { %7066 = vmatpush3.bf16.msra.mxu0 %v8323_v37 }
 0x653   :  { %7067 = vmatprep.subr.bf16.mxu0 %v9692_v11 }
 0x656   :  { %7069 = vmatpush3.bf16.msra.mxu0 %v8339_v13 }
 0x657   :  { %7070 = vmatprep.subr.bf16.mxu0 %v9692_v11 }
 0x65a   :  { %7072 = vmatpush3.bf16.msra.mxu0 %v8353_v40 }
 0x65b   :  { %7073 = vmatprep.subr.bf16.mxu0 %v9692_v11 }
 0x65e   :  { %7075 = vmatpush3.bf16.msra.mxu0 %v8369_v27 }
 0x65f   :  { %7076 = vmatprep.subr.bf16.mxu0 %v9692_v11 }
 0x662   :  { %7078 = vmatpush3.bf16.msra.mxu0 %v8383_v56 }
 0x663   :  { %7079 = vmatprep.subr.bf16.mxu0 %v9692_v11 }
 0x666   :  { %7081 = vmatpush3.bf16.msra.mxu0 %v8401_v44 }
 0x667   :  { %7107 = vmatprep.subr.bf16.mxu0 %v8598_v23 }
 0x6fc   :  { %v1784_v29 = vpop.f32.mrb[40].mxu0 }
 0x6fd   :  { %v8744_v8 = vadd.f32 %v1784_v29, %v8583_v1  ;;  %v5947_v9 = vpop.f32.mrb[41].mxu0 }
 0x6ff   :  { %9699 = vst [vmem:[#allocation29_spill] sm:$0xff] %v8744_v8  ;;  %v1788_v31 = vsel %vm1245_vm2, %v8744_v8, -inf }
 0x700   :  { %1789 = vmax.xlane.f32.xlu1 %v1788_v31 }
 0x71c   :  { %v8748_v39 = vpop.f32.mrb[42].mxu0 }
 0x71d   :  { %v5982_v35 = vpop.f32.mrb[43].mxu0 }
 0x78d   :  { %v8750_v45 = vpop.xlane.xlu1 %1789 }
 0x78e   :  { %9700 = vst [vmem:[#allocation30_spill] sm:$0xff] %v8750_v45  ;;  %vm1791_vm6 = vcmp.eq.f32.partialorder %v8744_v8, %v8750_v45 }
 0x78f   :  { %v1792_v49 = vsel %vm1791_vm6, %v8395_v36, 128 }
 0x790   :  { %v1793_v38 = vsel %vm1245_vm2, %v1792_v49, 2147483647  ;;  %v2422_v49 = vld [vmem:[#allocation4 + $0x420] sm:$0xff] }
 0x791   :  { %v1795_v0 = vshra.s32 %v1793_v38, 16  ;;  %v1794_v9 = vand.u32 65535, %v1793_v38  ;;  %v2425_v38 = vld [vmem:[#allocation4 + $0x438] sm:$0xff] }
 0x793   :  { %v1797_v29 = vcvt.s32.f32 %v1795_v0  ;;  %v1796_v23 = vcvt.s32.f32 %v1794_v9  ;;  %v2429_v0 = vld [vmem:[#allocation4 + $0x458] sm:$0xff]  ;;  %v8777_v9 = vpack.c.bf16 %v2425_v38, %v2422_v49  ;;  %v2246_v38 = vld [vmem:[#allocation4 + $0x4b0] sm:$0xff] }
 0x795   :  { %1798 = vmin.xlane.f32.xlu0 %v1797_v29  ;;  %9703 = vst [vmem:[#allocation33_spill] sm:$0xff] %v8777_v9 }
 0x822   :  { %v1799_v1 = vpop.xlane.xlu0 %1798 }
 0x823   :  { %vm1800_vm7 = vcmp.eq.f32.partialorder %v1797_v29, %v1799_v1  ;;  %v1805_v44 = vcvt.f32.s32 %v1799_v1  ;;  %v2432_v29 = vld [vmem:[#allocation4 + $0x470] sm:$0xff] }
 0x824   :  { %v1801_v31 = vsel %vm1800_vm7, %v1796_v23, inf }
 0x825   :  { %1802 = vmin.xlane.f32.xlu1 %v1801_v31  ;;  %v1806_v56 = vshll.u32 %v1805_v44, 16  ;;  %v2426_v44 = vld [vmem:[#allocation4 + $0x440] sm:$0xff]  ;;  %v8780_v31 = vpack.c.bf16 %v2432_v29, %v2429_v0  ;;  %v2247_v0 = vld [vmem:[#allocation4 + $0x4c8] sm:$0xff] }
 0x826   :  { %v8800_v29 = vpack.c.bf16 %v2247_v0, %v2246_v38 }
 0x827   :  { %9704 = vst [vmem:[#allocation34_spill] sm:$0xff] %v8780_v31 }
 0x8b2   :  { %v1803_v35 = vpop.xlane.xlu1 %1802 }
 0x8b3   :  { %v1804_v27 = vcvt.f32.s32 %v1803_v35  ;;  %v2428_v35 = vld [vmem:[#allocation4 + $0x450] sm:$0xff] }
 0x8b5   :  { %v1807_v40 = vadd.s32 %v1806_v56, %v1804_v27  ;;  %v2419_v27 = vld [vmem:[#allocation4 + $0x408] sm:$0xff] }
 0x8b6   :  { %v2423_v56 = vld [vmem:[#allocation4 + $0x428] sm:$0xff] }
 0x8b7   :  { %vm1808_vm8 = vcmp.eq.s32.totalorder %v8395_v36, %v1807_v40  ;;  %7804 = vpush %v1807_v40  ;;  %v2416_v40 = vld [vmem:[#allocation4 + $0x3f0] sm:$0xff]  ;;  %v8774_v23 = vpack.c.bf16 %v2426_v44, %v2423_v56  ;;  %v2244_v56 = vld [vmem:[#allocation4 + $0x480] sm:$0xff]  ;;  %v2245_v44 = vld [vmem:[#allocation4 + $0x498] sm:$0xff] }
 0x8b8   :  { %5149 = vmatmul.mubr.msk.f32.vlgmr.msra.gmra.mrb[26].mxu1 %vm1808_vm8, %v9698_v48  ;;  %6016 = vmatmul.mubr.msk.f32.vlgmr.msra.gmra.mrb[44].mxu0 %vm1808_vm8, %v9698_v48  ;;  %v8771_v1 = vpack.c.bf16 %v2419_v27, %v2416_v40  ;;  %v2431_v40 = vld [vmem:[#allocation4 + $0x468] sm:$0xff]  ;;  %v8796_v49 = vpack.c.bf16 %v2245_v44, %v2244_v56  ;;  %v2250_v56 = vld [vmem:[#allocation4 + $0x510] sm:$0xff] }
 0x8b9   :  { %7109 = vmatpush1.bf16.msra.mxu0 %v8601_v55  ;;  %6050 = vmatprep.mubr.msk.f32.mxu1 %vm8077_vm0, %v9693_v58  ;;  %9702 = vst [vmem:[#allocation32_spill] sm:$0xff] %v8774_v23  ;;  %v8783_v27 = vpack.c.bf16 %v2431_v40, %v2428_v35  ;;  %v2248_v35 = vld [vmem:[#allocation4 + $0x4e0] sm:$0xff]  ;;  %v2249_v40 = vld [vmem:[#allocation4 + $0x4f8] sm:$0xff]  ;;  %v2251_v44 = vld [vmem:[#allocation4 + $0x528] sm:$0xff] }
 0x8ba   :  { %7111 = vmatprep.subr.bf16.mxu0 %v8603_v46  ;;  %2498 = vmatprep.mubr.f32.mxu0 %v9693_v58  ;;  %9701 = vst [vmem:[#allocation31_spill] sm:$0xff] %v8771_v1  ;;  %v8804_v8 = vpack.c.bf16 %v2249_v40, %v2248_v35  ;;  %v8808_v45 = vpack.c.bf16 %v2251_v44, %v2250_v56 }
 0x8bb   :  { %9705 = vst [vmem:[#allocation35_spill] sm:$0xff] %v8783_v27  ;;  %7084 = vmatpush3.bf16.msra.mxu1 %v8796_v49 }
 0x8bc   :  { %7085 = vmatprep.subr.bf16.mxu1 %v9692_v11 }
 0x8bd   :  { %7113 = vmatpush1.bf16.msra.mxu0 %v8609_v22 }
 0x8be   :  { %7115 = vmatprep.subr.bf16.mxu0 %v8613_v34 }
 0x8bf   :  { %7087 = vmatpush3.bf16.msra.mxu1 %v8800_v29 }
 0x8c0   :  { %7088 = vmatprep.subr.bf16.mxu1 %v9692_v11 }
 0x8c1   :  { %7117 = vmatpush1.bf16.msra.mxu0 %v8620_v12 }
 0x8c2   :  { %7119 = vmatprep.subr.bf16.mxu0 %v8624_v19 }
 0x8c3   :  { %7090 = vmatpush3.bf16.msra.mxu1 %v8804_v8 }
 0x8c4   :  { %7091 = vmatprep.subr.bf16.mxu1 %v9692_v11 }
 0x8c5   :  { %7121 = vmatpush1.bf16.msra.mxu0 %v8628_v52 }
 0x8c6   :  { %7123 = vmatprep.subr.bf16.mxu0 %v8632_v28 }
 0x8c7   :  { %7093 = vmatpush3.bf16.msra.mxu1 %v8808_v45 }
 0x8c8   :  { %7094 = vmatprep.subr.bf16.mxu1 %v9692_v11 }
 0x8c9   :  { %7125 = vmatpush1.bf16.msra.mxu0 %v8636_v43 }
 0x8ca   :  { %7127 = vmatprep.subr.bf16.mxu0 %v8640_v3 }
 0x8cb   :  { %7096 = vmatpush3.bf16.msra.mxu1 %v8507_v60 }
 0x8cc   :  { %7097 = vmatprep.subr.bf16.mxu1 %v9692_v11 }
 0x8cd   :  { %7129 = vmatpush1.bf16.msra.mxu0 %v8771_v1 }
 0x8ce   :  { %7131 = vmatprep.subr.bf16.mxu0 %v8774_v23 }
 0x8cf   :  { %7099 = vmatpush3.bf16.msra.mxu1 %v8511_v32 }
 0x8d0   :  { %7100 = vmatprep.subr.bf16.mxu1 %v9692_v11 }
 0x8d1   :  { %7133 = vmatpush1.bf16.msra.mxu0 %v8777_v9 }
 0x8d2   :  { %7135 = vmatprep.subr.bf16.mxu0 %v8780_v31 }
 0x8d3   :  { %7102 = vmatpush3.bf16.msra.mxu1 %v8514_v57  ;;  %v2236_v57 = vadd.f32 %v8748_v39, %v8523_v61  ;;  %v9707_v61 = vld [vmem:[#allocation22_spill] sm:$0xff]  ;;  %v9709_v39 = vld [vmem:[#allocation24_spill] sm:$0xff] }
 0x8d4   :  { %7103 = vmatprep.subr.bf16.mxu1 %v9692_v11 }
 0x8d5   :  { %7137 = vmatpush1.bf16.msra.mxu0 %v8783_v27 }
 0x8d6   :  { %7163 = vmatprep.subr.bf16.mxu0 %v8311_v15 }
 0x8d7   :  { %7105 = vmatpush3.bf16.msra.mxu1 %v8518_v5 }
 0x8d8   :  { %7138 = vmatprep.subr.bf16.mxu1 %v9692_v11 }
 0x8e8   :  { %s7805_s11 = spop %7804 }
 0x8e9   :  { %p1823_p11 = scmp.eq.s32.totalorder %s7805_s11, 1 }
 0x8eb   :  { %s8788_s12 = scalar_select %p1823_p11, 1, 0 }
 0x8ed   :  { %s1827_s13 = ssub.s32 1, %s8788_s12  ;;  %s1841_s17 = smul.u32 %s8788_s12, %s8662_s7 }
 0x8ee   :  { %s8792_s14 = smul.u32 %s1827_s13, %s8662_s7 }
 0x8ef   :  { %s8927_s19 = sadd.s32 %s1841_s17, %s8659_s6 }
 0x8f0   :  { %s1829_s15 = smul.u32 %s7805_s11, %s8792_s14  ;;  %s5147_s16 = sadd.s32 4294967295, %s8792_s14 }
 0x8f1   :  { %s8932_s21 = ssub.s32 1, %s8927_s19  ;;  %s1838_s24 = sadd.s32 %s8792_s14, %s8662_s7 }
 0x8f2   :  { %s1831_s1 = sadd.s32 %s5147_s16, %s1829_s15 }
 0x8f3   :  { %1833 = sst [smem:[#allocation12 + $0x1]] %s1831_s1 }
 0x98b   :  { %v2147_v38 = vpop.f32.mrb[26].mxu1  ;;  %v2218_v0 = vpop.f32.mrb[44].mxu0 }
 0x98c   :  { %v5151_v35 = vmul.f32 -1.442695, %v2147_v38  ;;  %v2149_v40 = vpop.f32.mrb[27].mxu1  ;;  %v6017_v56 = vpop.f32.mrb[45].mxu0 }
 0x98d   :  { %v5152_v60 = vmul.f32 -1.442695, %v2149_v40 }
 0x98e   :  { %7853 = vpow2.f32 %v5151_v35 }
 0x98f   :  { %7855 = vpow2.f32 %v5152_v60 }
 0x998   :  { %v7854_v44 = vpop.eup %7853 }
 0x999   :  { %v2226_v32 = vadd.f32 1.0, %v7854_v44  ;;  %v7856_v15 = vpop.eup %7855 }
 0x99a   :  { %v2233_v27 = vadd.f32 1.0, %v7856_v15  ;;  %v9706_v15 = vld [vmem:[#allocation21_spill] sm:$0xff] }
 0x99b   :  { %7857 = vrcp.f32 %v2226_v32 }
 0x99c   :  { %7859 = vrcp.f32 %v2233_v27 }
 0x9a5   :  { %v7858_v31 = vpop.eup %7857 }
 0x9a6   :  { %v2237_v5 = vmul.f32 %v7858_v31, %v2236_v57  ;;  %v7860_v23 = vpop.eup %7859 }
 0x9a7   :  { %v2240_v38 = vsub.f32 1.0, %v7860_v23  ;;  %v2242_v35 = vmul.f32 %v7860_v23, %v8671_v26  ;;  %v9708_v26 = vld [vmem:[#allocation23_spill] sm:$0xff] }
 0x9a8   :  { %v2238_v9 = vadd.f32 %v2237_v5, %v2218_v0 }
 0x9aa   :  { %7861 = vtanh.f32 %v2238_v9  ;;  %v9711_v9 = vld [vmem:[#allocation25_spill] sm:$0xff] }
 0x9b4   :  { %v7862_v1 = vpop.eup %7861 }
 0x9b5   :  { %v2241_v56 = vmul.f32 %v7862_v1, %v2240_v38  ;;  %v9710_v1 = vld [vmem:[#allocation28_spill] sm:$0xff] }
 0x9b7   :  { %v8823_v40 = vadd.f32 %v2242_v35, %v2241_v56 }
 0x9b9   :  { %6051 = vmatmul.mubr.f32.vlgmr.msra.gmra.mrb[28].mxu1 %v8823_v40  ;;  %2499 = vmatmul.mubr.f32.vlgmr.msra.gmra.mrb[46].mxu0 %v8823_v40 }
 0x9ba   :  { %7140 = vmatpush3.bf16.msra.mxu1 %v8669_v10  ;;  %7165 = vmatpush1.bf16.msra.mxu0 %v8304_v2 }
 0x9bb   :  { %7167 = vmatprep.subr.bf16.mxu0 %v8341_v16  ;;  %7141 = vmatprep.subr.bf16.mxu1 %v9692_v11 }
 0x9bc   :  { %6085 = vmatprep.mubr.msk.f32.mxu1 %vm8077_vm0, %v9693_v58  ;;  %2687 = vmatprep.mubr.f32.mxu0 %v9693_v58 }
 0x9be   :  { %7143 = vmatpush3.bf16.msra.mxu1 %v8677_v21  ;;  %7169 = vmatpush1.bf16.msra.mxu0 %v8334_v59 }
 0x9bf   :  { %7171 = vmatprep.subr.bf16.mxu0 %v8371_v20  ;;  %7144 = vmatprep.subr.bf16.mxu1 %v9692_v11 }
 0x9c2   :  { %7146 = vmatpush3.bf16.msra.mxu1 %v8686_v41  ;;  %7173 = vmatpush1.bf16.msra.mxu0 %v8364_v24 }
 0x9c3   :  { %7175 = vmatprep.subr.bf16.mxu0 %v8403_v33  ;;  %7147 = vmatprep.subr.bf16.mxu1 %v9692_v11 }
 0x9c6   :  { %7149 = vmatpush3.bf16.msra.mxu1 %v8692_v25  ;;  %7177 = vmatpush1.bf16.msra.mxu0 %v8397_v6 }
 0x9c7   :  { %7179 = vmatprep.subr.bf16.mxu0 %v8426_v30  ;;  %7150 = vmatprep.subr.bf16.mxu1 %v9692_v11 }
 0x9ca   :  { %7152 = vmatpush3.bf16.msra.mxu1 %v8698_v4  ;;  %7181 = vmatpush1.bf16.msra.mxu0 %v8422_v47 }
 0x9cb   :  { %7183 = vmatprep.subr.bf16.mxu0 %v8444_v62  ;;  %7153 = vmatprep.subr.bf16.mxu1 %v9692_v11 }
 0x9ce   :  { %7155 = vmatpush3.bf16.msra.mxu1 %v8704_v54  ;;  %7185 = vmatpush1.bf16.msra.mxu0 %v8440_v51 }
 0x9cf   :  { %7187 = vmatprep.subr.bf16.mxu0 %v8462_v18  ;;  %7156 = vmatprep.subr.bf16.mxu1 %v9692_v11 }
 0x9d2   :  { %7158 = vmatpush3.bf16.msra.mxu1 %v8710_v17  ;;  %7189 = vmatpush1.bf16.msra.mxu0 %v8458_v50 }
 0x9d3   :  { %7191 = vmatprep.subr.bf16.mxu0 %v8479_v7  ;;  %7159 = vmatprep.subr.bf16.mxu1 %v9692_v11 }
 0x9d6   :  { %7161 = vmatpush3.bf16.msra.mxu1 %v8716_v53  ;;  %7193 = vmatpush1.bf16.msra.mxu0 %v8476_v63 }
 0x9d7   :  { %7194 = vmatprep.subr.bf16.mxu1 %v9692_v11  ;;  %7218 = vmatprep.subr.bf16.mxu0 %v9692_v11 }
 0x9d9   :  { %6086 = vmatmul.mubr.f32.vlgmr.msra.gmra.mrb[30].mxu1 %v8823_v40 }
 0x9da   :  { %7196 = vmatpush3.bf16.msra.mxu1 %v8293_v42  ;;  %6120 = vmatprep.mubr.msk.f32.mxu1 %vm8077_vm0, %v9693_v58 }
 0x9db   :  { %7197 = vmatprep.subr.bf16.mxu1 %v9692_v11 }
 0x9de   :  { %7199 = vmatpush3.bf16.msra.mxu1 %v8309_v14 }
 0x9df   :  { %7200 = vmatprep.subr.bf16.mxu1 %v9692_v11 }
 0x9e2   :  { %7202 = vmatpush3.bf16.msra.mxu1 %v8323_v37 }
 0x9e3   :  { %7203 = vmatprep.subr.bf16.mxu1 %v9692_v11 }
 0x9e6   :  { %7205 = vmatpush3.bf16.msra.mxu1 %v8339_v13 }
 0x9e7   :  { %7206 = vmatprep.subr.bf16.mxu1 %v9692_v11 }
 0x9ea   :  { %7208 = vmatpush3.bf16.msra.mxu1 %v9706_v15 }
 0x9eb   :  { %7209 = vmatprep.subr.bf16.mxu1 %v9692_v11 }
 0x9ee   :  { %7211 = vmatpush3.bf16.msra.mxu1 %v9707_v61 }
 0x9ef   :  { %7212 = vmatprep.subr.bf16.mxu1 %v9692_v11 }
 0x9f2   :  { %7214 = vmatpush3.bf16.msra.mxu1 %v9708_v26 }
 0x9f3   :  { %7215 = vmatprep.subr.bf16.mxu1 %v9692_v11 }
 0x9f6   :  { %7217 = vmatpush3.bf16.msra.mxu1 %v9709_v39 }
 0x9f7   :  { %7243 = vmatprep.subr.bf16.mxu1 %v9710_v1 }
 0xa8c   :  { %v2326_v23 = vpop.f32.mrb[28].mxu1 }
 0xa8d   :  { %v8882_v31 = vadd.f32 %v2326_v23, %v9711_v9  ;;  %v6052_v27 = vpop.f32.mrb[29].mxu1 }
 0xa8f   :  { %9712 = vst [vmem:[#allocation28_spill] sm:$0xff] %v8882_v31  ;;  %v2330_v0 = vsel %vm1245_vm2, %v8882_v31, -inf }
 0xa90   :  { %2331 = vmax.xlane.f32.xlu0 %v2330_v0 }
 0xaac   :  { %v8886_v60 = vpop.f32.mrb[30].mxu1 }
 0xaad   :  { %v6087_v44 = vpop.f32.mrb[31].mxu1 }
 0xb1d   :  { %v8888_v32 = vpop.xlane.xlu0 %2331 }
 0xb1e   :  { %9713 = vst [vmem:[#allocation25_spill] sm:$0xff] %v8888_v32  ;;  %vm2333_vm9 = vcmp.eq.f32.partialorder %v8882_v31, %v8888_v32 }
 0xb1f   :  { %v2334_v57 = vsel %vm2333_vm9, %v8395_v36, 128 }
 0xb20   :  { %v2335_v5 = vsel %vm1245_vm2, %v2334_v57, 2147483647  ;;  %v2798_v57 = vld [vmem:[#allocation4 + $0x5a0] sm:$0xff] }
 0xb21   :  { %v2337_v38 = vshra.s32 %v2335_v5, 16  ;;  %v2336_v35 = vand.u32 65535, %v2335_v5  ;;  %v2799_v5 = vld [vmem:[#allocation4 + $0x5b8] sm:$0xff] }
 0xb23   :  { %v2339_v56 = vcvt.s32.f32 %v2337_v38  ;;  %v2338_v23 = vcvt.s32.f32 %v2336_v35  ;;  %v8947_v38 = vpack.c.bf16 %v2799_v5, %v2798_v57  ;;  %v2801_v35 = vld [vmem:[#allocation4 + $0x5e8] sm:$0xff]  ;;  %v8956_v5 = vld [vmem:[#allocation10 + $0x18] ss:$0 sm:$0xff] }
 0xb25   :  { %2340 = vmin.xlane.f32.xlu1 %v2339_v56 }
 0xbb2   :  { %v2341_v1 = vpop.xlane.xlu1 %2340 }
 0xbb3   :  { %vm2342_vm10 = vcmp.eq.f32.partialorder %v2339_v56, %v2341_v1  ;;  %v2347_v27 = vcvt.f32.s32 %v2341_v1  ;;  %v2800_v56 = vld [vmem:[#allocation4 + $0x5d0] sm:$0xff] }
 0xbb4   :  { %v2343_v9 = vsel %vm2342_vm10, %v2338_v23, inf  ;;  %v8951_v1 = vpack.c.bf16 %v2801_v35, %v2800_v56  ;;  %v2778_v56 = vadd.f32 %v8956_v5, %v8886_v60 }
 0xbb5   :  { %2344 = vmin.xlane.f32.xlu0 %v2343_v9  ;;  %v2348_v44 = vshll.u32 %v2347_v27, 16 }
 0xc42   :  { %v2345_v0 = vpop.xlane.xlu0 %2344 }
 0xc43   :  { %v2346_v39 = vcvt.f32.s32 %v2345_v0 }
 0xc45   :  { %v2349_v26 = vadd.s32 %v2348_v44, %v2346_v39 }
 0xc47   :  { %vm2350_vm11 = vcmp.eq.s32.totalorder %v8395_v36, %v2349_v26  ;;  %7806 = vpush %v2349_v26  ;;  %v2797_v26 = vld [vmem:[#allocation4 + $0x588] sm:$0xff] }
 0xc48   :  { %5156 = vmatmul.mubr.msk.f32.vlgmr.msra.gmra.mrb[46].mxu0 %vm2350_vm11, %v9698_v48  ;;  %6121 = vmatmul.mubr.msk.f32.vlgmr.msra.gmra.mrb[32].mxu1 %vm2350_vm11, %v9698_v48 }
 0xc49   :  { %7245 = vmatpush1.bf16.msra.mxu1 %v8601_v55  ;;  %7220 = vmatpush3.bf16.msra.mxu0 %v8796_v49  ;;  %v9714_v55 = vld [vmem:[#allocation31_spill] sm:$0xff] }
 0xc4a   :  { %7247 = vmatprep.subr.bf16.mxu1 %v8603_v46  ;;  %7221 = vmatprep.subr.bf16.mxu0 %v9692_v11  ;;  %v9715_v46 = vld [vmem:[#allocation32_spill] sm:$0xff] }
 0xc4b   :  { %6155 = vmatprep.mubr.msk.f32.mxu0 %vm8077_vm0, %v9693_v58  ;;  %3040 = vmatprep.mubr.f32.mxu1 %v9693_v58 }
 0xc4d   :  { %7249 = vmatpush1.bf16.msra.mxu1 %v8609_v22  ;;  %7223 = vmatpush3.bf16.msra.mxu0 %v8800_v29  ;;  %v9716_v22 = vld [vmem:[#allocation33_spill] sm:$0xff] }
 0xc4e   :  { %7251 = vmatprep.subr.bf16.mxu1 %v8613_v34  ;;  %7224 = vmatprep.subr.bf16.mxu0 %v9692_v11  ;;  %v9717_v34 = vld [vmem:[#allocation34_spill] sm:$0xff] }
 0xc51   :  { %7253 = vmatpush1.bf16.msra.mxu1 %v8620_v12  ;;  %7226 = vmatpush3.bf16.msra.mxu0 %v8804_v8  ;;  %v9718_v12 = vld [vmem:[#allocation35_spill] sm:$0xff] }
 0xc52   :  { %7255 = vmatprep.subr.bf16.mxu1 %v8624_v19  ;;  %7227 = vmatprep.subr.bf16.mxu0 %v9692_v11  ;;  %v9719_v19 = vld [vmem:[#allocation20_spill] sm:$0xff] }
 0xc55   :  { %7257 = vmatpush1.bf16.msra.mxu1 %v8628_v52  ;;  %7229 = vmatpush3.bf16.msra.mxu0 %v8808_v45  ;;  %v2794_v52 = vld [vmem:[#allocation4 + $0x540] sm:$0xff] }
 0xc56   :  { %7259 = vmatprep.subr.bf16.mxu1 %v8632_v28  ;;  %7230 = vmatprep.subr.bf16.mxu0 %v9692_v11  ;;  %v2795_v28 = vld [vmem:[#allocation4 + $0x558] sm:$0xff] }
 0xc59   :  { %7261 = vmatpush1.bf16.msra.mxu1 %v8636_v43  ;;  %v8940_v43 = vpack.c.bf16 %v2795_v28, %v2794_v52 }
 0xc5a   :  { %7263 = vmatprep.subr.bf16.mxu1 %v8640_v3  ;;  %v2796_v3 = vld [vmem:[#allocation4 + $0x570] sm:$0xff] }
 0xc5b   :  { %7232 = vmatpush3.bf16.msra.mxu0 %v8940_v43  ;;  %v8944_v39 = vpack.c.bf16 %v2797_v26, %v2796_v3 }
 0xc5c   :  { %7233 = vmatprep.subr.bf16.mxu0 %v9692_v11 }
 0xc5d   :  { %7265 = vmatpush1.bf16.msra.mxu1 %v9714_v55 }
 0xc5e   :  { %7267 = vmatprep.subr.bf16.mxu1 %v9715_v46 }
 0xc5f   :  { %7235 = vmatpush3.bf16.msra.mxu0 %v8944_v39 }
 0xc60   :  { %7236 = vmatprep.subr.bf16.mxu0 %v9692_v11 }
 0xc61   :  { %7269 = vmatpush1.bf16.msra.mxu1 %v9716_v22 }
 0xc62   :  { %7271 = vmatprep.subr.bf16.mxu1 %v9717_v34 }
 0xc63   :  { %7238 = vmatpush3.bf16.msra.mxu0 %v8947_v38 }
 0xc64   :  { %7239 = vmatprep.subr.bf16.mxu0 %v9692_v11 }
 0xc65   :  { %7273 = vmatpush1.bf16.msra.mxu1 %v9718_v12 }
 0xc66   :  { %7299 = vmatprep.subr.bf16.mxu1 %v9719_v19 }
 0xc67   :  { %7241 = vmatpush3.bf16.msra.mxu0 %v8951_v1 }
 0xc68   :  { %7274 = vmatprep.subr.bf16.mxu0 %v9692_v11 }
 0xc78   :  { %s7807_s18 = spop %7806 }
 0xc79   :  { %p2365_p12 = scmp.eq.s32.totalorder %s7807_s18, 1 }
 0xc7b   :  { %s8929_s20 = scalar_select %p2365_p12, 1, 0 }
 0xc7d   :  { %s2369_s22 = ssub.s32 1, %s8929_s20  ;;  %s2383_s29 = smul.u32 %s8932_s21, %s8929_s20 }
 0xc7e   :  { %s2370_s23 = smul.u32 %s2369_s22, %s8932_s21 }
 0xc7f   :  { %s9097_s30 = sadd.s32 %s2383_s29, %s8927_s19 }
 0xc80   :  { %s2371_s25 = smul.u32 %s7807_s18, %s2370_s23  ;;  %s5154_s26 = sadd.s32 4294967295, %s2370_s23 }
 0xc81   :  { %s8938_s27 = sadd.s32 %s2370_s23, %s1838_s24  ;;  %s9102_s6 = ssub.s32 1, %s9097_s30 }
 0xc82   :  { %s2373_s28 = sadd.s32 %s5154_s26, %s2371_s25 }
 0xc83   :  { %2375 = sst [smem:[#allocation12 + $0x2]] %s2373_s28 }
 0xd1b   :  { %v2689_v23 = vpop.f32.mrb[46].mxu0  ;;  %v2760_v9 = vpop.f32.mrb[32].mxu1 }
 0xd1c   :  { %v5158_v27 = vmul.f32 -1.442695, %v2689_v23  ;;  %v2691_v0 = vpop.f32.mrb[47].mxu0  ;;  %v6122_v44 = vpop.f32.mrb[33].mxu1 }
 0xd1d   :  { %v5159_v52 = vmul.f32 -1.442695, %v2691_v0 }
 0xd1e   :  { %7863 = vpow2.f32 %v5158_v27 }
 0xd1f   :  { %7865 = vpow2.f32 %v5159_v52 }
 0xd28   :  { %v7864_v28 = vpop.eup %7863 }
 0xd29   :  { %v2768_v3 = vadd.f32 1.0, %v7864_v28  ;;  %v7866_v26 = vpop.eup %7865 }
 0xd2a   :  { %v2775_v57 = vadd.f32 1.0, %v7866_v26 }
 0xd2b   :  { %7867 = vrcp.f32 %v2768_v3 }
 0xd2c   :  { %7869 = vrcp.f32 %v2775_v57 }
 0xd35   :  { %v7868_v35 = vpop.eup %7867 }
 0xd36   :  { %v2779_v31 = vmul.f32 %v7868_v35, %v2778_v56  ;;  %v7870_v23 = vpop.eup %7869 }
 0xd37   :  { %v2782_v44 = vsub.f32 1.0, %v7870_v23  ;;  %v2784_v52 = vmul.f32 %v7870_v23, %v8823_v40  ;;  %v3471_v23 = vld [vmem:[#allocation4 + $0x308] sm:$0xff] }
 0xd38   :  { %v2780_v32 = vadd.f32 %v2779_v31, %v2760_v9 }
 0xd3a   :  { %7871 = vtanh.f32 %v2780_v32 }
 0xd44   :  { %v7872_v27 = vpop.eup %7871 }
 0xd45   :  { %v2783_v0 = vmul.f32 %v7872_v27, %v2782_v44  ;;  %v3474_v44 = vld [vmem:[#allocation4 + $0x320] sm:$0xff] }
 0xd46   :  { %v9033_v27 = vpack.c.bf16 %v3474_v44, %v3471_v23  ;;  %v3486_v23 = vld [vmem:[#allocation4 + $0x380] sm:$0xff] }
 0xd47   :  { %v8961_v28 = vadd.f32 %v2784_v52, %v2783_v0 }
 0xd48   :  { %9725 = vst [vmem:[#allocation34_spill] sm:$0xff] %v9033_v27 }
 0xd49   :  { %6156 = vmatmul.mubr.f32.vlgmr.msra.gmra.mrb[48].mxu0 %v8961_v28  ;;  %3041 = vmatmul.mubr.f32.vlgmr.msra.gmra.mrb[34].mxu1 %v8961_v28 }
 0xd4a   :  { %7276 = vmatpush3.bf16.msra.mxu0 %v8669_v10  ;;  %7301 = vmatpush1.bf16.msra.mxu1 %v8304_v2  ;;  %v9720_v10 = vld [vmem:[#allocation23_spill] sm:$0xff] }
 0xd4b   :  { %7303 = vmatprep.subr.bf16.mxu1 %v8341_v16  ;;  %7277 = vmatprep.subr.bf16.mxu0 %v9692_v11 }
 0xd4c   :  { %6190 = vmatprep.mubr.msk.f32.mxu0 %vm8077_vm0, %v9693_v58  ;;  %3229 = vmatprep.mubr.f32.mxu1 %v9693_v58 }
 0xd4e   :  { %7279 = vmatpush3.bf16.msra.mxu0 %v8677_v21  ;;  %7305 = vmatpush1.bf16.msra.mxu1 %v8334_v59  ;;  %v9721_v21 = vld [vmem:[#allocation24_spill] sm:$0xff] }
 0xd4f   :  { %7307 = vmatprep.subr.bf16.mxu1 %v8371_v20  ;;  %7280 = vmatprep.subr.bf16.mxu0 %v9692_v11 }
 0xd52   :  { %7282 = vmatpush3.bf16.msra.mxu0 %v8686_v41  ;;  %7309 = vmatpush1.bf16.msra.mxu1 %v8364_v24 }
 0xd53   :  { %7311 = vmatprep.subr.bf16.mxu1 %v8403_v33  ;;  %7283 = vmatprep.subr.bf16.mxu0 %v9692_v11 }
 0xd56   :  { %7285 = vmatpush3.bf16.msra.mxu0 %v8692_v25  ;;  %7313 = vmatpush1.bf16.msra.mxu1 %v8397_v6  ;;  %v9018_v25 = vld [vmem:[#allocation10 + $0x30] ss:$0 sm:$0xff] }
 0xd57   :  { %7315 = vmatprep.subr.bf16.mxu1 %v8426_v30  ;;  %7286 = vmatprep.subr.bf16.mxu0 %v9692_v11  ;;  %9722 = vst [vmem:[#allocation31_spill] sm:$0xff] %v9018_v25 }
 0xd5a   :  { %7288 = vmatpush3.bf16.msra.mxu0 %v8698_v4  ;;  %7317 = vmatpush1.bf16.msra.mxu1 %v8422_v47 }
 0xd5b   :  { %7319 = vmatprep.subr.bf16.mxu1 %v8444_v62  ;;  %7289 = vmatprep.subr.bf16.mxu0 %v9692_v11 }
 0xd5e   :  { %7291 = vmatpush3.bf16.msra.mxu0 %v8704_v54  ;;  %7321 = vmatpush1.bf16.msra.mxu1 %v8440_v51 }
 0xd5f   :  { %7323 = vmatprep.subr.bf16.mxu1 %v8462_v18  ;;  %7292 = vmatprep.subr.bf16.mxu0 %v9692_v11 }
 0xd62   :  { %7294 = vmatpush3.bf16.msra.mxu0 %v8710_v17  ;;  %7325 = vmatpush1.bf16.msra.mxu1 %v8458_v50 }
 0xd63   :  { %7327 = vmatprep.subr.bf16.mxu1 %v8479_v7  ;;  %7295 = vmatprep.subr.bf16.mxu0 %v9692_v11 }
 0xd66   :  { %7297 = vmatpush3.bf16.msra.mxu0 %v8716_v53  ;;  %7329 = vmatpush1.bf16.msra.mxu1 %v8476_v63 }
 0xd67   :  { %7330 = vmatprep.subr.bf16.mxu0 %v9692_v11  ;;  %7354 = vmatprep.subr.bf16.mxu1 %v9692_v11 }
 0xd69   :  { %6191 = vmatmul.mubr.f32.vlgmr.msra.gmra.mrb[50].mxu0 %v8961_v28 }
 0xd6a   :  { %7332 = vmatpush3.bf16.msra.mxu0 %v8293_v42  ;;  %6225 = vmatprep.mubr.msk.f32.mxu0 %vm8077_vm0, %v9693_v58 }
 0xd6b   :  { %7333 = vmatprep.subr.bf16.mxu0 %v9692_v11 }
 0xd6e   :  { %7335 = vmatpush3.bf16.msra.mxu0 %v8309_v14 }
 0xd6f   :  { %7336 = vmatprep.subr.bf16.mxu0 %v9692_v11 }
 0xd72   :  { %7338 = vmatpush3.bf16.msra.mxu0 %v8323_v37 }
 0xd73   :  { %7339 = vmatprep.subr.bf16.mxu0 %v9692_v11 }
 0xd76   :  { %7341 = vmatpush3.bf16.msra.mxu0 %v8339_v13 }
 0xd77   :  { %7342 = vmatprep.subr.bf16.mxu0 %v9692_v11 }
 0xd7a   :  { %7344 = vmatpush3.bf16.msra.mxu0 %v9706_v15 }
 0xd7b   :  { %7345 = vmatprep.subr.bf16.mxu0 %v9692_v11 }
 0xd7e   :  { %7347 = vmatpush3.bf16.msra.mxu0 %v9707_v61 }
 0xd7f   :  { %7348 = vmatprep.subr.bf16.mxu0 %v9692_v11 }
 0xd82   :  { %7350 = vmatpush3.bf16.msra.mxu0 %v9720_v10 }
 0xd83   :  { %7351 = vmatprep.subr.bf16.mxu0 %v9692_v11 }
 0xd86   :  { %7353 = vmatpush3.bf16.msra.mxu0 %v9721_v21 }
 0xd87   :  { %7379 = vmatprep.subr.bf16.mxu0 %v9033_v27 }
 0xe1c   :  { %v2868_v41 = vpop.f32.mrb[48].mxu0 }
 0xe1d   :  { %v9021_v4 = vadd.f32 %v9018_v25, %v2868_v41  ;;  %v6157_v54 = vpop.f32.mrb[49].mxu0  ;;  %v3470_v41 = vld [vmem:[#allocation4 + $0x300] sm:$0xff] }
 0xe1e   :  { %v3473_v54 = vld [vmem:[#allocation4 + $0x318] sm:$0xff] }
 0xe1f   :  { %9723 = vst [vmem:[#allocation32_spill] sm:$0xff] %v9021_v4  ;;  %v2872_v17 = vsel %vm1245_vm2, %v9021_v4, -inf }
 0xe20   :  { %2873 = vmax.xlane.f32.xlu1 %v2872_v17 }
 0xe3c   :  { %v9025_v53 = vpop.f32.mrb[50].mxu0 }
 0xe3d   :  { %v6192_v40 = vpop.f32.mrb[51].mxu0 }
 0xead   :  { %v9027_v31 = vpop.xlane.xlu1 %2873 }
 0xeae   :  { %9724 = vst [vmem:[#allocation33_spill] sm:$0xff] %v9027_v31  ;;  %vm2875_vm12 = vcmp.eq.f32.partialorder %v9021_v4, %v9027_v31  ;;  %v9036_v4 = vpack.c.bf16 %v3473_v54, %v3470_v41  ;;  %v3489_v41 = vld [vmem:[#allocation4 + $0x398] sm:$0xff]  ;;  %v3492_v54 = vld [vmem:[#allocation4 + $0x3b0] sm:$0xff] }
 0xeaf   :  { %v2876_v60 = vsel %vm2875_vm12, %v8395_v36, 128  ;;  %v3481_v31 = vld [vmem:[#allocation4 + $0x358] sm:$0xff] }
 0xeb0   :  { %v2877_v32 = vsel %vm1245_vm2, %v2876_v60, 2147483647  ;;  %v3477_v60 = vld [vmem:[#allocation4 + $0x338] sm:$0xff] }
 0xeb1   :  { %v2879_v9 = vshra.s32 %v2877_v32, 16  ;;  %v2878_v26 = vand.u32 65535, %v2877_v32 }
 0xeb3   :  { %v2881_v3 = vcvt.s32.f32 %v2879_v9  ;;  %v2880_v56 = vcvt.s32.f32 %v2878_v26  ;;  %v3480_v9 = vld [vmem:[#allocation4 + $0x350] sm:$0xff] }
 0xeb4   :  { %v3476_v26 = vld [vmem:[#allocation4 + $0x330] sm:$0xff] }
 0xeb5   :  { %2882 = vmin.xlane.f32.xlu0 %v2881_v3 }
 0xf42   :  { %v2883_v57 = vpop.xlane.xlu0 %2882 }
 0xf43   :  { %vm2884_vm13 = vcmp.eq.f32.partialorder %v2881_v3, %v2883_v57  ;;  %v2889_v0 = vcvt.f32.s32 %v2883_v57  ;;  %v9038_v3 = vpack.c.bf16 %v3480_v9, %v3477_v60  ;;  %v3491_v60 = vld [vmem:[#allocation4 + $0x3a8] sm:$0xff] }
 0xf44   :  { %v2885_v35 = vsel %vm2884_vm13, %v2880_v56, inf  ;;  %v3479_v56 = vld [vmem:[#allocation4 + $0x348] sm:$0xff] }
 0xf45   :  { %2886 = vmin.xlane.f32.xlu1 %v2885_v35  ;;  %v2890_v17 = vshll.u32 %v2889_v0, 16  ;;  %v3483_v35 = vld [vmem:[#allocation4 + $0x368] sm:$0xff]  ;;  %v9044_v57 = vpack.c.bf16 %v3479_v56, %v3476_v26  ;;  %v3482_v0 = vld [vmem:[#allocation4 + $0x360] sm:$0xff] }
 0xf46   :  { %v9048_v44 = vpack.c.bf16 %v3486_v23, %v3483_v35  ;;  %v3495_v9 = vld [vmem:[#allocation4 + $0x3c8] sm:$0xff]  ;;  %v3497_v35 = vld [vmem:[#allocation4 + $0x3d8] sm:$0xff] }
 0xf47   :  { %v3501_v23 = vld [vmem:[#allocation4 + $0x3f8] sm:$0xff] }
 0xfd2   :  { %v2887_v52 = vpop.xlane.xlu1 %2886 }
 0xfd3   :  { %v2888_v40 = vcvt.f32.s32 %v2887_v52  ;;  %v3485_v52 = vld [vmem:[#allocation4 + $0x378] sm:$0xff] }
 0xfd5   :  { %v2891_v32 = vadd.s32 %v2890_v17, %v2888_v40  ;;  %v9055_v17 = vpack.c.bf16 %v3485_v52, %v3482_v0  ;;  %v3488_v40 = vld [vmem:[#allocation4 + $0x390] sm:$0xff] }
 0xfd6   :  { %v9063_v26 = vpack.c.bf16 %v3491_v60, %v3488_v40  ;;  %v3504_v0 = vld [vmem:[#allocation4 + $0x410] sm:$0xff] }
 0xfd7   :  { %vm2892_vm14 = vcmp.eq.s32.totalorder %v8395_v36, %v2891_v32  ;;  %7808 = vpush %v2891_v32  ;;  %v3498_v32 = vld [vmem:[#allocation4 + $0x3e0] sm:$0xff] }
 0xfd8   :  { %5163 = vmatmul.mubr.msk.f32.vlgmr.msra.gmra.mrb[34].mxu1 %vm2892_vm14, %v9698_v48  ;;  %6226 = vmatmul.mubr.msk.f32.vlgmr.msra.gmra.mrb[52].mxu0 %vm2892_vm14, %v9698_v48  ;;  %v9067_v56 = vpack.c.bf16 %v3498_v32, %v3495_v9  ;;  %v3320_v9 = vadd.f32 %v8956_v5, %v9025_v53 }
 0xfd9   :  { %7381 = vmatpush1.bf16.msra.mxu0 %v9036_v4  ;;  %7356 = vmatpush3.bf16.msra.mxu1 %v8796_v49  ;;  %v9059_v49 = vpack.c.bf16 %v3492_v54, %v3489_v41  ;;  %v9075_v41 = vpack.c.bf16 %v3504_v0, %v3501_v23 }
 0xfda   :  { %7383 = vmatprep.subr.bf16.mxu0 %v9038_v3  ;;  %7357 = vmatprep.subr.bf16.mxu1 %v9692_v11 }
 0xfdb   :  { %6260 = vmatprep.mubr.msk.f32.mxu1 %vm8077_vm0, %v9693_v58  ;;  %3582 = vmatprep.mubr.f32.mxu0 %v9693_v58 }
 0xfdd   :  { %7385 = vmatpush1.bf16.msra.mxu0 %v9044_v57  ;;  %7359 = vmatpush3.bf16.msra.mxu1 %v8800_v29  ;;  %v3494_v29 = vld [vmem:[#allocation4 + $0x3c0] sm:$0xff] }
 0xfde   :  { %7387 = vmatprep.subr.bf16.mxu0 %v9048_v44  ;;  %7360 = vmatprep.subr.bf16.mxu1 %v9692_v11  ;;  %v9071_v52 = vpack.c.bf16 %v3497_v35, %v3494_v29 }
 0xfe1   :  { %7389 = vmatpush1.bf16.msra.mxu0 %v9055_v17  ;;  %7362 = vmatpush3.bf16.msra.mxu1 %v8804_v8 }
 0xfe2   :  { %7391 = vmatprep.subr.bf16.mxu0 %v9059_v49  ;;  %7363 = vmatprep.subr.bf16.mxu1 %v9692_v11 }
 0xfe5   :  { %7393 = vmatpush1.bf16.msra.mxu0 %v9063_v26  ;;  %7365 = vmatpush3.bf16.msra.mxu1 %v8808_v45 }
 0xfe6   :  { %7395 = vmatprep.subr.bf16.mxu0 %v9067_v56  ;;  %7366 = vmatprep.subr.bf16.mxu1 %v9692_v11 }
 0xfe9   :  { %7397 = vmatpush1.bf16.msra.mxu0 %v9071_v52  ;;  %7368 = vmatpush3.bf16.msra.mxu1 %v8940_v43 }
 0xfea   :  { %7399 = vmatprep.subr.bf16.mxu0 %v9075_v41  ;;  %7369 = vmatprep.subr.bf16.mxu1 %v9692_v11 }
 0xfed   :  { %7401 = vmatpush1.bf16.msra.mxu0 %v9714_v55  ;;  %7371 = vmatpush3.bf16.msra.mxu1 %v8944_v39 }
 0xfee   :  { %7403 = vmatprep.subr.bf16.mxu0 %v9715_v46  ;;  %7372 = vmatprep.subr.bf16.mxu1 %v9692_v11 }
 0xff1   :  { %7405 = vmatpush1.bf16.msra.mxu0 %v9716_v22  ;;  %7374 = vmatpush3.bf16.msra.mxu1 %v8947_v38 }
 0xff2   :  { %7407 = vmatprep.subr.bf16.mxu0 %v9717_v34  ;;  %7375 = vmatprep.subr.bf16.mxu1 %v9692_v11 }
 0xff5   :  { %7409 = vmatpush1.bf16.msra.mxu0 %v9718_v12  ;;  %7377 = vmatpush3.bf16.msra.mxu1 %v8951_v1 }
 0xff6   :  { %7435 = vmatprep.subr.bf16.mxu0 %v9719_v19  ;;  %7410 = vmatprep.subr.bf16.mxu1 %v9692_v11 }
0x1008   :  { %s7809_s0 = spop %7808 }
0x1009   :  { %p2907_p13 = scmp.eq.s32.totalorder %s7809_s0, 1 }
0x100b   :  { %s9099_s2 = scalar_select %p2907_p13, 1, 0 }
0x100d   :  { %s2911_s8 = ssub.s32 1, %s9099_s2  ;;  %s2925_s14 = smul.u32 %s9102_s6, %s9099_s2 }
0x100e   :  { %s9106_s9 = smul.u32 %s2911_s8, %s9102_s6 }
0x100f   :  { %s9237_s16 = sadd.s32 %s2925_s14, %s9097_s30 }
0x1010   :  { %s2913_s10 = smul.u32 %s7809_s0, %s9106_s9  ;;  %s5161_s11 = sadd.s32 4294967295, %s9106_s9 }
0x1011   :  { %s2922_s12 = sadd.s32 %s9106_s9, %s8938_s27  ;;  %s9242_s17 = ssub.s32 1, %s9237_s16 }
0x1012   :  { %s2915_s13 = sadd.s32 %s5161_s11, %s2913_s10 }
0x1013   :  { %2917 = sst [smem:[#allocation12 + $0x3]] %s2915_s13 }
0x10ab   :  { %v3231_v8 = vpop.f32.mrb[34].mxu1  ;;  %v3302_v45 = vpop.f32.mrb[52].mxu0 }
0x10ac   :  { %v5165_v55 = vmul.f32 -1.442695, %v3231_v8  ;;  %v3233_v46 = vpop.f32.mrb[35].mxu1  ;;  %v6227_v22 = vpop.f32.mrb[53].mxu0  ;;  %v3472_v8 = vld [vmem:[#allocation4 + $0x310] sm:$0xff] }
0x10ad   :  { %v5166_v34 = vmul.f32 -1.442695, %v3233_v46  ;;  %v3475_v22 = vld [vmem:[#allocation4 + $0x328] sm:$0xff] }
0x10ae   :  { %7873 = vpow2.f32 %v5165_v55 }
0x10af   :  { %7875 = vpow2.f32 %v5166_v34 }
0x10b8   :  { %v7874_v12 = vpop.eup %7873 }
0x10b9   :  { %v3310_v54 = vadd.f32 1.0, %v7874_v12  ;;  %v7876_v40 = vpop.eup %7875  ;;  %v9115_v12 = vpack.c.bf16 %v3475_v22, %v3472_v8  ;;  %v3505_v8 = vld [vmem:[#allocation4 + $0x418] sm:$0xff] }
0x10ba   :  { %v3317_v60 = vadd.f32 1.0, %v7876_v40  ;;  %v3478_v40 = vld [vmem:[#allocation4 + $0x340] sm:$0xff] }
0x10bb   :  { %7877 = vrcp.f32 %v3310_v54  ;;  %v9123_v53 = vpack.c.bf16 %v3481_v31, %v3478_v40  ;;  %v3490_v31 = vld [vmem:[#allocation4 + $0x3a0] sm:$0xff] }
0x10bc   :  { %7879 = vrcp.f32 %v3317_v60  ;;  %v3514_v40 = vld [vmem:[#allocation4 + $0x460] sm:$0xff] }
0x10c5   :  { %v7878_v32 = vpop.eup %7877 }
0x10c6   :  { %v3321_v29 = vmul.f32 %v7878_v32, %v3320_v9  ;;  %v7880_v23 = vpop.eup %7879  ;;  %v3493_v9 = vld [vmem:[#allocation4 + $0x3b8] sm:$0xff] }
0x10c7   :  { %v3324_v0 = vsub.f32 1.0, %v7880_v23  ;;  %v3326_v34 = vmul.f32 %v7880_v23, %v8961_v28  ;;  %v3484_v28 = vld [vmem:[#allocation4 + $0x370] sm:$0xff]  ;;  %v9138_v32 = vpack.c.bf16 %v3493_v9, %v3490_v31 }
0x10c8   :  { %v3322_v35 = vadd.f32 %v3321_v29, %v3302_v45  ;;  %v3487_v45 = vld [vmem:[#allocation4 + $0x388] sm:$0xff]  ;;  %v3496_v29 = vld [vmem:[#allocation4 + $0x3d0] sm:$0xff] }
0x10c9   :  { %v9132_v60 = vpack.c.bf16 %v3487_v45, %v3484_v28  ;;  %v3517_v28 = vld [vmem:[#allocation4 + $0x478] sm:$0xff] }
0x10ca   :  { %7881 = vtanh.f32 %v3322_v35  ;;  %v3499_v35 = vld [vmem:[#allocation4 + $0x3e8] sm:$0xff]  ;;  %v9162_v45 = vpack.c.bf16 %v3517_v28, %v3514_v40 }
0x10cb   :  { %v9144_v23 = vpack.c.bf16 %v3499_v35, %v3496_v29 }
0x10d4   :  { %v7882_v55 = vpop.eup %7881 }
0x10d5   :  { %v3325_v46 = vmul.f32 %v7882_v55, %v3324_v0  ;;  %v3502_v0 = vld [vmem:[#allocation4 + $0x400] sm:$0xff]  ;;  %v3508_v55 = vld [vmem:[#allocation4 + $0x430] sm:$0xff] }
0x10d6   :  { %v9150_v22 = vpack.c.bf16 %v3505_v8, %v3502_v0 }
0x10d7   :  { %v9117_v54 = vadd.f32 %v3326_v34, %v3325_v46  ;;  %v3511_v46 = vld [vmem:[#allocation4 + $0x448] sm:$0xff] }
0x10d8   :  { %v9156_v34 = vpack.c.bf16 %v3511_v46, %v3508_v55 }
0x10d9   :  { %6261 = vmatmul.mubr.f32.vlgmr.msra.gmra.mrb[36].mxu1 %v9117_v54  ;;  %3583 = vmatmul.mubr.f32.vlgmr.msra.gmra.mrb[54].mxu0 %v9117_v54 }
0x10da   :  { %7412 = vmatpush3.bf16.msra.mxu1 %v9115_v12  ;;  %7437 = vmatpush1.bf16.msra.mxu0 %v8304_v2 }
0x10db   :  { %7439 = vmatprep.subr.bf16.mxu0 %v8341_v16  ;;  %7413 = vmatprep.subr.bf16.mxu1 %v9692_v11 }
0x10dc   :  { %6295 = vmatprep.mubr.msk.f32.mxu1 %vm8077_vm0, %v9693_v58  ;;  %3771 = vmatprep.mubr.f32.mxu0 %v9693_v58 }
0x10de   :  { %7415 = vmatpush3.bf16.msra.mxu1 %v9123_v53  ;;  %7441 = vmatpush1.bf16.msra.mxu0 %v8334_v59 }
0x10df   :  { %7443 = vmatprep.subr.bf16.mxu0 %v8371_v20  ;;  %7416 = vmatprep.subr.bf16.mxu1 %v9692_v11 }
0x10e2   :  { %7418 = vmatpush3.bf16.msra.mxu1 %v9132_v60  ;;  %7445 = vmatpush1.bf16.msra.mxu0 %v8364_v24 }
0x10e3   :  { %7447 = vmatprep.subr.bf16.mxu0 %v8403_v33  ;;  %7419 = vmatprep.subr.bf16.mxu1 %v9692_v11 }
0x10e6   :  { %7421 = vmatpush3.bf16.msra.mxu1 %v9138_v32  ;;  %7449 = vmatpush1.bf16.msra.mxu0 %v8397_v6 }
0x10e7   :  { %7451 = vmatprep.subr.bf16.mxu0 %v8426_v30  ;;  %7422 = vmatprep.subr.bf16.mxu1 %v9692_v11 }
0x10ea   :  { %7424 = vmatpush3.bf16.msra.mxu1 %v9144_v23  ;;  %7453 = vmatpush1.bf16.msra.mxu0 %v8422_v47 }
0x10eb   :  { %7455 = vmatprep.subr.bf16.mxu0 %v8444_v62  ;;  %7425 = vmatprep.subr.bf16.mxu1 %v9692_v11 }
0x10ee   :  { %7427 = vmatpush3.bf16.msra.mxu1 %v9150_v22  ;;  %7457 = vmatpush1.bf16.msra.mxu0 %v8440_v51 }
0x10ef   :  { %7459 = vmatprep.subr.bf16.mxu0 %v8462_v18  ;;  %7428 = vmatprep.subr.bf16.mxu1 %v9692_v11 }
0x10f2   :  { %7430 = vmatpush3.bf16.msra.mxu1 %v9156_v34  ;;  %7461 = vmatpush1.bf16.msra.mxu0 %v8458_v50 }
0x10f3   :  { %7463 = vmatprep.subr.bf16.mxu0 %v8479_v7  ;;  %7431 = vmatprep.subr.bf16.mxu1 %v9692_v11 }
0x10f6   :  { %7433 = vmatpush3.bf16.msra.mxu1 %v9162_v45  ;;  %7465 = vmatpush1.bf16.msra.mxu0 %v8476_v63 }
0x10f7   :  { %7466 = vmatprep.subr.bf16.mxu1 %v9692_v11  ;;  %7490 = vmatprep.subr.bf16.mxu0 %v9692_v11 }
0x10f9   :  { %6296 = vmatmul.mubr.f32.vlgmr.msra.gmra.mrb[38].mxu1 %v9117_v54 }
0x10fa   :  { %7468 = vmatpush3.bf16.msra.mxu1 %v8293_v42  ;;  %6330 = vmatprep.mubr.msk.f32.mxu1 %vm8077_vm0, %v9693_v58 }
0x10fb   :  { %7469 = vmatprep.subr.bf16.mxu1 %v9692_v11 }
0x10fe   :  { %7471 = vmatpush3.bf16.msra.mxu1 %v8309_v14 }
0x10ff   :  { %7472 = vmatprep.subr.bf16.mxu1 %v9692_v11 }
0x1102   :  { %7474 = vmatpush3.bf16.msra.mxu1 %v8323_v37 }
0x1103   :  { %7475 = vmatprep.subr.bf16.mxu1 %v9692_v11 }
0x1106   :  { %7477 = vmatpush3.bf16.msra.mxu1 %v8339_v13 }
0x1107   :  { %7478 = vmatprep.subr.bf16.mxu1 %v9692_v11 }
0x110a   :  { %7480 = vmatpush3.bf16.msra.mxu1 %v9706_v15 }
0x110b   :  { %7481 = vmatprep.subr.bf16.mxu1 %v9692_v11 }
0x110e   :  { %7483 = vmatpush3.bf16.msra.mxu1 %v9707_v61 }
0x110f   :  { %7484 = vmatprep.subr.bf16.mxu1 %v9692_v11 }
0x1112   :  { %7486 = vmatpush3.bf16.msra.mxu1 %v9720_v10 }
0x1113   :  { %7487 = vmatprep.subr.bf16.mxu1 %v9692_v11 }
0x1116   :  { %7489 = vmatpush3.bf16.msra.mxu1 %v9721_v21 }
0x1117   :  { %7515 = vmatprep.subr.bf16.mxu1 %v9033_v27 }
0x11ac   :  { %v3410_v31 = vpop.f32.mrb[36].mxu1 }
0x11ad   :  { %v9190_v9 = vadd.f32 %v9018_v25, %v3410_v31  ;;  %v6262_v29 = vpop.f32.mrb[37].mxu1 }
0x11af   :  { %9726 = vst [vmem:[#allocation35_spill] sm:$0xff] %v9190_v9  ;;  %v3414_v35 = vsel %vm1245_vm2, %v9190_v9, -inf }
0x11b0   :  { %3415 = vmax.xlane.f32.xlu0 %v3414_v35 }
0x11cc   :  { %v9194_v0 = vpop.f32.mrb[38].mxu1 }
0x11cd   :  { %v6297_v8 = vpop.f32.mrb[39].mxu1 }
0x123d   :  { %v9196_v55 = vpop.xlane.xlu0 %3415 }
0x123e   :  { %9727 = vst [vmem:[#allocation36_spill] sm:$0xff] %v9196_v55  ;;  %vm3417_vm15 = vcmp.eq.f32.partialorder %v9190_v9, %v9196_v55 }
0x123f   :  { %v3418_v46 = vsel %vm3417_vm15, %v8395_v36, 128 }
0x1240   :  { %v3419_v40 = vsel %vm1245_vm2, %v3418_v46, 2147483647  ;;  %v4048_v46 = vld [vmem:[#allocation4 + $0x420] sm:$0xff] }
0x1241   :  { %v3421_v28 = vshra.s32 %v3419_v40, 16  ;;  %v3420_v29 = vand.u32 65535, %v3419_v40  ;;  %v4051_v40 = vld [vmem:[#allocation4 + $0x438] sm:$0xff] }
0x1243   :  { %v3423_v31 = vcvt.s32.f32 %v3421_v28  ;;  %v3422_v27 = vcvt.s32.f32 %v3420_v29  ;;  %v4055_v28 = vld [vmem:[#allocation4 + $0x458] sm:$0xff]  ;;  %v9223_v29 = vpack.c.bf16 %v4051_v40, %v4048_v46  ;;  %v3872_v40 = vld [vmem:[#allocation4 + $0x4b0] sm:$0xff] }
0x1245   :  { %3424 = vmin.xlane.f32.xlu1 %v3423_v31  ;;  %9730 = vst [vmem:[#allocation39_spill] sm:$0xff] %v9223_v29 }
0x12d2   :  { %v3425_v25 = vpop.xlane.xlu1 %3424 }
0x12d3   :  { %vm3426_vm1 = vcmp.eq.f32.partialorder %v3423_v31, %v3425_v25  ;;  %v3431_v21 = vcvt.f32.s32 %v3425_v25  ;;  %v4058_v31 = vld [vmem:[#allocation4 + $0x470] sm:$0xff] }
0x12d4   :  { %v3427_v35 = vsel %vm3426_vm1, %v3422_v27, inf }
0x12d5   :  { %3428 = vmin.xlane.f32.xlu0 %v3427_v35  ;;  %v3432_v10 = vshll.u32 %v3431_v21, 16  ;;  %v4052_v21 = vld [vmem:[#allocation4 + $0x440] sm:$0xff]  ;;  %v9226_v35 = vpack.c.bf16 %v4058_v31, %v4055_v28  ;;  %v3873_v28 = vld [vmem:[#allocation4 + $0x4c8] sm:$0xff] }
0x12d6   :  { %v9255_v31 = vpack.c.bf16 %v3873_v28, %v3872_v40 }
0x12d7   :  { %9731 = vst [vmem:[#allocation40_spill] sm:$0xff] %v9226_v35 }
0x1362   :  { %v3429_v8 = vpop.xlane.xlu0 %3428 }
0x1363   :  { %v3430_v61 = vcvt.f32.s32 %v3429_v8  ;;  %v4054_v8 = vld [vmem:[#allocation4 + $0x450] sm:$0xff] }
0x1365   :  { %v3433_v15 = vadd.s32 %v3432_v10, %v3430_v61  ;;  %v4045_v61 = vld [vmem:[#allocation4 + $0x408] sm:$0xff] }
0x1366   :  { %v4049_v10 = vld [vmem:[#allocation4 + $0x428] sm:$0xff] }
0x1367   :  { %vm3434_vm3 = vcmp.eq.s32.totalorder %v8395_v36, %v3433_v15  ;;  %7810 = vpush %v3433_v15  ;;  %v4042_v15 = vld [vmem:[#allocation4 + $0x3f0] sm:$0xff]  ;;  %v9220_v27 = vpack.c.bf16 %v4052_v21, %v4049_v10  ;;  %v3870_v10 = vld [vmem:[#allocation4 + $0x480] sm:$0xff]  ;;  %v3871_v21 = vld [vmem:[#allocation4 + $0x498] sm:$0xff] }
0x1368   :  { %5170 = vmatmul.mubr.msk.f32.vlgmr.msra.gmra.mrb[54].mxu0 %vm3434_vm3, %v9698_v48  ;;  %6331 = vmatmul.mubr.msk.f32.vlgmr.msra.gmra.mrb[40].mxu1 %vm3434_vm3, %v9698_v48  ;;  %v9217_v25 = vpack.c.bf16 %v4045_v61, %v4042_v15  ;;  %v4057_v15 = vld [vmem:[#allocation4 + $0x468] sm:$0xff]  ;;  %v9251_v46 = vpack.c.bf16 %v3871_v21, %v3870_v10  ;;  %v3876_v10 = vld [vmem:[#allocation4 + $0x510] sm:$0xff] }
0x1369   :  { %7517 = vmatpush1.bf16.msra.mxu1 %v9036_v4  ;;  %6365 = vmatprep.mubr.msk.f32.mxu0 %vm8077_vm0, %v9693_v58  ;;  %9729 = vst [vmem:[#allocation38_spill] sm:$0xff] %v9220_v27  ;;  %v9229_v61 = vpack.c.bf16 %v4057_v15, %v4054_v8  ;;  %v3874_v8 = vld [vmem:[#allocation4 + $0x4e0] sm:$0xff]  ;;  %v3875_v15 = vld [vmem:[#allocation4 + $0x4f8] sm:$0xff]  ;;  %v3877_v21 = vld [vmem:[#allocation4 + $0x528] sm:$0xff] }
0x136a   :  { %7519 = vmatprep.subr.bf16.mxu1 %v9038_v3  ;;  %4124 = vmatprep.mubr.f32.mxu1 %v9693_v58  ;;  %9728 = vst [vmem:[#allocation37_spill] sm:$0xff] %v9217_v25  ;;  %v9259_v9 = vpack.c.bf16 %v3875_v15, %v3874_v8  ;;  %v9263_v55 = vpack.c.bf16 %v3877_v21, %v3876_v10 }
0x136b   :  { %9732 = vst [vmem:[#allocation41_spill] sm:$0xff] %v9229_v61  ;;  %7492 = vmatpush3.bf16.msra.mxu0 %v9251_v46 }
0x136c   :  { %7493 = vmatprep.subr.bf16.mxu0 %v9692_v11 }
0x136d   :  { %7521 = vmatpush1.bf16.msra.mxu1 %v9044_v57 }
0x136e   :  { %7523 = vmatprep.subr.bf16.mxu1 %v9048_v44 }
0x136f   :  { %7495 = vmatpush3.bf16.msra.mxu0 %v9255_v31 }
0x1370   :  { %7496 = vmatprep.subr.bf16.mxu0 %v9692_v11 }
0x1371   :  { %7525 = vmatpush1.bf16.msra.mxu1 %v9055_v17 }
0x1372   :  { %7527 = vmatprep.subr.bf16.mxu1 %v9059_v49 }
0x1373   :  { %7498 = vmatpush3.bf16.msra.mxu0 %v9259_v9 }
0x1374   :  { %7499 = vmatprep.subr.bf16.mxu0 %v9692_v11 }
0x1375   :  { %7529 = vmatpush1.bf16.msra.mxu1 %v9063_v26 }
0x1376   :  { %7531 = vmatprep.subr.bf16.mxu1 %v9067_v56 }
0x1377   :  { %7501 = vmatpush3.bf16.msra.mxu0 %v9263_v55 }
0x1378   :  { %7502 = vmatprep.subr.bf16.mxu0 %v9692_v11 }
0x1379   :  { %7533 = vmatpush1.bf16.msra.mxu1 %v9071_v52 }
0x137a   :  { %7535 = vmatprep.subr.bf16.mxu1 %v9075_v41 }
0x137b   :  { %7504 = vmatpush3.bf16.msra.mxu0 %v8940_v43 }
0x137c   :  { %7505 = vmatprep.subr.bf16.mxu0 %v9692_v11 }
0x137d   :  { %7537 = vmatpush1.bf16.msra.mxu1 %v9217_v25 }
0x137e   :  { %7539 = vmatprep.subr.bf16.mxu1 %v9220_v27 }
0x137f   :  { %7507 = vmatpush3.bf16.msra.mxu0 %v8944_v39 }
0x1380   :  { %7508 = vmatprep.subr.bf16.mxu0 %v9692_v11 }
0x1381   :  { %7541 = vmatpush1.bf16.msra.mxu1 %v9223_v29 }
0x1382   :  { %7543 = vmatprep.subr.bf16.mxu1 %v9226_v35 }
0x1383   :  { %7510 = vmatpush3.bf16.msra.mxu0 %v8947_v38  ;;  %v3862_v38 = vadd.f32 %v8956_v5, %v9194_v0  ;;  %v9734_v5 = vld [vmem:[#allocation22_spill] sm:$0xff]  ;;  %v9736_v0 = vld [vmem:[#allocation24_spill] sm:$0xff] }
0x1384   :  { %7511 = vmatprep.subr.bf16.mxu0 %v9692_v11 }
0x1385   :  { %7545 = vmatpush1.bf16.msra.mxu1 %v9229_v61 }
0x1386   :  { %7571 = vmatprep.subr.bf16.mxu1 %v9719_v19 }
0x1387   :  { %7513 = vmatpush3.bf16.msra.mxu0 %v8951_v1 }
0x1388   :  { %7546 = vmatprep.subr.bf16.mxu0 %v9692_v11 }
0x1398   :  { %s7811_s15 = spop %7810 }
0x1399   :  { %p3449_p0 = scmp.eq.s32.totalorder %s7811_s15, 1 }
0x139b   :  { %s9239_s1 = scalar_select %p3449_p0, 1, 0 }
0x139d   :  { %s3453_s18 = ssub.s32 1, %s9239_s1  ;;  %s3467_s25 = smul.u32 %s9242_s17, %s9239_s1 }
0x139e   :  { %s3454_s19 = smul.u32 %s3453_s18, %s9242_s17 }
0x139f   :  { %s9382_s27 = sadd.s32 %s3467_s25, %s9237_s16 }
0x13a0   :  { %s3455_s20 = smul.u32 %s7811_s15, %s3454_s19  ;;  %s5168_s22 = sadd.s32 4294967295, %s3454_s19 }
0x13a1   :  { %s9249_s23 = sadd.s32 %s3454_s19, %s2922_s12  ;;  %s9387_s29 = ssub.s32 1, %s9382_s27 }
0x13a2   :  { %s3457_s24 = sadd.s32 %s5168_s22, %s3455_s20  ;;  %s1835_s12 = sadd.s32 1, %s8662_s7 }
0x13a3   :  { %3459 = sst [smem:[#allocation12 + $0x4]] %s3457_s24  ;;  %s2377_s13 = sadd.s32 %s8932_s21, %s1835_s12 }
0x13a4   :  { %s2919_s16 = sadd.s32 %s9102_s6, %s2377_s13 }
0x13a5   :  { %s3461_s18 = sadd.s32 %s9242_s17, %s2919_s16  ;;  %s8079_s17 = smov [#allocation11]  }
0x13a6   :  { %s4003_s24 = sadd.s32 %s9387_s29, %s3461_s18 }
0x143b   :  { %v3773_v40 = vpop.f32.mrb[54].mxu0  ;;  %v3844_v28 = vpop.f32.mrb[40].mxu1 }
0x143c   :  { %v5172_v8 = vmul.f32 -1.442695, %v3773_v40  ;;  %v3775_v15 = vpop.f32.mrb[55].mxu0  ;;  %v6332_v10 = vpop.f32.mrb[41].mxu1 }
0x143d   :  { %v5173_v43 = vmul.f32 -1.442695, %v3775_v15 }
0x143e   :  { %7883 = vpow2.f32 %v5172_v8 }
0x143f   :  { %7885 = vpow2.f32 %v5173_v43 }
0x1448   :  { %v7884_v21 = vpop.eup %7883 }
0x1449   :  { %v3852_v39 = vadd.f32 1.0, %v7884_v21  ;;  %v7886_v19 = vpop.eup %7885 }
0x144a   :  { %v3859_v61 = vadd.f32 1.0, %v7886_v19  ;;  %v9733_v19 = vld [vmem:[#allocation21_spill] sm:$0xff] }
0x144b   :  { %7887 = vrcp.f32 %v3852_v39 }
0x144c   :  { %7889 = vrcp.f32 %v3859_v61 }
0x1455   :  { %v7888_v35 = vpop.eup %7887 }
0x1456   :  { %v3863_v1 = vmul.f32 %v7888_v35, %v3862_v38  ;;  %v7890_v27 = vpop.eup %7889 }
0x1457   :  { %v3866_v40 = vsub.f32 1.0, %v7890_v27  ;;  %v3868_v8 = vmul.f32 %v7890_v27, %v9117_v54  ;;  %v9735_v54 = vld [vmem:[#allocation23_spill] sm:$0xff] }
0x1458   :  { %v3864_v29 = vadd.f32 %v3863_v1, %v3844_v28 }
0x145a   :  { %7891 = vtanh.f32 %v3864_v29  ;;  %v9738_v29 = vld [vmem:[#allocation31_spill] sm:$0xff] }
0x1464   :  { %v7892_v25 = vpop.eup %7891 }
0x1465   :  { %v3867_v10 = vmul.f32 %v7892_v25, %v3866_v40  ;;  %v9737_v25 = vld [vmem:[#allocation34_spill] sm:$0xff] }
0x1467   :  { %v9278_v15 = vadd.f32 %v3868_v8, %v3867_v10 }
0x1469   :  { %6366 = vmatmul.mubr.f32.vlgmr.msra.gmra.mrb[56].mxu0 %v9278_v15  ;;  %4125 = vmatmul.mubr.f32.vlgmr.msra.gmra.mrb[42].mxu1 %v9278_v15 }
0x146a   :  { %7548 = vmatpush3.bf16.msra.mxu0 %v9115_v12  ;;  %7573 = vmatpush1.bf16.msra.mxu1 %v8304_v2 }
0x146b   :  { %7575 = vmatprep.subr.bf16.mxu1 %v8341_v16  ;;  %7549 = vmatprep.subr.bf16.mxu0 %v9692_v11 }
0x146c   :  { %6400 = vmatprep.mubr.msk.f32.mxu0 %vm8077_vm0, %v9693_v58  ;;  %4313 = vmatprep.mubr.f32.mxu1 %v9693_v58 }
0x146e   :  { %7551 = vmatpush3.bf16.msra.mxu0 %v9123_v53  ;;  %7577 = vmatpush1.bf16.msra.mxu1 %v8334_v59 }
0x146f   :  { %7579 = vmatprep.subr.bf16.mxu1 %v8371_v20  ;;  %7552 = vmatprep.subr.bf16.mxu0 %v9692_v11 }
0x1472   :  { %7554 = vmatpush3.bf16.msra.mxu0 %v9132_v60  ;;  %7581 = vmatpush1.bf16.msra.mxu1 %v8364_v24 }
0x1473   :  { %7583 = vmatprep.subr.bf16.mxu1 %v8403_v33  ;;  %7555 = vmatprep.subr.bf16.mxu0 %v9692_v11 }
0x1476   :  { %7557 = vmatpush3.bf16.msra.mxu0 %v9138_v32  ;;  %7585 = vmatpush1.bf16.msra.mxu1 %v8397_v6 }
0x1477   :  { %7587 = vmatprep.subr.bf16.mxu1 %v8426_v30  ;;  %7558 = vmatprep.subr.bf16.mxu0 %v9692_v11 }
0x147a   :  { %7560 = vmatpush3.bf16.msra.mxu0 %v9144_v23  ;;  %7589 = vmatpush1.bf16.msra.mxu1 %v8422_v47 }
0x147b   :  { %7591 = vmatprep.subr.bf16.mxu1 %v8444_v62  ;;  %7561 = vmatprep.subr.bf16.mxu0 %v9692_v11 }
0x147e   :  { %7563 = vmatpush3.bf16.msra.mxu0 %v9150_v22  ;;  %7593 = vmatpush1.bf16.msra.mxu1 %v8440_v51 }
0x147f   :  { %7595 = vmatprep.subr.bf16.mxu1 %v8462_v18  ;;  %7564 = vmatprep.subr.bf16.mxu0 %v9692_v11 }
0x1482   :  { %7566 = vmatpush3.bf16.msra.mxu0 %v9156_v34  ;;  %7597 = vmatpush1.bf16.msra.mxu1 %v8458_v50 }
0x1483   :  { %7599 = vmatprep.subr.bf16.mxu1 %v8479_v7  ;;  %7567 = vmatprep.subr.bf16.mxu0 %v9692_v11 }
0x1486   :  { %7569 = vmatpush3.bf16.msra.mxu0 %v9162_v45  ;;  %7601 = vmatpush1.bf16.msra.mxu1 %v8476_v63 }
0x1487   :  { %7602 = vmatprep.subr.bf16.mxu0 %v9692_v11  ;;  %7626 = vmatprep.subr.bf16.mxu1 %v9692_v11 }
0x1489   :  { %6401 = vmatmul.mubr.f32.vlgmr.msra.gmra.mrb[58].mxu0 %v9278_v15 }
0x148a   :  { %7604 = vmatpush3.bf16.msra.mxu0 %v8293_v42  ;;  %6435 = vmatprep.mubr.msk.f32.mxu0 %vm8077_vm0, %v9693_v58 }
0x148b   :  { %7605 = vmatprep.subr.bf16.mxu0 %v9692_v11 }
0x148e   :  { %7607 = vmatpush3.bf16.msra.mxu0 %v8309_v14 }
0x148f   :  { %7608 = vmatprep.subr.bf16.mxu0 %v9692_v11 }
0x1492   :  { %7610 = vmatpush3.bf16.msra.mxu0 %v8323_v37 }
0x1493   :  { %7611 = vmatprep.subr.bf16.mxu0 %v9692_v11 }
0x1496   :  { %7613 = vmatpush3.bf16.msra.mxu0 %v8339_v13 }
0x1497   :  { %7614 = vmatprep.subr.bf16.mxu0 %v9692_v11 }
0x149a   :  { %7616 = vmatpush3.bf16.msra.mxu0 %v9733_v19 }
0x149b   :  { %7617 = vmatprep.subr.bf16.mxu0 %v9692_v11 }
0x149e   :  { %7619 = vmatpush3.bf16.msra.mxu0 %v9734_v5 }
0x149f   :  { %7620 = vmatprep.subr.bf16.mxu0 %v9692_v11 }
0x14a2   :  { %7622 = vmatpush3.bf16.msra.mxu0 %v9735_v54 }
0x14a3   :  { %7623 = vmatprep.subr.bf16.mxu0 %v9692_v11 }
0x14a6   :  { %7625 = vmatpush3.bf16.msra.mxu0 %v9736_v0 }
0x14a7   :  { %7651 = vmatprep.subr.bf16.mxu0 %v9737_v25 }
0x153c   :  { %v3952_v27 = vpop.f32.mrb[56].mxu0 }
0x153d   :  { %v9337_v35 = vadd.f32 %v9738_v29, %v3952_v27  ;;  %v6367_v61 = vpop.f32.mrb[57].mxu0 }
0x153f   :  { %v3956_v28 = vsel %vm1245_vm2, %v9337_v35, -inf }
0x1540   :  { %3957 = vmax.xlane.f32.xlu1 %v3956_v28 }
0x155c   :  { %v9341_v43 = vpop.f32.mrb[58].mxu0 }
0x155d   :  { %v6402_v21 = vpop.f32.mrb[59].mxu0 }
0x15cd   :  { %v9343_v39 = vpop.xlane.xlu1 %3957 }
0x15ce   :  { %vm3959_vm4 = vcmp.eq.f32.partialorder %v9337_v35, %v9343_v39 }
0x15cf   :  { %v3960_v38 = vsel %vm3959_vm4, %v8395_v36, 128 }
0x15d0   :  { %v3961_v1 = vsel %vm1245_vm2, %v3960_v38, 2147483647  ;;  %v4424_v38 = vld [vmem:[#allocation4 + $0x5a0] sm:$0xff] }
0x15d1   :  { %v3963_v40 = vshra.s32 %v3961_v1, 16  ;;  %v3962_v8 = vand.u32 65535, %v3961_v1  ;;  %v4425_v1 = vld [vmem:[#allocation4 + $0x5b8] sm:$0xff] }
0x15d3   :  { %v3965_v10 = vcvt.s32.f32 %v3963_v40  ;;  %v3964_v27 = vcvt.s32.f32 %v3962_v8  ;;  %v9404_v40 = vpack.c.bf16 %v4425_v1, %v4424_v38  ;;  %v4427_v8 = vld [vmem:[#allocation4 + $0x5e8] sm:$0xff] }
0x15d5   :  { %3966 = vmin.xlane.f32.xlu0 %v3965_v10 }
0x1662   :  { %v3967_v25 = vpop.xlane.xlu0 %3966 }
0x1663   :  { %vm3968_vm5 = vcmp.eq.f32.partialorder %v3965_v10, %v3967_v25  ;;  %v3973_v61 = vcvt.f32.s32 %v3967_v25  ;;  %v4426_v10 = vld [vmem:[#allocation4 + $0x5d0] sm:$0xff] }
0x1664   :  { %v3969_v29 = vsel %vm3968_vm5, %v3964_v27, inf  ;;  %v9408_v25 = vpack.c.bf16 %v4427_v8, %v4426_v10 }
0x1665   :  { %3970 = vmin.xlane.f32.xlu1 %v3969_v29  ;;  %v3974_v21 = vshll.u32 %v3973_v61, 16 }
0x16f2   :  { %v3971_v28 = vpop.xlane.xlu1 %3970 }
0x16f3   :  { %v3972_v0 = vcvt.f32.s32 %v3971_v28 }
0x16f5   :  { %v3975_v54 = vadd.s32 %v3974_v21, %v3972_v0 }
0x16f7   :  { %vm3976_vm6 = vcmp.eq.s32.totalorder %v8395_v36, %v3975_v54  ;;  %7812 = vpush %v3975_v54  ;;  %v4423_v54 = vld [vmem:[#allocation4 + $0x588] sm:$0xff] }
0x16f8   :  { %5177 = vmatmul.mubr.msk.f32.vlgmr.msra.gmra.mrb[42].mxu1 %vm3976_vm6, %v9698_v48  ;;  %6436 = vmatmul.mubr.msk.f32.vlgmr.msra.gmra.mrb[60].mxu0 %vm3976_vm6, %v9698_v48 }
0x16f9   :  { %7653 = vmatpush1.bf16.msra.mxu0 %v9036_v4  ;;  %7628 = vmatpush3.bf16.msra.mxu1 %v9251_v46  ;;  %v9739_v4 = vld [vmem:[#allocation37_spill] sm:$0xff] }
0x16fa   :  { %7655 = vmatprep.subr.bf16.mxu0 %v9038_v3  ;;  %7629 = vmatprep.subr.bf16.mxu1 %v9692_v11  ;;  %v9740_v3 = vld [vmem:[#allocation38_spill] sm:$0xff] }
0x16fb   :  { %6470 = vmatprep.mubr.msk.f32.mxu1 %vm8077_vm0, %v9693_v58  ;;  %4666 = vmatprep.mubr.f32.mxu0 %v9693_v58 }
0x16fd   :  { %7657 = vmatpush1.bf16.msra.mxu0 %v9044_v57  ;;  %7631 = vmatpush3.bf16.msra.mxu1 %v9255_v31  ;;  %v9741_v57 = vld [vmem:[#allocation39_spill] sm:$0xff] }
0x16fe   :  { %7659 = vmatprep.subr.bf16.mxu0 %v9048_v44  ;;  %7632 = vmatprep.subr.bf16.mxu1 %v9692_v11  ;;  %v9742_v44 = vld [vmem:[#allocation40_spill] sm:$0xff] }
0x1701   :  { %7661 = vmatpush1.bf16.msra.mxu0 %v9055_v17  ;;  %7634 = vmatpush3.bf16.msra.mxu1 %v9259_v9  ;;  %v9743_v17 = vld [vmem:[#allocation41_spill] sm:$0xff] }
0x1702   :  { %7663 = vmatprep.subr.bf16.mxu0 %v9059_v49  ;;  %7635 = vmatprep.subr.bf16.mxu1 %v9692_v11  ;;  %v9744_v49 = vld [vmem:[#allocation20_spill] sm:$0xff] }
0x1705   :  { %7665 = vmatpush1.bf16.msra.mxu0 %v9063_v26  ;;  %7637 = vmatpush3.bf16.msra.mxu1 %v9263_v55  ;;  %v4420_v26 = vld [vmem:[#allocation4 + $0x540] sm:$0xff] }
0x1706   :  { %7667 = vmatprep.subr.bf16.mxu0 %v9067_v56  ;;  %7638 = vmatprep.subr.bf16.mxu1 %v9692_v11  ;;  %v4421_v56 = vld [vmem:[#allocation4 + $0x558] sm:$0xff] }
0x1709   :  { %7669 = vmatpush1.bf16.msra.mxu0 %v9071_v52  ;;  %v9397_v52 = vpack.c.bf16 %v4421_v56, %v4420_v26 }
0x170a   :  { %7671 = vmatprep.subr.bf16.mxu0 %v9075_v41  ;;  %v4422_v41 = vld [vmem:[#allocation4 + $0x570] sm:$0xff] }
0x170b   :  { %7640 = vmatpush3.bf16.msra.mxu1 %v9397_v52  ;;  %v9401_v0 = vpack.c.bf16 %v4423_v54, %v4422_v41 }
0x170c   :  { %7641 = vmatprep.subr.bf16.mxu1 %v9692_v11 }
0x170d   :  { %7673 = vmatpush1.bf16.msra.mxu0 %v9739_v4 }
0x170e   :  { %7675 = vmatprep.subr.bf16.mxu0 %v9740_v3 }
0x170f   :  { %7643 = vmatpush3.bf16.msra.mxu1 %v9401_v0 }
0x1710   :  { %7644 = vmatprep.subr.bf16.mxu1 %v9692_v11 }
0x1711   :  { %7677 = vmatpush1.bf16.msra.mxu0 %v9741_v57 }
0x1712   :  { %7679 = vmatprep.subr.bf16.mxu0 %v9742_v44 }
0x1713   :  { %7646 = vmatpush3.bf16.msra.mxu1 %v9404_v40 }
0x1714   :  { %7647 = vmatprep.subr.bf16.mxu1 %v9692_v11 }
0x1715   :  { %7681 = vmatpush1.bf16.msra.mxu0 %v9743_v17 }
0x1716   :  { %7707 = vmatprep.subr.bf16.mxu0 %v9744_v49  ;;  %v9413_v49 = vld [vmem:[#allocation10 + $0x18] ss:$0 sm:$0xff] }
0x1717   :  { %7649 = vmatpush3.bf16.msra.mxu1 %v9408_v25  ;;  %v4404_v26 = vadd.f32 %v9413_v49, %v9341_v43 }
0x1718   :  { %7682 = vmatprep.subr.bf16.mxu1 %v9692_v11 }
0x1728   :  { %s7813_s26 = spop %7812 }
0x1729   :  { %p3991_p1 = scmp.eq.s32.totalorder %s7813_s26, 1 }
0x172b   :  { %s9384_s28 = scalar_select %p3991_p1, 1, 0 }
0x172d   :  { %s3995_s0 = ssub.s32 1, %s9384_s28  ;;  %s4009_s11 = smul.u32 %s9387_s29, %s9384_s28 }
0x172e   :  { %s9391_s30 = smul.u32 %s3995_s0, %s9387_s29 }
0x172f   :  { %s4010_s15 = sadd.s32 %s4009_s11, %s9382_s27 }
0x1730   :  { %s3997_s2 = smul.u32 %s7813_s26, %s9391_s30  ;;  %s5175_s8 = sadd.s32 4294967295, %s9391_s30 }
0x1731   :  { %s4006_s9 = sadd.s32 %s9391_s30, %s9249_s23  ;;  %s4536_s19 = ssub.s32 1, %s4010_s15 }
0x1732   :  { %s3999_s10 = sadd.s32 %s5175_s8, %s3997_s2  ;;  %s4545_s26 = sadd.s32 %s4536_s19, %s4003_s24 }
0x1733   :  { %4001 = sst [smem:[#allocation12 + $0x5]] %s3999_s10  ;;  %s5099_s23 = sshll.u32 %s8079_s17, 4  ;;  %s5100_s23 = int_to_ptr.vmem [resolvable:$true] %s5099_s23 }
0x1734   :  { %s8016_s29 = scalar_lea.vmem %s5100_s23, 128  ;;  %p8021_p4 = scmp.lt.s32.totalorder %s5100_s23, %s5100_s23 }
0x1735   :  { %p8017_p3 = scmp.ne.s32.totalorder %s5100_s23, %s8016_s29  ;;  %p8022_p5 = scmp.lt.s32.totalorder %s8016_s29, %s8016_s29 }
0x1737   :  { %p8023_p6 = por %p8022_p5, %p8021_p4 }
0x1739   :  { %p8024_p7 = pnand %p8023_p6, %p8017_p3 }
0x17cb   :  { %v4315_v27 = vpop.f32.mrb[42].mxu1  ;;  %v4386_v29 = vpop.f32.mrb[60].mxu0 }
0x17cc   :  { %v5179_v61 = vmul.f32 -1.442695, %v4315_v27  ;;  %v4317_v28 = vpop.f32.mrb[43].mxu1  ;;  %v6437_v21 = vpop.f32.mrb[61].mxu0 }
0x17cd   :  { %v5180_v4 = vmul.f32 -1.442695, %v4317_v28 }
0x17ce   :  { %7893 = vpow2.f32 %v5179_v61 }
0x17cf   :  { %7895 = vpow2.f32 %v5180_v4 }
0x17d8   :  { %v7894_v3 = vpop.eup %7893 }
0x17d9   :  { %v4394_v57 = vadd.f32 1.0, %v7894_v3  ;;  %v7896_v44 = vpop.eup %7895 }
0x17da   :  { %v4401_v17 = vadd.f32 1.0, %v7896_v44  ;;  %v9748_v44 = vld [vmem:[#allocation26_spill] sm:$0xff] }
0x17db   :  { %7897 = vrcp.f32 %v4394_v57  ;;  %v9747_v57 = vld [vmem:[#allocation27_spill] sm:$0xff] }
0x17dc   :  { %7899 = vrcp.f32 %v4401_v17  ;;  %v1269_v17 = vsub.f32 %v9748_v44, %v9747_v57 }
0x17e5   :  { %v7898_v56 = vpop.eup %7897 }
0x17e6   :  { %v4405_v41 = vmul.f32 %v7898_v56, %v4404_v26  ;;  %v7900_v38 = vpop.eup %7899  ;;  %v9749_v26 = vld [vmem:[#allocation25_spill] sm:$0xff]  ;;  %v9750_v56 = vld [vmem:[#allocation28_spill] sm:$0xff] }
0x17e7   :  { %v4408_v1 = vsub.f32 1.0, %v7900_v38  ;;  %v4410_v27 = vmul.f32 %v7900_v38, %v9278_v15  ;;  %v9751_v38 = vld [vmem:[#allocation36_spill] sm:$0xff] }
0x17e8   :  { %v4406_v54 = vadd.f32 %v4405_v41, %v4386_v29  ;;  %v2353_v41 = vsub.f32 %v9750_v56, %v9749_v26 }
0x17ea   :  { %7901 = vtanh.f32 %v4406_v54  ;;  %v2354_v54 = vmul.f32 1.442695, %v2353_v41 }
0x17f4   :  { %v7902_v10 = vpop.eup %7901 }
0x17f5   :  { %v4409_v8 = vmul.f32 %v7902_v10, %v4408_v1  ;;  %v9752_v1 = vld [vmem:[#allocation35_spill] sm:$0xff] }
0x17f6   :  { %v3437_v10 = vsub.f32 %v9752_v1, %v9751_v38 }
0x17f7   :  { %v9418_v61 = vadd.f32 %v4410_v27, %v4409_v8 }
0x17f8   :  { %v3438_v27 = vmul.f32 1.442695, %v3437_v10 }
0x17f9   :  { %6471 = vmatmul.mubr.f32.vlgmr.msra.gmra.mrb[44].mxu1 %v9418_v61  ;;  %4667 = vmatmul.mubr.f32.vlgmr.msra.gmra.mrb[62].mxu0 %v9418_v61 }
0x17fa   :  { %7684 = vmatpush3.bf16.msra.mxu1 %v9115_v12  ;;  %7709 = vmatpush1.bf16.msra.mxu0 %v8304_v2  ;;  %v9746_v2 = vld [vmem:[#allocation24_spill] sm:$0xff] }
0x17fb   :  { %7711 = vmatprep.subr.bf16.mxu0 %v8341_v16  ;;  %7685 = vmatprep.subr.bf16.mxu1 %v9692_v11 }
0x17fc   :  { %6505 = vmatprep.mubr.msk.f32.mxu1 %vm8077_vm0, %v9693_v58  ;;  %4855 = vmatprep.mubr.f32.mxu0 %v9693_v58 }
0x17fe   :  { %7687 = vmatpush3.bf16.msra.mxu1 %v9123_v53  ;;  %7713 = vmatpush1.bf16.msra.mxu0 %v8334_v59 }
0x17ff   :  { %7715 = vmatprep.subr.bf16.mxu0 %v8371_v20  ;;  %7688 = vmatprep.subr.bf16.mxu1 %v9692_v11 }
0x1802   :  { %7690 = vmatpush3.bf16.msra.mxu1 %v9132_v60  ;;  %7717 = vmatpush1.bf16.msra.mxu0 %v8364_v24 }
0x1803   :  { %7719 = vmatprep.subr.bf16.mxu0 %v8403_v33  ;;  %7691 = vmatprep.subr.bf16.mxu1 %v9692_v11 }
0x1806   :  { %7693 = vmatpush3.bf16.msra.mxu1 %v9138_v32  ;;  %7721 = vmatpush1.bf16.msra.mxu0 %v8397_v6 }
0x1807   :  { %7723 = vmatprep.subr.bf16.mxu0 %v8426_v30  ;;  %7694 = vmatprep.subr.bf16.mxu1 %v9692_v11 }
0x180a   :  { %7696 = vmatpush3.bf16.msra.mxu1 %v9144_v23  ;;  %7725 = vmatpush1.bf16.msra.mxu0 %v8422_v47 }
0x180b   :  { %7727 = vmatprep.subr.bf16.mxu0 %v8444_v62  ;;  %7697 = vmatprep.subr.bf16.mxu1 %v9692_v11 }
0x180e   :  { %7699 = vmatpush3.bf16.msra.mxu1 %v9150_v22  ;;  %7729 = vmatpush1.bf16.msra.mxu0 %v8440_v51 }
0x180f   :  { %7731 = vmatprep.subr.bf16.mxu0 %v8462_v18  ;;  %7700 = vmatprep.subr.bf16.mxu1 %v9692_v11 }
0x1812   :  { %7702 = vmatpush3.bf16.msra.mxu1 %v9156_v34  ;;  %7733 = vmatpush1.bf16.msra.mxu0 %v8458_v50 }
0x1813   :  { %7735 = vmatprep.subr.bf16.mxu0 %v8479_v7  ;;  %7703 = vmatprep.subr.bf16.mxu1 %v9692_v11 }
0x1816   :  { %7705 = vmatpush3.bf16.msra.mxu1 %v9162_v45  ;;  %7737 = vmatpush1.bf16.msra.mxu0 %v8476_v63 }
0x1817   :  { %7738 = vmatprep.subr.bf16.mxu1 %v9692_v11  ;;  %7762 = vmatprep.subr.bf16.mxu0 %v9692_v11 }
0x1819   :  { %6506 = vmatmul.mubr.f32.vlgmr.msra.gmra.mrb[46].mxu1 %v9418_v61 }
0x181a   :  { %7740 = vmatpush3.bf16.msra.mxu1 %v8293_v42  ;;  %6540 = vmatprep.mubr.msk.f32.mxu1 %vm8077_vm0, %v9693_v58  ;;  %v9745_v42 = vld [vmem:[#allocation23_spill] sm:$0xff] }
0x181b   :  { %7741 = vmatprep.subr.bf16.mxu1 %v9692_v11 }
0x181e   :  { %7743 = vmatpush3.bf16.msra.mxu1 %v8309_v14 }
0x181f   :  { %7744 = vmatprep.subr.bf16.mxu1 %v9692_v11 }
0x1822   :  { %7746 = vmatpush3.bf16.msra.mxu1 %v8323_v37  ;;  %v9475_v37 = vld [vmem:[#allocation10 + $0x30] ss:$0 sm:$0xff] }
0x1823   :  { %7747 = vmatprep.subr.bf16.mxu1 %v9692_v11 }
0x1826   :  { %7749 = vmatpush3.bf16.msra.mxu1 %v8339_v13 }
0x1827   :  { %7750 = vmatprep.subr.bf16.mxu1 %v9692_v11 }
0x182a   :  { %7752 = vmatpush3.bf16.msra.mxu1 %v9733_v19 }
0x182b   :  { %7753 = vmatprep.subr.bf16.mxu1 %v9692_v11 }
0x182e   :  { %7755 = vmatpush3.bf16.msra.mxu1 %v9734_v5 }
0x182f   :  { %7756 = vmatprep.subr.bf16.mxu1 %v9692_v11 }
0x1832   :  { %7758 = vmatpush3.bf16.msra.mxu1 %v9745_v42 }
0x1833   :  { %7759 = vmatprep.subr.bf16.mxu1 %v9692_v11 }
0x1836   :  { %7761 = vmatpush3.bf16.msra.mxu1 %v9746_v2 }
0x18cc   :  { %v4494_v14 = vpop.f32.mrb[44].mxu1 }
0x18cd   :  { %v9478_v59 = vadd.f32 %v9475_v37, %v4494_v14  ;;  %v6472_v13 = vpop.f32.mrb[45].mxu1 }
0x18cf   :  { %v4498_v16 = vsel %vm1245_vm2, %v9478_v59, -inf }
0x18d0   :  { %4499 = vmax.xlane.f32.xlu0 %v4498_v16 }
0x18ec   :  { %v9482_v24 = vpop.f32.mrb[46].mxu1 }
0x18ed   :  { %v6507_v20 = vpop.f32.mrb[47].mxu1 }
0x195d   :  { %v9484_v6 = vpop.xlane.xlu0 %4499 }
0x195e   :  { %vm4501_vm7 = vcmp.eq.f32.partialorder %v9478_v59, %v9484_v6 }
0x195f   :  { %v4502_v33 = vsel %vm4501_vm7, %v8395_v36, 128 }
0x1960   :  { %v4503_v47 = vsel %vm1245_vm2, %v4502_v33, 2147483647 }
0x1961   :  { %v4505_v30 = vshra.s32 %v4503_v47, 16  ;;  %v4504_v62 = vand.u32 65535, %v4503_v47 }
0x1963   :  { %v4507_v51 = vcvt.s32.f32 %v4505_v30  ;;  %v4506_v18 = vcvt.s32.f32 %v4504_v62  ;;  %v9753_v62 = vld [vmem:[#allocation30_spill] sm:$0xff] }
0x1965   :  { %4508 = vmin.xlane.f32.xlu1 %v4507_v51 }
0x19f2   :  { %v4509_v50 = vpop.xlane.xlu1 %4508 }
0x19f3   :  { %vm4510_vm8 = vcmp.eq.f32.partialorder %v4507_v51, %v4509_v50  ;;  %v4515_v7 = vcvt.f32.s32 %v4509_v50  ;;  %v9754_v50 = vld [vmem:[#allocation29_spill] sm:$0xff] }
0x19f4   :  { %v4511_v63 = vsel %vm4510_vm8, %v4506_v18, inf  ;;  %v1811_v18 = vsub.f32 %v9754_v50, %v9753_v62 }
0x19f5   :  { %4512 = vmin.xlane.f32.xlu0 %v4511_v63  ;;  %v4516_v53 = vshll.u32 %v4515_v7, 16  ;;  %v9755_v7 = vld [vmem:[#allocation33_spill] sm:$0xff] }
0x19f6   :  { %v1812_v63 = vmul.f32 1.442695, %v1811_v18 }
0x1a82   :  { %v4513_v12 = vpop.xlane.xlu0 %4512 }
0x1a83   :  { %v4514_v60 = vcvt.f32.s32 %v4513_v12  ;;  %v9756_v12 = vld [vmem:[#allocation32_spill] sm:$0xff] }
0x1a85   :  { %v4517_v32 = vadd.s32 %v4516_v53, %v4514_v60  ;;  %v2895_v53 = vsub.f32 %v9756_v12, %v9755_v7 }
0x1a87   :  { %vm4518_vm9 = vcmp.eq.s32.totalorder %v8395_v36, %v4517_v32  ;;  %7814 = vpush %v4517_v32  ;;  %v2896_v60 = vmul.f32 1.442695, %v2895_v53  ;;  %v3979_v32 = vsub.f32 %v9337_v35, %v9343_v39 }
0x1a88   :  { %5184 = vmatmul.mubr.msk.f32.vlgmr.msra.gmra.mrb[62].mxu0 %vm4518_vm9, %v9698_v48  ;;  %6541 = vmatmul.mubr.msk.f32.vlgmr.msra.gmra.mrb[48].mxu1 %vm4518_vm9, %v9698_v48 }
0x1a89   :  { %7764 = vmatpush3.bf16.msra.mxu0 %v9251_v46  ;;  %6575 = vmatprep.mubr.msk.f32.mxu0 %vm8077_vm0, %v9693_v58 }
0x1a8a   :  { %7765 = vmatprep.subr.bf16.mxu0 %v9692_v11 }
0x1a8d   :  { %7767 = vmatpush3.bf16.msra.mxu0 %v9255_v31  ;;  %v4946_v31 = vadd.f32 %v9413_v49, %v9482_v24  ;;  %v1270_v49 = vmul.f32 1.442695, %v1269_v17 }
0x1a8e   :  { %7768 = vmatprep.subr.bf16.mxu0 %v9692_v11 }
0x1a91   :  { %7770 = vmatpush3.bf16.msra.mxu0 %v9259_v9 }
0x1a92   :  { %7771 = vmatprep.subr.bf16.mxu0 %v9692_v11 }
0x1a95   :  { %7773 = vmatpush3.bf16.msra.mxu0 %v9263_v55 }
0x1a96   :  { %7774 = vmatprep.subr.bf16.mxu0 %v9692_v11 }
0x1a99   :  { %7776 = vmatpush3.bf16.msra.mxu0 %v9397_v52 }
0x1a9a   :  { %7777 = vmatprep.subr.bf16.mxu0 %v9692_v11 }
0x1a9d   :  { %7779 = vmatpush3.bf16.msra.mxu0 %v9401_v0 }
0x1a9e   :  { %7780 = vmatprep.subr.bf16.mxu0 %v9692_v11 }
0x1aa1   :  { %7782 = vmatpush3.bf16.msra.mxu0 %v9404_v40 }
0x1aa2   :  { %7783 = vmatprep.subr.bf16.mxu0 %v9692_v11 }
0x1aa5   :  { %7785 = vmatpush3.bf16.msra.mxu0 %v9408_v25 }
0x1ab8   :  { %s7815_s14 = spop %7814 }
0x1ab9   :  { %p4533_p2 = scmp.eq.s32.totalorder %s7815_s14, 1 }
0x1abb   :  { %s4534_s1 = scalar_select %p4533_p2, 1, 0 }
0x1abd   :  { %s4537_s20 = ssub.s32 1, %s4534_s1  ;;  %s4551_s22 = smul.u32 %s4536_s19, %s4534_s1 }
0x1abe   :  { %s4538_s25 = smul.u32 %s4537_s20, %s4536_s19 }
0x1abf   :  { %s9518_s0 = sadd.s32 %s4551_s22, %s4010_s15 }
0x1ac0   :  { %s4539_s7 = smul.u32 %s7815_s14, %s4538_s25  ;;  %s5182_s21 = sadd.s32 4294967295, %s4538_s25 }
0x1ac1   :  { %s9523_s28 = sadd.s32 %s4538_s25, %s4006_s9  ;;  %s5075_s27 = ssub.s32 1, %s9518_s0 }
0x1ac2   :  { %s4541_s2 = sadd.s32 %s5182_s21, %s4539_s7  ;;  %s5084_s6 = sadd.s32 %s5075_s27, %s4545_s26 }
0x1ac3   :  { %4543 = sst [smem:[#allocation12 + $0x6]] %s4541_s2 }
0x1ac4   :  { %5085 = sst [smem:[#allocation13]] %s5084_s6 }
0x1b5b   :  { %v4857_v11 = vpop.f32.mrb[62].mxu0  ;;  %v4928_v58 = vpop.f32.mrb[48].mxu1 }
0x1b5c   :  { %v5186_v48 = vmul.f32 -1.442695, %v4857_v11  ;;  %v4859_v23 = vpop.f32.mrb[63].mxu0  ;;  %v6542_v22 = vpop.f32.mrb[49].mxu1 }
0x1b5d   :  { %v5187_v34 = vmul.f32 -1.442695, %v4859_v23 }
0x1b5e   :  { %7903 = vpow2.f32 %v5186_v48  ;;  %v3980_v48 = vmul.f32 1.442695, %v3979_v32 }
0x1b5f   :  { %7905 = vpow2.f32 %v5187_v34 }
0x1b68   :  { %v7904_v45 = vpop.eup %7903 }
0x1b69   :  { %v4936_v9 = vadd.f32 1.0, %v7904_v45  ;;  %v7906_v55 = vpop.eup %7905 }
0x1b6a   :  { %v4943_v46 = vadd.f32 1.0, %v7906_v55 }
0x1b6b   :  { %7907 = vrcp.f32 %v4936_v9 }
0x1b6c   :  { %7909 = vrcp.f32 %v4943_v46 }
0x1b75   :  { %v7908_v15 = vpop.eup %7907 }
0x1b76   :  { %v4947_v19 = vmul.f32 %v7908_v15, %v4946_v31  ;;  %v7910_v43 = vpop.eup %7909 }
0x1b77   :  { %v4950_v52 = vsub.f32 1.0, %v7910_v43  ;;  %v4952_v25 = vmul.f32 %v7910_v43, %v9418_v61  ;;  %v4521_v61 = vsub.f32 %v9478_v59, %v9484_v6 }
0x1b78   :  { %v4948_v5 = vadd.f32 %v4947_v19, %v4928_v58 }
0x1b7a   :  { %7911 = vtanh.f32 %v4948_v5 }
0x1b7b   :  { %7913 = vpow2.f32 %v1270_v49 }
0x1b7c   :  { %7915 = vpow2.f32 %v2354_v54 }
0x1b7d   :  { %7917 = vpow2.f32 %v3438_v27 }
0x1b84   :  { %v7912_v0 = vpop.eup %7911 }
0x1b85   :  { %v4951_v40 = vmul.f32 %v7912_v0, %v4950_v52  ;;  %v7914_v16 = vpop.eup %7913 }
0x1b86   :  { %v1272_v24 = vsel %vm1245_vm2, %v7914_v16, 0.0  ;;  %v7916_v20 = vpop.eup %7915 }
0x1b87   :  { %v4953_v29 = vadd.f32 %v4952_v25, %v4951_v40  ;;  %v2356_v33 = vsel %vm1245_vm2, %v7916_v20, 0.0  ;;  %v7918_v47 = vpop.eup %7917 }
0x1b88   :  { %v3440_v30 = vsel %vm1245_vm2, %v7918_v47, 0.0 }
0x1b89   :  { %6576 = vmatmul.mubr.f32.vlgmr.msra.gmra.mrb[64].mxu0 %v4953_v29 }
0x1c5c   :  { %v5036_v28 = vpop.f32.mrb[64].mxu0 }
0x1c5d   :  { %v9532_v21 = vadd.f32 %v9475_v37, %v5036_v28  ;;  %v6577_v4 = vpop.f32.mrb[65].mxu0  ;;  %v4522_v37 = vmul.f32 1.442695, %v4521_v61 }
0x1c5f   :  { %v5040_v3 = vsel %vm1245_vm2, %v9532_v21, -inf  ;;  %7919 = vpow2.f32 %v4522_v37 }
0x1c60   :  { %5041 = vmax.xlane.f32.xlu1 %v5040_v3  ;;  %7921 = vpow2.f32 %v1812_v63 }
0x1c61   :  { %7923 = vpow2.f32 %v2896_v60 }
0x1c62   :  { %7925 = vpow2.f32 %v3980_v48 }
0x1ced   :  { %v9542_v8 = vpop.xlane.xlu1 %5041 }
0x1cee   :  { %vm5043_vm0 = vcmp.eq.f32.partialorder %v9532_v21, %v9542_v8  ;;  %v5060_v11 = vsub.f32 %v9532_v21, %v9542_v8 }
0x1cef   :  { %v5044_v42 = vsel %vm5043_vm0, %v8395_v36, 128  ;;  %v7920_v36 = vpop.eup %7919 }
0x1cf0   :  { %v5045_v2 = vsel %vm1245_vm2, %v5044_v42, 2147483647  ;;  %v4524_v51 = vsel %vm1245_vm2, %v7920_v36, 0.0  ;;  %v5061_v23 = vmul.f32 1.442695, %v5060_v11  ;;  %v7922_v9 = vpop.eup %7921 }
0x1cf1   :  { %v5047_v14 = vshra.s32 %v5045_v2, 16  ;;  %v5046_v58 = vand.u32 65535, %v5045_v2  ;;  %v1814_v46 = vsel %vm1245_vm2, %v7922_v9, 0.0  ;;  %v7924_v31 = vpop.eup %7923 }
0x1cf2   :  { %7927 = vpow2.f32 %v5061_v23  ;;  %v2898_v19 = vsel %vm1245_vm2, %v7924_v31, 0.0  ;;  %v7926_v5 = vpop.eup %7925 }
0x1cf3   :  { %v5049_v13 = vcvt.s32.f32 %v5047_v14  ;;  %v5048_v34 = vcvt.s32.f32 %v5046_v58  ;;  %v3982_v0 = vsel %vm1245_vm2, %v7926_v5, 0.0 }
0x1cf5   :  { %5050 = vmin.xlane.f32.xlu0 %v5049_v13 }
0x1cf9   :  { %1273 = vadd.xlane.f32.xlu0 %v1272_v24 }
0x1cfc   :  { %v7928_v52 = vpop.eup %7927 }
0x1cfd   :  { %2357 = vadd.xlane.f32.xlu0 %v2356_v33  ;;  %v5063_v4 = vsel %vm1245_vm2, %v7928_v52, 0.0 }
0x1d01   :  { %3441 = vadd.xlane.f32.xlu0 %v3440_v30 }
0x1d05   :  { %4525 = vadd.xlane.f32.xlu0 %v4524_v51 }
0x1d82   :  { %v5051_v22 = vpop.xlane.xlu0 %5050 }
0x1d83   :  { %vm5052_vm10 = vcmp.eq.f32.partialorder %v5049_v13, %v5051_v22  ;;  %v5057_v37 = vcvt.f32.s32 %v5051_v22 }
0x1d84   :  { %v5053_v45 = vsel %vm5052_vm10, %v5048_v34, inf }
0x1d85   :  { %5054 = vmin.xlane.f32.xlu1 %v5053_v45 }
0x1d86   :  { %v1274_v55 = vpop.xlane.xlu0 %1273 }
0x1d87   :  { %7929 = vlog2.f32 %v1274_v55 }
0x1d89   :  { %1815 = vadd.xlane.f32.xlu1 %v1814_v46 }
0x1d8a   :  { %v2358_v15 = vpop.xlane.xlu0 %2357 }
0x1d8b   :  { %7931 = vlog2.f32 %v2358_v15 }
0x1d8d   :  { %2899 = vadd.xlane.f32.xlu1 %v2898_v19 }
0x1d8e   :  { %v3442_v43 = vpop.xlane.xlu0 %3441 }
0x1d8f   :  { %7933 = vlog2.f32 %v3442_v43 }
0x1d91   :  { %v7930_v40 = vpop.eup %7929  ;;  %3983 = vadd.xlane.f32.xlu1 %v3982_v0 }
0x1d92   :  { %v1276_v25 = vmul.f32 0.6931472, %v7930_v40  ;;  %v4526_v29 = vpop.xlane.xlu0 %4525 }
0x1d93   :  { %7935 = vlog2.f32 %v4526_v29 }
0x1d94   :  { %v1277_v28 = vadd.f32 %v1276_v25, %v9747_v57 }
0x1d95   :  { %v7932_v3 = vpop.eup %7931  ;;  %5064 = vadd.xlane.f32.xlu1 %v5063_v4 }
0x1d96   :  { %v1278_v17 = vsub.f32 %v9748_v44, %v1277_v28  ;;  %v2360_v49 = vmul.f32 0.6931472, %v7932_v3 }
0x1d98   :  { %1279 = vst [vmem:[#allocation11] sm:$0x1] %v1278_v17  ;;  %v2361_v41 = vadd.f32 %v2360_v49, %v9749_v26  ;;  %v5058_v26 = vshll.u32 %v5057_v37, 16 }
0x1d99   :  { %v7934_v54 = vpop.eup %7933 }
0x1d9a   :  { %v2362_v10 = vsub.f32 %v9750_v56, %v2361_v41  ;;  %v3444_v27 = vmul.f32 0.6931472, %v7934_v54 }
0x1d9c   :  { %2363 = vst [vmem:[#allocation11 + $0x2] sm:$0x1] %v2362_v10  ;;  %v3445_v61 = vadd.f32 %v3444_v27, %v9751_v38 }
0x1d9d   :  { %v7936_v42 = vpop.eup %7935 }
0x1d9e   :  { %v3446_v57 = vsub.f32 %v9752_v1, %v3445_v61  ;;  %v4528_v2 = vmul.f32 0.6931472, %v7936_v42 }
0x1da0   :  { %3447 = vst [vmem:[#allocation11 + $0x4] sm:$0x1] %v3446_v57  ;;  %v4529_v14 = vadd.f32 %v4528_v2, %v9484_v6 }
0x1da2   :  { %v4530_v44 = vsub.f32 %v9478_v59, %v4529_v14 }
0x1da4   :  { %4531 = vst [vmem:[#allocation11 + $0x6] sm:$0x1] %v4530_v44 }
0x1e12   :  { %v5055_v13 = vpop.xlane.xlu1 %5054 }
0x1e13   :  { %v5056_v16 = vcvt.f32.s32 %v5055_v13 }
0x1e15   :  { %v5059_v24 = vadd.s32 %v5058_v26, %v5056_v16 }
0x1e16   :  { %v1816_v56 = vpop.xlane.xlu1 %1815 }
0x1e17   :  { %7937 = vlog2.f32 %v1816_v56  ;;  %7816 = vpush %v5059_v24 }
0x1e1a   :  { %v2900_v20 = vpop.xlane.xlu1 %2899 }
0x1e1b   :  { %7939 = vlog2.f32 %v2900_v20 }
0x1e1e   :  { %v3984_v38 = vpop.xlane.xlu1 %3983 }
0x1e1f   :  { %7941 = vlog2.f32 %v3984_v38 }
0x1e21   :  { %v7938_v1 = vpop.eup %7937 }
0x1e22   :  { %v1818_v33 = vmul.f32 0.6931472, %v7938_v1  ;;  %v5065_v47 = vpop.xlane.xlu1 %5064 }
0x1e23   :  { %7943 = vlog2.f32 %v5065_v47 }
0x1e24   :  { %v1819_v6 = vadd.f32 %v1818_v33, %v9753_v62 }
0x1e25   :  { %v7940_v59 = vpop.eup %7939 }
0x1e26   :  { %v1820_v30 = vsub.f32 %v9754_v50, %v1819_v6  ;;  %v2902_v36 = vmul.f32 0.6931472, %v7940_v59 }
0x1e28   :  { %1821 = vst [vmem:[#allocation11 + $0x1] sm:$0x1] %v1820_v30  ;;  %v2903_v51 = vadd.f32 %v2902_v36, %v9755_v7 }
0x1e29   :  { %v7942_v18 = vpop.eup %7941 }
0x1e2a   :  { %v2904_v63 = vsub.f32 %v9756_v12, %v2903_v51  ;;  %v3986_v53 = vmul.f32 0.6931472, %v7942_v18 }
0x1e2c   :  { %2905 = vst [vmem:[#allocation11 + $0x3] sm:$0x1] %v2904_v63  ;;  %v3987_v60 = vadd.f32 %v3986_v53, %v9343_v39 }
0x1e2d   :  { %v7944_v32 = vpop.eup %7943 }
0x1e2e   :  { %v3988_v11 = vsub.f32 %v9337_v35, %v3987_v60  ;;  %v5067_v58 = vmul.f32 0.6931472, %v7944_v32 }
0x1e30   :  { %3989 = vst [vmem:[#allocation11 + $0x5] sm:$0x1] %v3988_v11  ;;  %v5068_v62 = vadd.f32 %v5067_v58, %v9542_v8 }
0x1e32   :  { %v5069_v50 = vsub.f32 %v9532_v21, %v5068_v62 }
0x1e34   :  { %5070 = vst [vmem:[#allocation11 + $0x7] sm:$0x1] %v5069_v50 }
0x1e35   :  { %8027 = shalt.err (!%p8024_p7)
}
0x1e36   :  { %s8028_s9 = scalar_lea.hbm %s9624_s3, 128 }
0x1e37   :  { %p8029_p8 = scmp.ne.s32.totalorder %s9624_s3, %s8028_s9  ;;  %p8032_p9 = scmp.lt.u32.totalorder %s8028_s9, %s9624_s3 }
0x1e39   :  { %p8034_p10 = pnand %p8032_p9, %p8029_p8 }
0x1e3b   :  { %8037 = shalt.err (!%p8034_p10)
}
0x1e3c   :  { %5102 = dma.vmem_to_hbm [thread:$0]  %s5100_s23, 128, %s9624_s3, [#allocation6]  }
0x1e3d   :  { %s8038_s21 = scalar_lea.hbm %s9625_s4, 16 }
0x1e3e   :  { %p8039_p12 = scmp.ne.s32.totalorder %s9625_s4, %s8038_s21  ;;  %p8042_p13 = scmp.lt.u32.totalorder %s8038_s21, %s9625_s4 }
0x1e40   :  { %p8044_p0 = pnand %p8042_p13, %p8039_p12 }
0x1e48   :  { %s7817_s16 = spop %7816 }
0x1e49   :  { %p5072_p11 = scmp.eq.s32.totalorder %s7817_s16, 1 }
0x1e4b   :  { %s5073_s1 = scalar_select %p5072_p11, 1, 0 }
0x1e4d   :  { %s5076_s18 = ssub.s32 1, %s5073_s1 }
0x1e4e   :  { %s5077_s19 = smul.u32 %s5076_s18, %s5075_s27 }
0x1e50   :  { %s5078_s20 = smul.u32 %s7817_s16, %s5077_s19  ;;  %s5188_s22 = sadd.s32 4294967295, %s5077_s19 }
0x1e51   :  { %s5087_s24 = sadd.s32 %s5077_s19, %s9523_s28 }
0x1e52   :  { %s5080_s25 = sadd.s32 %s5188_s22, %s5078_s20  ;;  %5088 = sst [smem:[#allocation13 + $0x1]] %s5087_s24 }
0x1e53   :  { %5082 = sst [smem:[#allocation12 + $0x7]] %s5080_s25 }
0x1e54   :  { %8047 = shalt.err (!%p8044_p0)
}
0x1e55   :  { %s8080_s0 = smov [#allocation12]   ;;  %s8048_s30 = scalar_lea.hbm %s9626_s5, 16 }
0x1e56   :  { %5110 = dma.smem_to_hbm %s8080_s0, 16, %s9625_s4, [#allocation7]  }
0x1e57   :  { %p8049_p1 = scmp.ne.s32.totalorder %s9626_s5, %s8048_s30  ;;  %p8052_p2 = scmp.lt.u32.totalorder %s8048_s30, %s9626_s5 }
0x1e59   :  { %p8054_p3 = pnand %p8052_p2, %p8049_p1 }
0x1e5b   :  { %8057 = shalt.err (!%p8054_p3)
}
0x1e5c   :  { %s8081_s12 = smov [#allocation13]  }
0x1e5d   :  { %5118 = dma.smem_to_hbm %s8081_s12, 16, %s9626_s5, [#allocation14]  }
0x1e5e   :  { %8062 = dma.done.wait [#allocation6], 128  }
0x1e5f   :  { %8063 = vsyncadd [#allocation6], 4294967168 }
0x1e60   :  { %8064 = dma.done.wait [#allocation7], 16  }
0x1e61   :  { %8065 = vsyncadd [#allocation7], 4294967280 }
0x1e62   :  { %8066 = dma.done.wait [#allocation14], 16  }
0x1e63   :  { %8067 = vsyncadd [#allocation14], 4294967280 }
0x1e64   :  { %5128 = sfence }
0x1e65   :  { %5129 = vsyncpa [#allocation5], 1 }
0x1e66   :  { %5130 = vsyncpa [#allocation9], 1 }
0x1e67   :  { %5131 = vsyncpa [#allocation6], 1 }
0x1e68   :  { %5132 = vsyncpa [#allocation7], 1 }
0x1e69   :  { %5133 = vsyncpa [#allocation14], 1 }

</bundles_post_ra>
